<compile_context>
chip_gen: v5e
topology: v5e:2x2
jax: 0.10.0
libtpu: 0.0.40
codegen_flags: <defaults>
</compile_context>

<pallas_src>
import functools
import math

import numpy as np

import jax
import jax.numpy as jnp
from jax.experimental import pallas as pl
from jax.experimental.pallas import tpu as pltpu

F32 = jnp.float32
BF16 = jnp.bfloat16
LN_EPS = 1e-12
BN_EPS = 1e-5
OUT_LANES = 128     # lane-dense epilogue output slab width

# rows of the packed per-block (7, C) bias table
BC_O, BC_POSU, BC_POSV, BC_PW1A, BC_PW1B, BC_DW, BC_PW2 = range(7)
# rows of the per-block layer-norm tables (5, C)
LN_FFM, LN_MHA, LN_CONV, LN_FF, LN_FIN = range(5)

_ENC_WEIGHT_ORDER = ("ln_g", "ln_b", "w_ff1", "b_ff1", "w_ff2", "b_ff2",
                     "w_qkv", "b_qkv", "w_o", "w_pw1", "w_pw2", "b_c", "dw_w")


def _round_up(x, m):
    return (x + m - 1) // m * m


def _full_spec(arr):
    nd = arr.ndim
    return pl.BlockSpec(arr.shape, lambda *_, _nd=nd: (0,) * _nd)


def _vmem_limit_bytes():
    """Generation-aware scoped-VMEM limit (~75% of physical, capped at 100MiB)."""
    try:
        cap = pltpu.get_tpu_info().vmem_capacity_bytes
    except Exception:  # pragma: no cover - conservative fallback
        cap = 128 * 1024 * 1024
    return int(min(100 * 1024 * 1024, cap * 3 // 4))


# --------------------------------------------------------------------------
# In-kernel helpers
# --------------------------------------------------------------------------
def _mm(a, b):
    """bf16 MXU matmul with f32 accumulation."""
    return jnp.dot(a.astype(BF16), b.astype(BF16), preferred_element_type=F32)


def _layernorm(v, g, b, eps=LN_EPS):
    mu = jnp.mean(v, axis=-1, keepdims=True)
    vc = v - mu
    var = jnp.mean(vc * vc, axis=-1, keepdims=True)
    return vc * jax.lax.rsqrt(var + eps) * g + b


def _rel_shift(bd, T, mode):
    """Transformer-XL rel-shift: out[i, j] = bd[i, T-1-i+j], bd: (T, 2T-1)."""
    P = 2 * T - 1
    if mode == "roll_neg":
        r = pltpu.roll(bd, -(T - 1), axis=1, stride=1, stride_axis=0)
        return r[:, :T]
    if mode == "roll_pos":
        r = pltpu.roll(bd, T - 1, axis=1, stride=-1, stride_axis=0)
        return r[:, :T]
    if mode == "skew":
        z = jnp.zeros((T, 1), bd.dtype)
        p = jnp.concatenate([z, bd], axis=1)          # (T, 2T)
        p = p.reshape(2 * T, T)[1:, :]                # (2T-1, T)
        return p.reshape(T, P)[:, :T]
    # "slice" reference fallback (always correct, O(T) slices)
    return jnp.concatenate(
        [bd[i:i + 1, T - 1 - i:P - i] for i in range(T)], axis=0)


# --------------------------------------------------------------------------
# One-off rel-shift lowering probe (run OUTSIDE jit): picks the cheapest
# implementation (XLU roll > skew reshapes > per-row slices) that is
# bit-correct on this backend; the guaranteed fallback is the slice form.
# --------------------------------------------------------------------------
def _rel_shift_probe_kernel(x_ref, o_ref, *, T, mode):
    o_ref[...] = _rel_shift(x_ref[...], T, mode)


_REL_SHIFT_CACHE = {}


def select_rel_shift_mode(T):
    if T in _REL_SHIFT_CACHE:
        return _REL_SHIFT_CACHE[T]
    bd = np.arange(T * (2 * T - 1), dtype=np.float32).reshape(T, 2 * T - 1)
    ref = np.stack([bd[i, T - 1 - i:2 * T - 1 - i] for i in range(T)], axis=0)
    mode = "slice"
    for cand in ("roll_neg", "roll_pos", "skew"):
        try:
            out = pl.pallas_call(
                functools.partial(_rel_shift_probe_kernel, T=T, mode=cand),
                out_shape=jax.ShapeDtypeStruct((T, T), jnp.float32),
            )(jnp.asarray(bd))
            if np.allclose(np.asarray(jax.block_until_ready(out)), ref):
                mode = cand
                break
        except Exception:
            continue
    _REL_SHIFT_CACHE[T] = mode
    return mode


# --------------------------------------------------------------------------
# Fused encoder kernel: grid = (batch, block).  The activation is carried in
# the VMEM-resident output block across the "arbitrary" block axis.
# --------------------------------------------------------------------------
def _encoder_kernel(feat_ref, mask_ref, pre_w_ref, pre_b_ref, pproj_ref,
                    ln_g_ref, ln_b_ref, w_ff1_ref, b_ff1_ref, w_ff2_ref,
                    b_ff2_ref, w_qkv_ref, b_qkv_ref, w_o_ref, w_pw1_ref,
                    w_pw2_ref, b_c_ref, dw_w_ref, o_ref,
                    *, T, C, LU, H, d_k, K_dw, L, xscale, shift_mode):
    j = pl.program_id(1)

    # ---- block step 0: pre linear + RelPositionalEncoding x-scale ----
    @pl.when(j == 0)
    def _():
        x0 = jnp.dot(feat_ref[0], pre_w_ref[...], preferred_element_type=F32)
        o_ref[0] = (x0 + pre_b_ref[...]) * xscale

    x = o_ref[0]                          # carried activation (T, C) f32

    # ---- hoisted masks ----
    key_mask = mask_ref[0]                                  # (1, T)
    neg_mask = (key_mask - 1.0) * 1e30                      # 0 valid / -1e30 padded
    if L < T:
        t_iota = jax.lax.broadcasted_iota(jnp.int32, (T, 1), 0)
        row_mask = (t_iota < L).astype(F32)                 # (T, 1)
    else:
        row_mask = None

    ln_g = ln_g_ref[0]                    # (5, C)
    ln_b = ln_b_ref[0]
    b_c = b_c_ref[0]                      # (7, C)
    b_ff1 = b_ff1_ref[0]                  # (2, LU)
    b_ff2 = b_ff2_ref[0]                  # (2, C)
    b_qkv = b_qkv_ref[0]                  # (1, 3C)
    dw = dw_w_ref[0]                      # (K_dw, C)
    pproj = pproj_ref[0]                  # (2T-1, C) bf16 (hoisted pe @ w_pos)

    def ln(v, idx):
        return _layernorm(v, ln_g[idx:idx + 1, :], ln_b[idx:idx + 1, :])

    def mask_rows(v):
        return v if row_mask is None else v * row_mask

    def taps(v, k_taps):
        """im2col: one zero-padded buffer, static sublane slices, lane concat."""
        pad = (k_taps - 1) // 2
        zp = jnp.zeros((pad, v.shape[1]), v.dtype)
        vp = jnp.concatenate([zp, v, zp], axis=0)           # (T + k - 1, Cv)
        return jnp.concatenate([vp[k:k + T, :] for k in range(k_taps)], axis=1)

    def ff_module(v, widx):
        """MultiLayeredConv1d: conv(k=3) -> ReLU -> conv(k=3) as 2 im2col matmuls."""
        h1 = _mm(taps(mask_rows(v), 3), w_ff1_ref[0, widx]) + b_ff1[widx:widx + 1, :]
        h1 = jnp.maximum(h1, 0.0)
        return _mm(taps(mask_rows(h1), 3), w_ff2_ref[0, widx]) + b_ff2[widx:widx + 1, :]

    # ---- macaron feed-forward (0.5 scale) ----
    x = x + 0.5 * ff_module(ln(x, LN_FFM), 0)

    # ---- relative-position multi-headed self-attention ----
    xn = ln(x, LN_MHA)
    qkv = _mm(xn, w_qkv_ref[0]) + b_qkv                     # fused QKV (T, 3C)
    inv_sqrt = 1.0 / math.sqrt(d_k)
    dn = (((1,), (1,)), ((), ()))                           # contract last dims
    ctx_heads = []
    for h in range(H):                                      # H == 2 in this model
        lo, hi = h * d_k, (h + 1) * d_k
        qh = qkv[:, lo:hi]
        kh = qkv[:, C + lo:C + hi].astype(BF16)
        vh = qkv[:, 2 * C + lo:2 * C + hi]
        q_u = ((qh + b_c[BC_POSU:BC_POSU + 1, lo:hi]) * inv_sqrt).astype(BF16)
        q_v = ((qh + b_c[BC_POSV:BC_POSV + 1, lo:hi]) * inv_sqrt).astype(BF16)
        ac = jax.lax.dot_general(q_u, kh, dn, preferred_element_type=F32)      # (T, T)
        bd = jax.lax.dot_general(q_v, pproj[:, lo:hi], dn,
                                 preferred_element_type=F32)                   # (T, 2T-1)
        s = ac + _rel_shift(bd, T, shift_mode) + neg_mask
        m = jnp.max(s, axis=-1, keepdims=True)
        e = jnp.exp(s - m)
        p = e * pl.reciprocal(jnp.sum(e, axis=-1, keepdims=True), approx=True)
        ctx_heads.append(_mm(p, vh))                        # (T, d_k)
    ctx = jnp.concatenate(ctx_heads, axis=-1)               # (T, C)
    x = x + _mm(ctx, w_o_ref[0]) + b_c[BC_O:BC_O + 1, :]

    # ---- conv module: pw(GLU, fused) -> depthwise(31)+BN(folded) -> swish -> pw ----
    xn = ln(x, LN_CONV)
    b_pw1 = jnp.concatenate(
        [b_c[BC_PW1A:BC_PW1A + 1, :], b_c[BC_PW1B:BC_PW1B + 1, :]], axis=1)
    ag = _mm(xn, w_pw1_ref[0]) + b_pw1                      # one (C, 2C) MXU pass
    u = mask_rows(ag[:, :C] * jax.nn.sigmoid(ag[:, C:]))    # GLU
    pad = (K_dw - 1) // 2
    zp = jnp.zeros((pad, C), F32)
    up = jnp.concatenate([zp, u, zp], axis=0)               # single padded buffer
    acc = jnp.zeros((T, C), F32)
    for k in range(K_dw):
        dt = k - pad
        if dt <= -L or dt >= L:
            continue                                        # taps only on zero padding
        acc = acc + up[k:k + T, :] * dw[k:k + 1, :]
    acc = acc + b_c[BC_DW:BC_DW + 1, :]                     # folded BN bias
    acc = acc * jax.nn.sigmoid(acc)                         # swish
    x = x + _mm(acc, w_pw2_ref[0]) + b_c[BC_PW2:BC_PW2 + 1, :]

    # ---- feed-forward (0.5 scale) + per-block final LN ----
    x = x + 0.5 * ff_module(ln(x, LN_FF), 1)
    o_ref[0] = ln(x, LN_FIN)


# --------------------------------------------------------------------------
# Epilogue kernel: after_norm -> post linear -> postnet -> residual.
# Both outputs are packed into one lane-dense (T, 128) slab.
# --------------------------------------------------------------------------
def _epilogue_kernel(*refs, T, L, n_pn):
    h_ref, g_ref, b_ref, pw_ref, pb_ref = refs[:5]
    pn_refs = refs[5:5 + 2 * n_pn]
    out_ref = refs[5 + 2 * n_pn]

    if L < T:
        t_iota = jax.lax.broadcasted_iota(jnp.int32, (T, 1), 0)
        row_mask = (t_iota < L).astype(F32)
    else:
        row_mask = None

    def mask_rows(v):
        return v if row_mask is None else v * row_mask

    xn = _layernorm(h_ref[0], g_ref[...], b_ref[...])       # after_norm
    out1 = _mm(xn, pw_ref[...]) + pb_ref[...]               # post linear (T, 2)

    pn = out1
    for li in range(n_pn):
        w_r = pn_refs[2 * li]
        bias = pn_refs[2 * li + 1][...]
        cin = pn.shape[1]
        kc, _ = w_r.shape
        K = kc // cin
        pad = (K - 1) // 2
        src = mask_rows(pn)
        zp = jnp.zeros((pad, cin), F32)
        sp = jnp.concatenate([zp, src, zp], axis=0)          # (T + K - 1, cin)
        cat = jnp.concatenate([sp[k:k + T, :] for k in range(K)], axis=1)
        acc = _mm(cat, w_r[...]) + bias                      # im2col conv + folded BN
        if li != n_pn - 1:
            acc = jnp.tanh(acc)
        pn = acc

    out2 = (out1 + pn) if n_pn > 0 else out1
    fill = jnp.zeros((T, OUT_LANES - 4), F32)
    out_ref[0] = jnp.concatenate([out1, out2, fill], axis=1)  # lane-dense store


# --------------------------------------------------------------------------
# pallas_call wrappers
# --------------------------------------------------------------------------
def conformer_encoder(feat, mask3, pproj, pre_w, pre_b, enc, *, H, d_k, L, shift_mode):
    B, T, IN = feat.shape
    nb, _, C = enc["ln_g"].shape
    LU = enc["b_ff1"].shape[-1]
    K_dw = enc["dw_w"].shape[1]

    kernel = functools.partial(
        _encoder_kernel, T=T, C=C, LU=LU, H=H, d_k=d_k, K_dw=K_dw, L=L,
        xscale=math.sqrt(C), shift_mode=shift_mode)

    in_specs = [
        pl.BlockSpec((1, T, IN), lambda b, j: (b, 0, 0)),     # feat (used at j==0)
        pl.BlockSpec((1, 1, T), lambda b, j: (b, 0, 0)),      # key mask
        pl.BlockSpec(pre_w.shape, lambda b, j: (0, 0)),       # pre linear
        pl.BlockSpec(pre_b.shape, lambda b, j: (0, 0)),
        pl.BlockSpec((1,) + pproj.shape[1:], lambda b, j: (j, 0, 0)),  # hoisted pproj
    ]
    weight_args = []
    for name in _ENC_WEIGHT_ORDER:                            # per-block weight stream
        a = enc[name]
        in_specs.append(pl.BlockSpec(
            (1,) + a.shape[1:], lambda b, j, _n=a.ndim - 1: (j,) + (0,) * _n))
        weight_args.append(a)

    return pl.pallas_call(
        kernel,
        out_shape=jax.ShapeDtypeStruct((B, T, C), F32),
        grid=(B, nb),
        in_specs=in_specs,
        out_specs=pl.BlockSpec((1, T, C), lambda b, j: (b, 0, 0)),
        compiler_params=pltpu.CompilerParams(
            dimension_semantics=("parallel", "arbitrary"),
            vmem_limit_bytes=_vmem_limit_bytes()),
    )(feat, mask3, pre_w, pre_b, pproj, *weight_args)


def encoder_epilogue(h, after_g, after_b, post_w, post_b, postnet, *, L):
    B, T, C = h.shape
    n_pn = len(postnet)
    inputs = [h, after_g, after_b, post_w, post_b]
    for layer in postnet:
        inputs += [layer["w"], layer["b"]]
    in_specs = [pl.BlockSpec((1, T, C), lambda i: (i, 0, 0))]
    in_specs += [_full_spec(a) for a in inputs[1:]]
    kernel = functools.partial(_epilogue_kernel, T=T, L=L, n_pn=n_pn)
    slab = pl.pallas_call(
        kernel,
        out_shape=jax.ShapeDtypeStruct((B, T, OUT_LANES), F32),
        grid=(B,),
        in_specs=in_specs,
        out_specs=pl.BlockSpec((1, T, OUT_LANES), lambda i: (i, 0, 0)),
        compiler_params=pltpu.CompilerParams(
            dimension_semantics=("parallel",),
            vmem_limit_bytes=_vmem_limit_bytes()),
    )(*inputs)
    return slab[:, :, 0:2], slab[:, :, 2:4]


# --------------------------------------------------------------------------
# Positional encoding table (ESPnet RelPositionalEncoding)
# --------------------------------------------------------------------------
def rel_positional_encoding(T, d):
    pos = jnp.arange(T, dtype=F32)[:, None]
    div = jnp.exp(jnp.arange(0, d, 2, dtype=F32) * -(math.log(10000.0) / d))
    pe_pos = jnp.zeros((T, d), F32)
    pe_pos = pe_pos.at[:, 0::2].set(jnp.sin(pos * div))
    pe_pos = pe_pos.at[:, 1::2].set(jnp.cos(pos * div))
    pe_neg = jnp.zeros((T, d), F32)
    pe_neg = pe_neg.at[:, 0::2].set(jnp.sin(-pos * div))
    pe_neg = pe_neg.at[:, 1::2].set(jnp.cos(-pos * div))
    return jnp.concatenate([pe_pos[::-1], pe_neg[1:]], axis=0)   # (2T-1, d)


# --------------------------------------------------------------------------
# Parameter init (deterministic, synthetic) with packed per-block layout.
# k=3 / k=5 conv weights are im2col-packed tap-major:
#   packed[(k*cin + c), o] == torch_weight[o, c, k]
# --------------------------------------------------------------------------
def init_params(key, cfg):
    H = cfg["heads"]
    hid = cfg["hidden_size"]
    lu = hid * 4
    d_k = hid // H
    ph = cfg["phoneme_embedding_size"]
    sp = cfg["speaker_embedding_size"]
    in_size = 1 + ph + sp
    K_dw = cfg["cnn_kernel"]
    nb = cfg["block_num"]

    keys = iter(jax.random.split(key, 4096))

    def w(shape, scale=0.1):
        return (scale * jax.random.normal(next(keys), shape)).astype(F32)

    zeros = lambda s: jnp.zeros(s, F32)
    ones = lambda s: jnp.ones(s, F32)

    # eval-mode BatchNorm with freshly-initialized stats/affine, folded:
    bn_gamma, bn_beta, bn_mean, bn_var = 1.0, 0.0, 0.0, 1.0
    bn_scale = bn_gamma / math.sqrt(bn_var + BN_EPS)
    bn_bias = bn_beta - bn_mean * bn_scale

    params = {
        "spk_emb": w((cfg["speaker_size"], sp)),
        "ph_emb": w((cfg["phoneme_size"], ph)),
        "pre_w": w((in_size, hid)).astype(BF16), "pre_b": zeros((1, hid)),
        "after_g": ones((1, hid)), "after_b": zeros((1, hid)),
        "post_w": w((hid, 2)).astype(BF16), "post_b": zeros((1, 2)),
    }

    def per_block(fn):
        return jnp.stack([fn() for _ in range(nb)], axis=0)

    dw_bias_row = jnp.full((hid,), (0.0 - bn_mean) * bn_scale + bn_beta, F32)

    def make_b_c():
        return jnp.stack([
            zeros((hid,)),          # BC_O     attention output bias
            w((H * d_k,)),          # BC_POSU  pos_bias_u (flattened over heads)
            w((H * d_k,)),          # BC_POSV  pos_bias_v
            zeros((hid,)),          # BC_PW1A  GLU "a" bias
            zeros((hid,)),          # BC_PW1B  GLU gate bias
            dw_bias_row,            # BC_DW    depthwise conv bias with folded BN
            zeros((hid,)),          # BC_PW2
        ], axis=0)

    params["enc"] = {
        "ln_g": jnp.ones((nb, 5, hid), F32),
        "ln_b": jnp.zeros((nb, 5, hid), F32),
        "w_ff1": per_block(lambda: w((2, 3 * hid, lu))).astype(BF16),   # im2col k=3
        "b_ff1": jnp.zeros((nb, 2, lu), F32),
        "w_ff2": per_block(lambda: w((2, 3 * lu, hid))).astype(BF16),   # im2col k=3
        "b_ff2": jnp.zeros((nb, 2, hid), F32),
        "w_qkv": per_block(lambda: w((hid, 3 * hid))).astype(BF16),     # fused QKV
        "b_qkv": jnp.zeros((nb, 1, 3 * hid), F32),
        "w_pos": per_block(lambda: w((hid, hid))).astype(BF16),         # used in wrapper
        "w_o": per_block(lambda: w((hid, hid))).astype(BF16),
        "w_pw1": per_block(lambda: w((hid, 2 * hid))).astype(BF16),     # GLU a||gate fused
        "w_pw2": per_block(lambda: w((hid, hid))).astype(BF16),
        "b_c": per_block(make_b_c),
        "dw_w": per_block(lambda: w((K_dw, hid))) * bn_scale,           # BN scale folded
    }

    # Postnet: Conv1d(k=5, no bias) + BatchNorm (eval, folded) + Tanh (except last)
    layers = []
    n_layers = cfg["post_layer_num"]
    chans = hid
    for li in range(n_layers):
        cin = 2 if li == 0 else chans
        cout = 2 if li == n_layers - 1 else chans
        layers.append({
            "w": (w((5 * cin, cout)) * bn_scale).astype(BF16),          # im2col k=5
            "b": jnp.full((1, cout), bn_bias, F32),
        })
    params["postnet"] = layers
    return params


# --------------------------------------------------------------------------
# Full forward pass
# --------------------------------------------------------------------------
def predictor_forward(params, f0_list, phoneme_list, speaker_id, cfg):
    H = cfg["heads"]
    hid = cfg["hidden_size"]
    d_k = hid // H

    lengths = [int(t.shape[0]) for t in f0_list]
    B = len(f0_list)
    L = max(lengths)
    Tpad = _round_up(max(L, 8), 8)

    # pad_sequence equivalents (padded layout kept throughout)
    f0 = jnp.zeros((B, Tpad, 1), F32)
    phon = jnp.zeros((B, Tpad), jnp.int32)
    for i in range(B):
        f0 = f0.at[i, :lengths[i]].set(f0_list[i].astype(F32))
        phon = phon.at[i, :lengths[i]].set(phoneme_list[i].astype(jnp.int32))

    # embedding lookups (gathers kept as thin XLA glue)
    ph_emb = jnp.take(params["ph_emb"], phon, axis=0)                        # (B,T,ph)
    spk = jnp.take(params["spk_emb"], speaker_id.astype(jnp.int32), axis=0)  # (B,sp)
    spk = jnp.broadcast_to(spk[:, None, :], (B, Tpad, spk.shape[-1]))
    feat = jnp.concatenate([f0, ph_emb, spk], axis=-1).astype(BF16)          # (B,T,in)

    len_arr = jnp.array(lengths, jnp.int32)
    mask3 = (jnp.arange(Tpad)[None, :] < len_arr[:, None]).astype(F32)[:, None, :]

    # batch-invariant positional projection, hoisted out of the kernel grid
    pe = rel_positional_encoding(Tpad, hid)                                  # (2T-1, C)
    pproj = jnp.einsum("pc,ncd->npd", pe,
                       params["enc"]["w_pos"].astype(F32)).astype(BF16)      # (nb,2T-1,C)

    shift_mode = _REL_SHIFT_CACHE.get(Tpad, "slice")

    h = conformer_encoder(feat, mask3, pproj, params["pre_w"], params["pre_b"],
                          params["enc"], H=H, d_k=d_k, L=L, shift_mode=shift_mode)

    out1, out2 = encoder_epilogue(h, params["after_g"], params["after_b"],
                                  params["post_w"], params["post_b"],
                                  params["postnet"], L=L)

    out1_list = [out1[i, :lengths[i]] for i in range(B)]
    out2_list = [out2[i, :lengths[i]] for i in range(B)]
    return out1_list, out2_list


# --------------------------------------------------------------------------
if __name__ == "__main__":
    cfg = dict(
        speaker_size=4,
        speaker_embedding_size=4,
        phoneme_size=10,
        phoneme_embedding_size=8,
        hidden_size=32,
        block_num=2,
        post_layer_num=2,
        heads=2,
        cnn_kernel=31,
    )

    root = jax.random.PRNGKey(0)
    k_params, k_f0, k_ph = jax.random.split(root, 3)
    params = init_params(k_params, cfg)

    lengths = [8, 6]
    f0_list = [jax.random.normal(jax.random.fold_in(k_f0, i), (l, 1), F32)
               for i, l in enumerate(lengths)]
    phoneme_list = [jax.random.randint(jax.random.fold_in(k_ph, i), (l,), 0,
                                       cfg["phoneme_size"], dtype=jnp.int32)
                    for i, l in enumerate(lengths)]
    speaker_id = jnp.array([0, 2], dtype=jnp.int32)

    # pick the cheapest bit-correct rel-shift lowering for this Tpad (outside jit)
    select_rel_shift_mode(_round_up(max(max(lengths), 8), 8))

    forward = jax.jit(functools.partial(predictor_forward, cfg=cfg))
    out1_list, out2_list = forward(params, f0_list, phoneme_list, speaker_id)
    jax.block_until_ready((out1_list, out2_list))

    assert [tuple(o.shape) for o in out1_list] == [(8, 2), (6, 2)]
    assert [tuple(o.shape) for o in out2_list] == [(8, 2), (6, 2)]
    for o in out1_list + out2_list:
        assert bool(jnp.isfinite(o).all())
    print("KERNEL_OK")
</pallas_src>

<mosaic_0001>
module attributes {stable_mosaic.version = 11 : i64} {
  func.func @_rel_shift_probe_kernel(%arg0: memref<8x15xf32, #tpu.memory_space<vmem>>, %arg1: memref<8x8xf32, #tpu.memory_space<vmem>>) attributes {dimension_semantics = [], scalar_prefetch = 0 : i64, scratch_operands = 0 : i64, tpu.core_type = #tpu.core_type<tc>} {
    %c0 = arith.constant 0 : index
    %c0_0 = arith.constant 0 : index
    %0 = vector.load %arg0[%c0, %c0_0] : memref<8x15xf32, #tpu.memory_space<vmem>>, vector<8x15xf32>
    %cst = arith.constant 0.000000e+00 : f32
    %1 = vector.broadcast %cst : f32 to vector<8x1xf32>
    %2 = tpu.concatenate %1, %0 in 1 : vector<8x1xf32>, vector<8x15xf32> -> vector<8x16xf32>
    %3 = vector.shape_cast %2 : vector<8x16xf32> to vector<16x8xf32>
    %4 = vector.extract_strided_slice %3 {offsets = [1, 0], sizes = [15, 8], strides = [1, 1]} : vector<16x8xf32> to vector<15x8xf32>
    %5 = vector.shape_cast %4 : vector<15x8xf32> to vector<8x15xf32>
    %6 = vector.extract_strided_slice %5 {offsets = [0, 0], sizes = [8, 8], strides = [1, 1]} : vector<8x15xf32> to vector<8x8xf32>
    %c0_1 = arith.constant 0 : index
    %c0_2 = arith.constant 0 : index
    %7 = vector.load %arg1[%c0_1, %c0_2] : memref<8x8xf32, #tpu.memory_space<vmem>>, vector<8x8xf32>
    tpu.vector_store %arg1[%c0_1, %c0_2], %6 {strides = array<i32>} : memref<8x8xf32, #tpu.memory_space<vmem>>, vector<8x8xf32>,
    return
  }
}

module attributes {stable_mosaic.version = 11 : i64} {
  func.func @_encoder_kernel(%arg0: i32, %arg1: i32, %arg2: memref<1x8x13xbf16, #tpu.memory_space<vmem>>, %arg3: memref<1x1x8xf32, #tpu.memory_space<vmem>>, %arg4: memref<13x32xbf16, #tpu.memory_space<vmem>>, %arg5: memref<1x32xf32, #tpu.memory_space<vmem>>, %arg6: memref<1x15x32xbf16, #tpu.memory_space<vmem>>, %arg7: memref<1x5x32xf32, #tpu.memory_space<vmem>>, %arg8: memref<1x5x32xf32, #tpu.memory_space<vmem>>, %arg9: memref<1x2x96x128xbf16, #tpu.memory_space<vmem>>, %arg10: memref<1x2x128xf32, #tpu.memory_space<vmem>>, %arg11: memref<1x2x384x32xbf16, #tpu.memory_space<vmem>>, %arg12: memref<1x2x32xf32, #tpu.memory_space<vmem>>, %arg13: memref<1x32x96xbf16, #tpu.memory_space<vmem>>, %arg14: memref<1x1x96xf32, #tpu.memory_space<vmem>>, %arg15: memref<1x32x32xbf16, #tpu.memory_space<vmem>>, %arg16: memref<1x32x64xbf16, #tpu.memory_space<vmem>>, %arg17: memref<1x32x32xbf16, #tpu.memory_space<vmem>>, %arg18: memref<1x7x32xf32, #tpu.memory_space<vmem>>, %arg19: memref<1x31x32xf32, #tpu.memory_space<vmem>>, %arg20: memref<1x8x32xf32, #tpu.memory_space<vmem>>) attributes {dimension_semantics = [#tpu.dimension_semantics<parallel>, #tpu.dimension_semantics<arbitrary>], iteration_bounds = array<i64: 2, 2>, scalar_prefetch = 0 : i64, scratch_operands = 0 : i64, tpu.core_type = #tpu.core_type<tc>, window_params = [{transform_indices = @transform_0, window_bounds = array<i64: 1, 8, 13>}, {transform_indices = @transform_1, window_bounds = array<i64: 1, 1, 8>}, {pipeline_mode = #tpu.pipeline_mode<synchronous>, transform_indices = @transform_2, window_bounds = array<i64: 13, 32>}, {pipeline_mode = #tpu.pipeline_mode<synchronous>, transform_indices = @transform_3, window_bounds = array<i64: 1, 32>}, {transform_indices = @transform_4, window_bounds = array<i64: 1, 15, 32>}, {transform_indices = @transform_5, window_bounds = array<i64: 1, 5, 32>}, {transform_indices = @transform_6, window_bounds = array<i64: 1, 5, 32>}, {transform_indices = @transform_7, window_bounds = array<i64: 1, 2, 96, 128>}, {transform_indices = @transform_8, window_bounds = array<i64: 1, 2, 128>}, {transform_indices = @transform_9, window_bounds = array<i64: 1, 2, 384, 32>}, {transform_indices = @transform_10, window_bounds = array<i64: 1, 2, 32>}, {transform_indices = @transform_11, window_bounds = array<i64: 1, 32, 96>}, {transform_indices = @transform_12, window_bounds = array<i64: 1, 1, 96>}, {transform_indices = @transform_13, window_bounds = array<i64: 1, 32, 32>}, {transform_indices = @transform_14, window_bounds = array<i64: 1, 32, 64>}, {transform_indices = @transform_15, window_bounds = array<i64: 1, 32, 32>}, {transform_indices = @transform_16, window_bounds = array<i64: 1, 7, 32>}, {transform_indices = @transform_17, window_bounds = array<i64: 1, 31, 32>}, {transform_indices = @transform_18, window_bounds = array<i64: 1, 8, 32>}]} {
    %c0_i32 = arith.constant 0 : i32
    %0 = arith.cmpi eq, %arg1, %c0_i32 : i32
    %1 = arith.extui %0 : i1 to i32
    %c0_i32_0 = arith.constant 0 : i32
    %2 = arith.cmpi ne, %1, %c0_i32_0 : i32
    scf.if %2 {
      %c0_120 = arith.constant 0 : index
      %c0_121 = arith.constant 0 : index
      %c0_122 = arith.constant 0 : index
      %417 = vector.load %arg2[%c0_120, %c0_121, %c0_122] : memref<1x8x13xbf16, #tpu.memory_space<vmem>>, vector<1x8x13xbf16>
      %418 = vector.shape_cast %417 : vector<1x8x13xbf16> to vector<8x13xbf16>
      %c0_123 = arith.constant 0 : index
      %c0_124 = arith.constant 0 : index
      %419 = vector.load %arg4[%c0_123, %c0_124] : memref<13x32xbf16, #tpu.memory_space<vmem>>, vector<13x32xbf16>
      %cst_125 = arith.constant dense<0.000000e+00> : vector<8x32xf32>
      %420 = tpu.matmul %418, %419, %cst_125 {dimension_numbers = #tpu.dot_dimension_numbers<[1], [0], [0], [1], [0, 0, 1, 1], [], []>} : vector<8x13xbf16>, vector<13x32xbf16>, vector<8x32xf32> -> vector<8x32xf32>
      %c0_126 = arith.constant 0 : index
      %c0_127 = arith.constant 0 : index
      %421 = vector.load %arg5[%c0_126, %c0_127] : memref<1x32xf32, #tpu.memory_space<vmem>>, vector<1x32xf32>
      %422 = vector.broadcast %421 : vector<1x32xf32> to vector<8x32xf32>
      %423 = arith.addf %420, %422 : vector<8x32xf32>
      %cst_128 = arith.constant 5.65685415 : f32
      %424 = vector.broadcast %cst_128 : f32 to vector<8x32xf32>
      %425 = arith.mulf %423, %424 : vector<8x32xf32>
      %c0_129 = arith.constant 0 : index
      %c0_130 = arith.constant 0 : index
      %c0_131 = arith.constant 0 : index
      %426 = vector.load %arg20[%c0_129, %c0_130, %c0_131] : memref<1x8x32xf32, #tpu.memory_space<vmem>>, vector<1x8x32xf32>
      %427 = vector.shape_cast %426 : vector<1x8x32xf32> to vector<8x32xf32>
      %428 = vector.shape_cast %425 : vector<8x32xf32> to vector<1x8x32xf32>
      tpu.vector_store %arg20[%c0_129, %c0_130, %c0_131], %428 {strides = array<i32>} : memref<1x8x32xf32, #tpu.memory_space<vmem>>, vector<1x8x32xf32>,
    } else {
    }
    %c0 = arith.constant 0 : index
    %c0_1 = arith.constant 0 : index
    %c0_2 = arith.constant 0 : index
    %3 = vector.load %arg20[%c0, %c0_1, %c0_2] : memref<1x8x32xf32, #tpu.memory_space<vmem>>, vector<1x8x32xf32>
    %4 = vector.shape_cast %3 : vector<1x8x32xf32> to vector<8x32xf32>
    %c0_3 = arith.constant 0 : index
    %c0_4 = arith.constant 0 : index
    %c0_5 = arith.constant 0 : index
    %5 = vector.load %arg3[%c0_3, %c0_4, %c0_5] : memref<1x1x8xf32, #tpu.memory_space<vmem>>, vector<1x1x8xf32>
    %6 = vector.shape_cast %5 : vector<1x1x8xf32> to vector<1x8xf32>
    %cst = arith.constant 1.000000e+00 : f32
    %7 = vector.broadcast %cst : f32 to vector<1x8xf32>
    %8 = arith.subf %6, %7 : vector<1x8xf32>
    %cst_6 = arith.constant 1.000000e+30 : f32
    %9 = vector.broadcast %cst_6 : f32 to vector<1x8xf32>
    %10 = arith.mulf %8, %9 : vector<1x8xf32>
    %c0_7 = arith.constant 0 : index
    %c0_8 = arith.constant 0 : index
    %c0_9 = arith.constant 0 : index
    %11 = vector.load %arg7[%c0_7, %c0_8, %c0_9] : memref<1x5x32xf32, #tpu.memory_space<vmem>>, vector<1x5x32xf32>
    %12 = vector.shape_cast %11 : vector<1x5x32xf32> to vector<5x32xf32>
    %c0_10 = arith.constant 0 : index
    %c0_11 = arith.constant 0 : index
    %c0_12 = arith.constant 0 : index
    %13 = vector.load %arg8[%c0_10, %c0_11, %c0_12] : memref<1x5x32xf32, #tpu.memory_space<vmem>>, vector<1x5x32xf32>
    %14 = vector.shape_cast %13 : vector<1x5x32xf32> to vector<5x32xf32>
    %c0_13 = arith.constant 0 : index
    %c0_14 = arith.constant 0 : index
    %c0_15 = arith.constant 0 : index
    %15 = vector.load %arg18[%c0_13, %c0_14, %c0_15] : memref<1x7x32xf32, #tpu.memory_space<vmem>>, vector<1x7x32xf32>
    %16 = vector.shape_cast %15 : vector<1x7x32xf32> to vector<7x32xf32>
    %c0_16 = arith.constant 0 : index
    %c0_17 = arith.constant 0 : index
    %c0_18 = arith.constant 0 : index
    %17 = vector.load %arg10[%c0_16, %c0_17, %c0_18] : memref<1x2x128xf32, #tpu.memory_space<vmem>>, vector<1x2x128xf32>
    %18 = vector.shape_cast %17 : vector<1x2x128xf32> to vector<2x128xf32>
    %c0_19 = arith.constant 0 : index
    %c0_20 = arith.constant 0 : index
    %c0_21 = arith.constant 0 : index
    %19 = vector.load %arg12[%c0_19, %c0_20, %c0_21] : memref<1x2x32xf32, #tpu.memory_space<vmem>>, vector<1x2x32xf32>
    %20 = vector.shape_cast %19 : vector<1x2x32xf32> to vector<2x32xf32>
    %c0_22 = arith.constant 0 : index
    %c0_23 = arith.constant 0 : index
    %c0_24 = arith.constant 0 : index
    %21 = vector.load %arg14[%c0_22, %c0_23, %c0_24] : memref<1x1x96xf32, #tpu.memory_space<vmem>>, vector<1x1x96xf32>
    %22 = vector.shape_cast %21 : vector<1x1x96xf32> to vector<1x96xf32>
    %c0_25 = arith.constant 0 : index
    %c0_26 = arith.constant 0 : index
    %c0_27 = arith.constant 0 : index
    %23 = vector.load %arg19[%c0_25, %c0_26, %c0_27] : memref<1x31x32xf32, #tpu.memory_space<vmem>>, vector<1x31x32xf32>
    %24 = vector.shape_cast %23 : vector<1x31x32xf32> to vector<31x32xf32>
    %c0_28 = arith.constant 0 : index
    %c0_29 = arith.constant 0 : index
    %c0_30 = arith.constant 0 : index
    %25 = vector.load %arg6[%c0_28, %c0_29, %c0_30] : memref<1x15x32xbf16, #tpu.memory_space<vmem>>, vector<1x15x32xbf16>
    %26 = vector.shape_cast %25 : vector<1x15x32xbf16> to vector<15x32xbf16>
    %27 = vector.extract_strided_slice %12 {offsets = [0, 0], sizes = [1, 32], strides = [1, 1]} : vector<5x32xf32> to vector<1x32xf32>
    %28 = vector.extract_strided_slice %14 {offsets = [0, 0], sizes = [1, 32], strides = [1, 1]} : vector<5x32xf32> to vector<1x32xf32>
    %cst_31 = arith.constant dense<0.000000e+00> : vector<8xf32>
    %29 = vector.multi_reduction <add>, %4, %cst_31 [1] : vector<8x32xf32> to vector<8xf32>
    %30 = vector.shape_cast %29 : vector<8xf32> to vector<8x1xf32>
    %cst_32 = arith.constant 3.200000e+01 : f32
    %31 = vector.broadcast %cst_32 : f32 to vector<8x1xf32>
    %32 = arith.divf %30, %31 : vector<8x1xf32>
    %33 = vector.broadcast %32 : vector<8x1xf32> to vector<8x32xf32>
    %34 = arith.subf %4, %33 : vector<8x32xf32>
    %35 = arith.mulf %34, %34 : vector<8x32xf32>
    %cst_33 = arith.constant dense<0.000000e+00> : vector<8xf32>
    %36 = vector.multi_reduction <add>, %35, %cst_33 [1] : vector<8x32xf32> to vector<8xf32>
    %37 = vector.shape_cast %36 : vector<8xf32> to vector<8x1xf32>
    %cst_34 = arith.constant 3.200000e+01 : f32
    %38 = vector.broadcast %cst_34 : f32 to vector<8x1xf32>
    %39 = arith.divf %37, %38 : vector<8x1xf32>
    %cst_35 = arith.constant 9.99999996E-13 : f32
    %40 = vector.broadcast %cst_35 : f32 to vector<8x1xf32>
    %41 = arith.addf %39, %40 : vector<8x1xf32>
    %42 = math.rsqrt %41 : vector<8x1xf32>
    %43 = vector.broadcast %42 : vector<8x1xf32> to vector<8x32xf32>
    %44 = arith.mulf %34, %43 : vector<8x32xf32>
    %45 = vector.broadcast %27 : vector<1x32xf32> to vector<8x32xf32>
    %46 = arith.mulf %44, %45 : vector<8x32xf32>
    %47 = vector.broadcast %28 : vector<1x32xf32> to vector<8x32xf32>
    %48 = arith.addf %46, %47 : vector<8x32xf32>
    %cst_36 = arith.constant 0.000000e+00 : f32
    %49 = vector.broadcast %cst_36 : f32 to vector<1x32xf32>
    %50 = tpu.concatenate %49, %48, %49 in 0 : vector<1x32xf32>, vector<8x32xf32>, vector<1x32xf32> -> vector<10x32xf32>
    %51 = vector.extract_strided_slice %50 {offsets = [0, 0], sizes = [8, 32], strides = [1, 1]} : vector<10x32xf32> to vector<8x32xf32>
    %52 = vector.extract_strided_slice %50 {offsets = [1, 0], sizes = [8, 32], strides = [1, 1]} : vector<10x32xf32> to vector<8x32xf32>
    %53 = vector.extract_strided_slice %50 {offsets = [2, 0], sizes = [8, 32], strides = [1, 1]} : vector<10x32xf32> to vector<8x32xf32>
    %54 = tpu.concatenate %51, %52, %53 in 1 : vector<8x32xf32>, vector<8x32xf32>, vector<8x32xf32> -> vector<8x96xf32>
    %c0_37 = arith.constant 0 : index
    %c0_38 = arith.constant 0 : index
    %c0_39 = arith.constant 0 : index
    %c0_40 = arith.constant 0 : index
    %55 = vector.load %arg9[%c0_37, %c0_38, %c0_39, %c0_40] : memref<1x2x96x128xbf16, #tpu.memory_space<vmem>>, vector<1x1x96x128xbf16>
    %56 = vector.shape_cast %55 : vector<1x1x96x128xbf16> to vector<96x128xbf16>
    %57 = arith.truncf %54 : vector<8x96xf32> to vector<8x96xbf16>
    %cst_41 = arith.constant dense<0.000000e+00> : vector<8x128xf32>
    %58 = tpu.matmul %57, %56, %cst_41 {dimension_numbers = #tpu.dot_dimension_numbers<[1], [0], [0], [1], [0, 0, 1, 1], [], []>} : vector<8x96xbf16>, vector<96x128xbf16>, vector<8x128xf32> -> vector<8x128xf32>
    %59 = vector.extract_strided_slice %18 {offsets = [0, 0], sizes = [1, 128], strides = [1, 1]} : vector<2x128xf32> to vector<1x128xf32>
    %60 = vector.broadcast %59 : vector<1x128xf32> to vector<8x128xf32>
    %61 = arith.addf %58, %60 : vector<8x128xf32>
    %cst_42 = arith.constant 0.000000e+00 : f32
    %62 = vector.broadcast %cst_42 : f32 to vector<8x128xf32>
    %63 = arith.maximumf %61, %62 : vector<8x128xf32>
    %cst_43 = arith.constant 0.000000e+00 : f32
    %64 = vector.broadcast %cst_43 : f32 to vector<1x128xf32>
    %65 = tpu.concatenate %64, %63, %64 in 0 : vector<1x128xf32>, vector<8x128xf32>, vector<1x128xf32> -> vector<10x128xf32>
    %66 = vector.extract_strided_slice %65 {offsets = [0, 0], sizes = [8, 128], strides = [1, 1]} : vector<10x128xf32> to vector<8x128xf32>
    %67 = vector.extract_strided_slice %65 {offsets = [1, 0], sizes = [8, 128], strides = [1, 1]} : vector<10x128xf32> to vector<8x128xf32>
    %68 = vector.extract_strided_slice %65 {offsets = [2, 0], sizes = [8, 128], strides = [1, 1]} : vector<10x128xf32> to vector<8x128xf32>
    %69 = tpu.concatenate %66, %67, %68 in 1 : vector<8x128xf32>, vector<8x128xf32>, vector<8x128xf32> -> vector<8x384xf32>
    %c0_44 = arith.constant 0 : index
    %c0_45 = arith.constant 0 : index
    %c0_46 = arith.constant 0 : index
    %c0_47 = arith.constant 0 : index
    %70 = vector.load %arg11[%c0_44, %c0_45, %c0_46, %c0_47] : memref<1x2x384x32xbf16, #tpu.memory_space<vmem>>, vector<1x1x384x32xbf16>
    %71 = vector.shape_cast %70 : vector<1x1x384x32xbf16> to vector<384x32xbf16>
    %72 = arith.truncf %69 : vector<8x384xf32> to vector<8x384xbf16>
    %cst_48 = arith.constant dense<0.000000e+00> : vector<8x32xf32>
    %73 = tpu.matmul %72, %71, %cst_48 {dimension_numbers = #tpu.dot_dimension_numbers<[1], [0], [0], [1], [0, 0, 1, 1], [], []>} : vector<8x384xbf16>, vector<384x32xbf16>, vector<8x32xf32> -> vector<8x32xf32>
    %74 = vector.extract_strided_slice %20 {offsets = [0, 0], sizes = [1, 32], strides = [1, 1]} : vector<2x32xf32> to vector<1x32xf32>
    %75 = vector.broadcast %74 : vector<1x32xf32> to vector<8x32xf32>
    %76 = arith.addf %73, %75 : vector<8x32xf32>
    %cst_49 = arith.constant 5.000000e-01 : f32
    %77 = vector.broadcast %cst_49 : f32 to vector<8x32xf32>
    %78 = arith.mulf %77, %76 : vector<8x32xf32>
    %79 = arith.addf %4, %78 : vector<8x32xf32>
    %80 = vector.extract_strided_slice %12 {offsets = [1, 0], sizes = [1, 32], strides = [1, 1]} : vector<5x32xf32> to vector<1x32xf32>
    %81 = vector.extract_strided_slice %14 {offsets = [1, 0], sizes = [1, 32], strides = [1, 1]} : vector<5x32xf32> to vector<1x32xf32>
    %cst_50 = arith.constant dense<0.000000e+00> : vector<8xf32>
    %82 = vector.multi_reduction <add>, %79, %cst_50 [1] : vector<8x32xf32> to vector<8xf32>
    %83 = vector.shape_cast %82 : vector<8xf32> to vector<8x1xf32>
    %cst_51 = arith.constant 3.200000e+01 : f32
    %84 = vector.broadcast %cst_51 : f32 to vector<8x1xf32>
    %85 = arith.divf %83, %84 : vector<8x1xf32>
    %86 = vector.broadcast %85 : vector<8x1xf32> to vector<8x32xf32>
    %87 = arith.subf %79, %86 : vector<8x32xf32>
    %88 = arith.mulf %87, %87 : vector<8x32xf32>
    %cst_52 = arith.constant dense<0.000000e+00> : vector<8xf32>
    %89 = vector.multi_reduction <add>, %88, %cst_52 [1] : vector<8x32xf32> to vector<8xf32>
    %90 = vector.shape_cast %89 : vector<8xf32> to vector<8x1xf32>
    %cst_53 = arith.constant 3.200000e+01 : f32
    %91 = vector.broadcast %cst_53 : f32 to vector<8x1xf32>
    %92 = arith.divf %90, %91 : vector<8x1xf32>
    %cst_54 = arith.constant 9.99999996E-13 : f32
    %93 = vector.broadcast %cst_54 : f32 to vector<8x1xf32>
    %94 = arith.addf %92, %93 : vector<8x1xf32>
    %95 = math.rsqrt %94 : vector<8x1xf32>
    %96 = vector.broadcast %95 : vector<8x1xf32> to vector<8x32xf32>
    %97 = arith.mulf %87, %96 : vector<8x32xf32>
    %98 = vector.broadcast %80 : vector<1x32xf32> to vector<8x32xf32>
    %99 = arith.mulf %97, %98 : vector<8x32xf32>
    %100 = vector.broadcast %81 : vector<1x32xf32> to vector<8x32xf32>
    %101 = arith.addf %99, %100 : vector<8x32xf32>
    %c0_55 = arith.constant 0 : index
    %c0_56 = arith.constant 0 : index
    %c0_57 = arith.constant 0 : index
    %102 = vector.load %arg13[%c0_55, %c0_56, %c0_57] : memref<1x32x96xbf16, #tpu.memory_space<vmem>>, vector<1x32x96xbf16>
    %103 = vector.shape_cast %102 : vector<1x32x96xbf16> to vector<32x96xbf16>
    %104 = arith.truncf %101 : vector<8x32xf32> to vector<8x32xbf16>
    %cst_58 = arith.constant dense<0.000000e+00> : vector<8x96xf32>
    %105 = tpu.matmul %104, %103, %cst_58 {dimension_numbers = #tpu.dot_dimension_numbers<[1], [0], [0], [1], [0, 0, 1, 1], [], []>} : vector<8x32xbf16>, vector<32x96xbf16>, vector<8x96xf32> -> vector<8x96xf32>
    %106 = vector.broadcast %22 : vector<1x96xf32> to vector<8x96xf32>
    %107 = arith.addf %105, %106 : vector<8x96xf32>
    %108 = vector.extract_strided_slice %107 {offsets = [0, 0], sizes = [8, 16], strides = [1, 1]} : vector<8x96xf32> to vector<8x16xf32>
    %109 = vector.extract_strided_slice %107 {offsets = [0, 32], sizes = [8, 16], strides = [1, 1]} : vector<8x96xf32> to vector<8x16xf32>
    %110 = arith.truncf %109 : vector<8x16xf32> to vector<8x16xbf16>
    %111 = vector.extract_strided_slice %107 {offsets = [0, 64], sizes = [8, 16], strides = [1, 1]} : vector<8x96xf32> to vector<8x16xf32>
    %112 = vector.extract_strided_slice %16 {offsets = [1, 0], sizes = [1, 16], strides = [1, 1]} : vector<7x32xf32> to vector<1x16xf32>
    %113 = vector.broadcast %112 : vector<1x16xf32> to vector<8x16xf32>
    %114 = arith.addf %108, %113 : vector<8x16xf32>
    %cst_59 = arith.constant 2.500000e-01 : f32
    %115 = vector.broadcast %cst_59 : f32 to vector<8x16xf32>
    %116 = arith.mulf %114, %115 : vector<8x16xf32>
    %117 = arith.truncf %116 : vector<8x16xf32> to vector<8x16xbf16>
    %118 = vector.extract_strided_slice %16 {offsets = [2, 0], sizes = [1, 16], strides = [1, 1]} : vector<7x32xf32> to vector<1x16xf32>
    %119 = vector.broadcast %118 : vector<1x16xf32> to vector<8x16xf32>
    %120 = arith.addf %108, %119 : vector<8x16xf32>
    %cst_60 = arith.constant 2.500000e-01 : f32
    %121 = vector.broadcast %cst_60 : f32 to vector<8x16xf32>
    %122 = arith.mulf %120, %121 : vector<8x16xf32>
    %123 = arith.truncf %122 : vector<8x16xf32> to vector<8x16xbf16>
    %cst_61 = arith.constant dense<0.000000e+00> : vector<8x8xf32>
    %124 = tpu.matmul %117, %110, %cst_61 {dimension_numbers = #tpu.dot_dimension_numbers<[1], [1], [0], [0], [0, 0, 1, 0], [], []>} : vector<8x16xbf16>, vector<8x16xbf16>, vector<8x8xf32> -> vector<8x8xf32>
    %125 = vector.extract_strided_slice %26 {offsets = [0, 0], sizes = [15, 16], strides = [1, 1]} : vector<15x32xbf16> to vector<15x16xbf16>
    %cst_62 = arith.constant dense<0.000000e+00> : vector<8x15xf32>
    %126 = tpu.matmul %123, %125, %cst_62 {dimension_numbers = #tpu.dot_dimension_numbers<[1], [1], [0], [0], [0, 0, 1, 0], [], []>} : vector<8x16xbf16>, vector<15x16xbf16>, vector<8x15xf32> -> vector<8x15xf32>
    %127 = vector.extract_strided_slice %126 {offsets = [0, 7], sizes = [1, 8], strides = [1, 1]} : vector<8x15xf32> to vector<1x8xf32>
    %128 = vector.extract_strided_slice %126 {offsets = [1, 6], sizes = [1, 8], strides = [1, 1]} : vector<8x15xf32> to vector<1x8xf32>
    %129 = vector.extract_strided_slice %126 {offsets = [2, 5], sizes = [1, 8], strides = [1, 1]} : vector<8x15xf32> to vector<1x8xf32>
    %130 = vector.extract_strided_slice %126 {offsets = [3, 4], sizes = [1, 8], strides = [1, 1]} : vector<8x15xf32> to vector<1x8xf32>
    %131 = vector.extract_strided_slice %126 {offsets = [4, 3], sizes = [1, 8], strides = [1, 1]} : vector<8x15xf32> to vector<1x8xf32>
    %132 = vector.extract_strided_slice %126 {offsets = [5, 2], sizes = [1, 8], strides = [1, 1]} : vector<8x15xf32> to vector<1x8xf32>
    %133 = vector.extract_strided_slice %126 {offsets = [6, 1], sizes = [1, 8], strides = [1, 1]} : vector<8x15xf32> to vector<1x8xf32>
    %134 = vector.extract_strided_slice %126 {offsets = [7, 0], sizes = [1, 8], strides = [1, 1]} : vector<8x15xf32> to vector<1x8xf32>
    %135 = tpu.concatenate %127, %128, %129, %130, %131, %132, %133, %134 in 0 : vector<1x8xf32>, vector<1x8xf32>, vector<1x8xf32>, vector<1x8xf32>, vector<1x8xf32>, vector<1x8xf32>, vector<1x8xf32>, vector<1x8xf32> -> vector<8x8xf32>
    %136 = arith.addf %124, %135 : vector<8x8xf32>
    %137 = vector.broadcast %10 : vector<1x8xf32> to vector<8x8xf32>
    %138 = arith.addf %136, %137 : vector<8x8xf32>
    %cst_63 = arith.constant dense<0xFF800000> : vector<8xf32>
    %139 = vector.multi_reduction <maximumf>, %138, %cst_63 [1] : vector<8x8xf32> to vector<8xf32>
    %140 = vector.shape_cast %139 : vector<8xf32> to vector<8x1xf32>
    %141 = vector.broadcast %140 : vector<8x1xf32> to vector<8x8xf32>
    %142 = arith.subf %138, %141 : vector<8x8xf32>
    %143 = math.exp %142 : vector<8x8xf32>
    %cst_64 = arith.constant dense<0.000000e+00> : vector<8xf32>
    %144 = vector.multi_reduction <add>, %143, %cst_64 [1] : vector<8x8xf32> to vector<8xf32>
    %145 = vector.shape_cast %144 : vector<8xf32> to vector<8x1xf32>
    %146 = tpu.reciprocal %145 {approx = true} : vector<8x1xf32> -> vector<8x1xf32>
    %147 = vector.broadcast %146 : vector<8x1xf32> to vector<8x8xf32>
    %148 = arith.mulf %143, %147 : vector<8x8xf32>
    %149 = arith.truncf %148 : vector<8x8xf32> to vector<8x8xbf16>
    %150 = arith.truncf %111 : vector<8x16xf32> to vector<8x16xbf16>
    %cst_65 = arith.constant dense<0.000000e+00> : vector<8x16xf32>
    %151 = tpu.matmul %149, %150, %cst_65 {dimension_numbers = #tpu.dot_dimension_numbers<[1], [0], [0], [1], [0, 0, 1, 1], [], []>} : vector<8x8xbf16>, vector<8x16xbf16>, vector<8x16xf32> -> vector<8x16xf32>
    %152 = vector.extract_strided_slice %107 {offsets = [0, 16], sizes = [8, 16], strides = [1, 1]} : vector<8x96xf32> to vector<8x16xf32>
    %153 = vector.extract_strided_slice %107 {offsets = [0, 48], sizes = [8, 16], strides = [1, 1]} : vector<8x96xf32> to vector<8x16xf32>
    %154 = arith.truncf %153 : vector<8x16xf32> to vector<8x16xbf16>
    %155 = vector.extract_strided_slice %107 {offsets = [0, 80], sizes = [8, 16], strides = [1, 1]} : vector<8x96xf32> to vector<8x16xf32>
    %156 = vector.extract_strided_slice %16 {offsets = [1, 16], sizes = [1, 16], strides = [1, 1]} : vector<7x32xf32> to vector<1x16xf32>
    %157 = vector.broadcast %156 : vector<1x16xf32> to vector<8x16xf32>
    %158 = arith.addf %152, %157 : vector<8x16xf32>
    %cst_66 = arith.constant 2.500000e-01 : f32
    %159 = vector.broadcast %cst_66 : f32 to vector<8x16xf32>
    %160 = arith.mulf %158, %159 : vector<8x16xf32>
    %161 = arith.truncf %160 : vector<8x16xf32> to vector<8x16xbf16>
    %162 = vector.extract_strided_slice %16 {offsets = [2, 16], sizes = [1, 16], strides = [1, 1]} : vector<7x32xf32> to vector<1x16xf32>
    %163 = vector.broadcast %162 : vector<1x16xf32> to vector<8x16xf32>
    %164 = arith.addf %152, %163 : vector<8x16xf32>
    %cst_67 = arith.constant 2.500000e-01 : f32
    %165 = vector.broadcast %cst_67 : f32 to vector<8x16xf32>
    %166 = arith.mulf %164, %165 : vector<8x16xf32>
    %167 = arith.truncf %166 : vector<8x16xf32> to vector<8x16xbf16>
    %cst_68 = arith.constant dense<0.000000e+00> : vector<8x8xf32>
    %168 = tpu.matmul %161, %154, %cst_68 {dimension_numbers = #tpu.dot_dimension_numbers<[1], [1], [0], [0], [0, 0, 1, 0], [], []>} : vector<8x16xbf16>, vector<8x16xbf16>, vector<8x8xf32> -> vector<8x8xf32>
    %169 = vector.extract_strided_slice %26 {offsets = [0, 16], sizes = [15, 16], strides = [1, 1]} : vector<15x32xbf16> to vector<15x16xbf16>
    %cst_69 = arith.constant dense<0.000000e+00> : vector<8x15xf32>
    %170 = tpu.matmul %167, %169, %cst_69 {dimension_numbers = #tpu.dot_dimension_numbers<[1], [1], [0], [0], [0, 0, 1, 0], [], []>} : vector<8x16xbf16>, vector<15x16xbf16>, vector<8x15xf32> -> vector<8x15xf32>
    %171 = vector.extract_strided_slice %170 {offsets = [0, 7], sizes = [1, 8], strides = [1, 1]} : vector<8x15xf32> to vector<1x8xf32>
    %172 = vector.extract_strided_slice %170 {offsets = [1, 6], sizes = [1, 8], strides = [1, 1]} : vector<8x15xf32> to vector<1x8xf32>
    %173 = vector.extract_strided_slice %170 {offsets = [2, 5], sizes = [1, 8], strides = [1, 1]} : vector<8x15xf32> to vector<1x8xf32>
    %174 = vector.extract_strided_slice %170 {offsets = [3, 4], sizes = [1, 8], strides = [1, 1]} : vector<8x15xf32> to vector<1x8xf32>
    %175 = vector.extract_strided_slice %170 {offsets = [4, 3], sizes = [1, 8], strides = [1, 1]} : vector<8x15xf32> to vector<1x8xf32>
    %176 = vector.extract_strided_slice %170 {offsets = [5, 2], sizes = [1, 8], strides = [1, 1]} : vector<8x15xf32> to vector<1x8xf32>
    %177 = vector.extract_strided_slice %170 {offsets = [6, 1], sizes = [1, 8], strides = [1, 1]} : vector<8x15xf32> to vector<1x8xf32>
    %178 = vector.extract_strided_slice %170 {offsets = [7, 0], sizes = [1, 8], strides = [1, 1]} : vector<8x15xf32> to vector<1x8xf32>
    %179 = tpu.concatenate %171, %172, %173, %174, %175, %176, %177, %178 in 0 : vector<1x8xf32>, vector<1x8xf32>, vector<1x8xf32>, vector<1x8xf32>, vector<1x8xf32>, vector<1x8xf32>, vector<1x8xf32>, vector<1x8xf32> -> vector<8x8xf32>
    %180 = arith.addf %168, %179 : vector<8x8xf32>
    %181 = vector.broadcast %10 : vector<1x8xf32> to vector<8x8xf32>
    %182 = arith.addf %180, %181 : vector<8x8xf32>
    %cst_70 = arith.constant dense<0xFF800000> : vector<8xf32>
    %183 = vector.multi_reduction <maximumf>, %182, %cst_70 [1] : vector<8x8xf32> to vector<8xf32>
    %184 = vector.shape_cast %183 : vector<8xf32> to vector<8x1xf32>
    %185 = vector.broadcast %184 : vector<8x1xf32> to vector<8x8xf32>
    %186 = arith.subf %182, %185 : vector<8x8xf32>
    %187 = math.exp %186 : vector<8x8xf32>
    %cst_71 = arith.constant dense<0.000000e+00> : vector<8xf32>
    %188 = vector.multi_reduction <add>, %187, %cst_71 [1] : vector<8x8xf32> to vector<8xf32>
    %189 = vector.shape_cast %188 : vector<8xf32> to vector<8x1xf32>
    %190 = tpu.reciprocal %189 {approx = true} : vector<8x1xf32> -> vector<8x1xf32>
    %191 = vector.broadcast %190 : vector<8x1xf32> to vector<8x8xf32>
    %192 = arith.mulf %187, %191 : vector<8x8xf32>
    %193 = arith.truncf %192 : vector<8x8xf32> to vector<8x8xbf16>
    %194 = arith.truncf %155 : vector<8x16xf32> to vector<8x16xbf16>
    %cst_72 = arith.constant dense<0.000000e+00> : vector<8x16xf32>
    %195 = tpu.matmul %193, %194, %cst_72 {dimension_numbers = #tpu.dot_dimension_numbers<[1], [0], [0], [1], [0, 0, 1, 1], [], []>} : vector<8x8xbf16>, vector<8x16xbf16>, vector<8x16xf32> -> vector<8x16xf32>
    %196 = tpu.concatenate %151, %195 in 1 : vector<8x16xf32>, vector<8x16xf32> -> vector<8x32xf32>
    %c0_73 = arith.constant 0 : index
    %c0_74 = arith.constant 0 : index
    %c0_75 = arith.constant 0 : index
    %197 = vector.load %arg15[%c0_73, %c0_74, %c0_75] : memref<1x32x32xbf16, #tpu.memory_space<vmem>>, vector<1x32x32xbf16>
    %198 = vector.shape_cast %197 : vector<1x32x32xbf16> to vector<32x32xbf16>
    %199 = arith.truncf %196 : vector<8x32xf32> to vector<8x32xbf16>
    %cst_76 = arith.constant dense<0.000000e+00> : vector<8x32xf32>
    %200 = tpu.matmul %199, %198, %cst_76 {dimension_numbers = #tpu.dot_dimension_numbers<[1], [0], [0], [1], [0, 0, 1, 1], [], []>} : vector<8x32xbf16>, vector<32x32xbf16>, vector<8x32xf32> -> vector<8x32xf32>
    %201 = arith.addf %79, %200 : vector<8x32xf32>
    %202 = vector.extract_strided_slice %16 {offsets = [0, 0], sizes = [1, 32], strides = [1, 1]} : vector<7x32xf32> to vector<1x32xf32>
    %203 = vector.broadcast %202 : vector<1x32xf32> to vector<8x32xf32>
    %204 = arith.addf %201, %203 : vector<8x32xf32>
    %205 = vector.extract_strided_slice %12 {offsets = [2, 0], sizes = [1, 32], strides = [1, 1]} : vector<5x32xf32> to vector<1x32xf32>
    %206 = vector.extract_strided_slice %14 {offsets = [2, 0], sizes = [1, 32], strides = [1, 1]} : vector<5x32xf32> to vector<1x32xf32>
    %cst_77 = arith.constant dense<0.000000e+00> : vector<8xf32>
    %207 = vector.multi_reduction <add>, %204, %cst_77 [1] : vector<8x32xf32> to vector<8xf32>
    %208 = vector.shape_cast %207 : vector<8xf32> to vector<8x1xf32>
    %cst_78 = arith.constant 3.200000e+01 : f32
    %209 = vector.broadcast %cst_78 : f32 to vector<8x1xf32>
    %210 = arith.divf %208, %209 : vector<8x1xf32>
    %211 = vector.broadcast %210 : vector<8x1xf32> to vector<8x32xf32>
    %212 = arith.subf %204, %211 : vector<8x32xf32>
    %213 = arith.mulf %212, %212 : vector<8x32xf32>
    %cst_79 = arith.constant dense<0.000000e+00> : vector<8xf32>
    %214 = vector.multi_reduction <add>, %213, %cst_79 [1] : vector<8x32xf32> to vector<8xf32>
    %215 = vector.shape_cast %214 : vector<8xf32> to vector<8x1xf32>
    %cst_80 = arith.constant 3.200000e+01 : f32
    %216 = vector.broadcast %cst_80 : f32 to vector<8x1xf32>
    %217 = arith.divf %215, %216 : vector<8x1xf32>
    %cst_81 = arith.constant 9.99999996E-13 : f32
    %218 = vector.broadcast %cst_81 : f32 to vector<8x1xf32>
    %219 = arith.addf %217, %218 : vector<8x1xf32>
    %220 = math.rsqrt %219 : vector<8x1xf32>
    %221 = vector.broadcast %220 : vector<8x1xf32> to vector<8x32xf32>
    %222 = arith.mulf %212, %221 : vector<8x32xf32>
    %223 = vector.broadcast %205 : vector<1x32xf32> to vector<8x32xf32>
    %224 = arith.mulf %222, %223 : vector<8x32xf32>
    %225 = vector.broadcast %206 : vector<1x32xf32> to vector<8x32xf32>
    %226 = arith.addf %224, %225 : vector<8x32xf32>
    %227 = vector.extract_strided_slice %16 {offsets = [3, 0], sizes = [1, 32], strides = [1, 1]} : vector<7x32xf32> to vector<1x32xf32>
    %228 = vector.extract_strided_slice %16 {offsets = [4, 0], sizes = [1, 32], strides = [1, 1]} : vector<7x32xf32> to vector<1x32xf32>
    %229 = tpu.concatenate %227, %228 in 1 : vector<1x32xf32>, vector<1x32xf32> -> vector<1x64xf32>
    %c0_82 = arith.constant 0 : index
    %c0_83 = arith.constant 0 : index
    %c0_84 = arith.constant 0 : index
    %230 = vector.load %arg16[%c0_82, %c0_83, %c0_84] : memref<1x32x64xbf16, #tpu.memory_space<vmem>>, vector<1x32x64xbf16>
    %231 = vector.shape_cast %230 : vector<1x32x64xbf16> to vector<32x64xbf16>
    %232 = arith.truncf %226 : vector<8x32xf32> to vector<8x32xbf16>
    %cst_85 = arith.constant dense<0.000000e+00> : vector<8x64xf32>
    %233 = tpu.matmul %232, %231, %cst_85 {dimension_numbers = #tpu.dot_dimension_numbers<[1], [0], [0], [1], [0, 0, 1, 1], [], []>} : vector<8x32xbf16>, vector<32x64xbf16>, vector<8x64xf32> -> vector<8x64xf32>
    %234 = vector.broadcast %229 : vector<1x64xf32> to vector<8x64xf32>
    %235 = arith.addf %233, %234 : vector<8x64xf32>
    %236 = vector.extract_strided_slice %235 {offsets = [0, 0], sizes = [8, 32], strides = [1, 1]} : vector<8x64xf32> to vector<8x32xf32>
    %237 = vector.extract_strided_slice %235 {offsets = [0, 32], sizes = [8, 32], strides = [1, 1]} : vector<8x64xf32> to vector<8x32xf32>
    %238 = arith.negf %237 : vector<8x32xf32>
    %239 = math.exp %238 : vector<8x32xf32>
    %cst_86 = arith.constant 1.000000e+00 : f32
    %240 = vector.broadcast %cst_86 : f32 to vector<8x32xf32>
    %241 = arith.addf %240, %239 : vector<8x32xf32>
    %242 = arith.divf %240, %241 : vector<8x32xf32>
    %243 = arith.mulf %236, %242 : vector<8x32xf32>
    %cst_87 = arith.constant 0.000000e+00 : f32
    %244 = vector.broadcast %cst_87 : f32 to vector<15x32xf32>
    %245 = tpu.concatenate %244, %243, %244 in 0 : vector<15x32xf32>, vector<8x32xf32>, vector<15x32xf32> -> vector<38x32xf32>
    %cst_88 = arith.constant 0.000000e+00 : f32
    %246 = vector.broadcast %cst_88 : f32 to vector<8x32xf32>
    %247 = vector.extract_strided_slice %245 {offsets = [8, 0], sizes = [8, 32], strides = [1, 1]} : vector<38x32xf32> to vector<8x32xf32>
    %248 = vector.extract_strided_slice %24 {offsets = [8, 0], sizes = [1, 32], strides = [1, 1]} : vector<31x32xf32> to vector<1x32xf32>
    %249 = vector.broadcast %248 : vector<1x32xf32> to vector<8x32xf32>
    %250 = arith.mulf %247, %249 : vector<8x32xf32>
    %251 = arith.addf %246, %250 : vector<8x32xf32>
    %252 = vector.extract_strided_slice %245 {offsets = [9, 0], sizes = [8, 32], strides = [1, 1]} : vector<38x32xf32> to vector<8x32xf32>
    %253 = vector.extract_strided_slice %24 {offsets = [9, 0], sizes = [1, 32], strides = [1, 1]} : vector<31x32xf32> to vector<1x32xf32>
    %254 = vector.broadcast %253 : vector<1x32xf32> to vector<8x32xf32>
    %255 = arith.mulf %252, %254 : vector<8x32xf32>
    %256 = arith.addf %251, %255 : vector<8x32xf32>
    %257 = vector.extract_strided_slice %245 {offsets = [10, 0], sizes = [8, 32], strides = [1, 1]} : vector<38x32xf32> to vector<8x32xf32>
    %258 = vector.extract_strided_slice %24 {offsets = [10, 0], sizes = [1, 32], strides = [1, 1]} : vector<31x32xf32> to vector<1x32xf32>
    %259 = vector.broadcast %258 : vector<1x32xf32> to vector<8x32xf32>
    %260 = arith.mulf %257, %259 : vector<8x32xf32>
    %261 = arith.addf %256, %260 : vector<8x32xf32>
    %262 = vector.extract_strided_slice %245 {offsets = [11, 0], sizes = [8, 32], strides = [1, 1]} : vector<38x32xf32> to vector<8x32xf32>
    %263 = vector.extract_strided_slice %24 {offsets = [11, 0], sizes = [1, 32], strides = [1, 1]} : vector<31x32xf32> to vector<1x32xf32>
    %264 = vector.broadcast %263 : vector<1x32xf32> to vector<8x32xf32>
    %265 = arith.mulf %262, %264 : vector<8x32xf32>
    %266 = arith.addf %261, %265 : vector<8x32xf32>
    %267 = vector.extract_strided_slice %245 {offsets = [12, 0], sizes = [8, 32], strides = [1, 1]} : vector<38x32xf32> to vector<8x32xf32>
    %268 = vector.extract_strided_slice %24 {offsets = [12, 0], sizes = [1, 32], strides = [1, 1]} : vector<31x32xf32> to vector<1x32xf32>
    %269 = vector.broadcast %268 : vector<1x32xf32> to vector<8x32xf32>
    %270 = arith.mulf %267, %269 : vector<8x32xf32>
    %271 = arith.addf %266, %270 : vector<8x32xf32>
    %272 = vector.extract_strided_slice %245 {offsets = [13, 0], sizes = [8, 32], strides = [1, 1]} : vector<38x32xf32> to vector<8x32xf32>
    %273 = vector.extract_strided_slice %24 {offsets = [13, 0], sizes = [1, 32], strides = [1, 1]} : vector<31x32xf32> to vector<1x32xf32>
    %274 = vector.broadcast %273 : vector<1x32xf32> to vector<8x32xf32>
    %275 = arith.mulf %272, %274 : vector<8x32xf32>
    %276 = arith.addf %271, %275 : vector<8x32xf32>
    %277 = vector.extract_strided_slice %245 {offsets = [14, 0], sizes = [8, 32], strides = [1, 1]} : vector<38x32xf32> to vector<8x32xf32>
    %278 = vector.extract_strided_slice %24 {offsets = [14, 0], sizes = [1, 32], strides = [1, 1]} : vector<31x32xf32> to vector<1x32xf32>
    %279 = vector.broadcast %278 : vector<1x32xf32> to vector<8x32xf32>
    %280 = arith.mulf %277, %279 : vector<8x32xf32>
    %281 = arith.addf %276, %280 : vector<8x32xf32>
    %282 = vector.extract_strided_slice %245 {offsets = [15, 0], sizes = [8, 32], strides = [1, 1]} : vector<38x32xf32> to vector<8x32xf32>
    %283 = vector.extract_strided_slice %24 {offsets = [15, 0], sizes = [1, 32], strides = [1, 1]} : vector<31x32xf32> to vector<1x32xf32>
    %284 = vector.broadcast %283 : vector<1x32xf32> to vector<8x32xf32>
    %285 = arith.mulf %282, %284 : vector<8x32xf32>
    %286 = arith.addf %281, %285 : vector<8x32xf32>
    %287 = vector.extract_strided_slice %245 {offsets = [16, 0], sizes = [8, 32], strides = [1, 1]} : vector<38x32xf32> to vector<8x32xf32>
    %288 = vector.extract_strided_slice %24 {offsets = [16, 0], sizes = [1, 32], strides = [1, 1]} : vector<31x32xf32> to vector<1x32xf32>
    %289 = vector.broadcast %288 : vector<1x32xf32> to vector<8x32xf32>
    %290 = arith.mulf %287, %289 : vector<8x32xf32>
    %291 = arith.addf %286, %290 : vector<8x32xf32>
    %292 = vector.extract_strided_slice %245 {offsets = [17, 0], sizes = [8, 32], strides = [1, 1]} : vector<38x32xf32> to vector<8x32xf32>
    %293 = vector.extract_strided_slice %24 {offsets = [17, 0], sizes = [1, 32], strides = [1, 1]} : vector<31x32xf32> to vector<1x32xf32>
    %294 = vector.broadcast %293 : vector<1x32xf32> to vector<8x32xf32>
    %295 = arith.mulf %292, %294 : vector<8x32xf32>
    %296 = arith.addf %291, %295 : vector<8x32xf32>
    %297 = vector.extract_strided_slice %245 {offsets = [18, 0], sizes = [8, 32], strides = [1, 1]} : vector<38x32xf32> to vector<8x32xf32>
    %298 = vector.extract_strided_slice %24 {offsets = [18, 0], sizes = [1, 32], strides = [1, 1]} : vector<31x32xf32> to vector<1x32xf32>
    %299 = vector.broadcast %298 : vector<1x32xf32> to vector<8x32xf32>
    %300 = arith.mulf %297, %299 : vector<8x32xf32>
    %301 = arith.addf %296, %300 : vector<8x32xf32>
    %302 = vector.extract_strided_slice %245 {offsets = [19, 0], sizes = [8, 32], strides = [1, 1]} : vector<38x32xf32> to vector<8x32xf32>
    %303 = vector.extract_strided_slice %24 {offsets = [19, 0], sizes = [1, 32], strides = [1, 1]} : vector<31x32xf32> to vector<1x32xf32>
    %304 = vector.broadcast %303 : vector<1x32xf32> to vector<8x32xf32>
    %305 = arith.mulf %302, %304 : vector<8x32xf32>
    %306 = arith.addf %301, %305 : vector<8x32xf32>
    %307 = vector.extract_strided_slice %245 {offsets = [20, 0], sizes = [8, 32], strides = [1, 1]} : vector<38x32xf32> to vector<8x32xf32>
    %308 = vector.extract_strided_slice %24 {offsets = [20, 0], sizes = [1, 32], strides = [1, 1]} : vector<31x32xf32> to vector<1x32xf32>
    %309 = vector.broadcast %308 : vector<1x32xf32> to vector<8x32xf32>
    %310 = arith.mulf %307, %309 : vector<8x32xf32>
    %311 = arith.addf %306, %310 : vector<8x32xf32>
    %312 = vector.extract_strided_slice %245 {offsets = [21, 0], sizes = [8, 32], strides = [1, 1]} : vector<38x32xf32> to vector<8x32xf32>
    %313 = vector.extract_strided_slice %24 {offsets = [21, 0], sizes = [1, 32], strides = [1, 1]} : vector<31x32xf32> to vector<1x32xf32>
    %314 = vector.broadcast %313 : vector<1x32xf32> to vector<8x32xf32>
    %315 = arith.mulf %312, %314 : vector<8x32xf32>
    %316 = arith.addf %311, %315 : vector<8x32xf32>
    %317 = vector.extract_strided_slice %245 {offsets = [22, 0], sizes = [8, 32], strides = [1, 1]} : vector<38x32xf32> to vector<8x32xf32>
    %318 = vector.extract_strided_slice %24 {offsets = [22, 0], sizes = [1, 32], strides = [1, 1]} : vector<31x32xf32> to vector<1x32xf32>
    %319 = vector.broadcast %318 : vector<1x32xf32> to vector<8x32xf32>
    %320 = arith.mulf %317, %319 : vector<8x32xf32>
    %321 = arith.addf %316, %320 : vector<8x32xf32>
    %322 = vector.extract_strided_slice %16 {offsets = [5, 0], sizes = [1, 32], strides = [1, 1]} : vector<7x32xf32> to vector<1x32xf32>
    %323 = vector.broadcast %322 : vector<1x32xf32> to vector<8x32xf32>
    %324 = arith.addf %321, %323 : vector<8x32xf32>
    %325 = arith.negf %324 : vector<8x32xf32>
    %326 = math.exp %325 : vector<8x32xf32>
    %cst_89 = arith.constant 1.000000e+00 : f32
    %327 = vector.broadcast %cst_89 : f32 to vector<8x32xf32>
    %328 = arith.addf %327, %326 : vector<8x32xf32>
    %329 = arith.divf %327, %328 : vector<8x32xf32>
    %330 = arith.mulf %324, %329 : vector<8x32xf32>
    %c0_90 = arith.constant 0 : index
    %c0_91 = arith.constant 0 : index
    %c0_92 = arith.constant 0 : index
    %331 = vector.load %arg17[%c0_90, %c0_91, %c0_92] : memref<1x32x32xbf16, #tpu.memory_space<vmem>>, vector<1x32x32xbf16>
    %332 = vector.shape_cast %331 : vector<1x32x32xbf16> to vector<32x32xbf16>
    %333 = arith.truncf %330 : vector<8x32xf32> to vector<8x32xbf16>
    %cst_93 = arith.constant dense<0.000000e+00> : vector<8x32xf32>
    %334 = tpu.matmul %333, %332, %cst_93 {dimension_numbers = #tpu.dot_dimension_numbers<[1], [0], [0], [1], [0, 0, 1, 1], [], []>} : vector<8x32xbf16>, vector<32x32xbf16>, vector<8x32xf32> -> vector<8x32xf32>
    %335 = arith.addf %204, %334 : vector<8x32xf32>
    %336 = vector.extract_strided_slice %16 {offsets = [6, 0], sizes = [1, 32], strides = [1, 1]} : vector<7x32xf32> to vector<1x32xf32>
    %337 = vector.broadcast %336 : vector<1x32xf32> to vector<8x32xf32>
    %338 = arith.addf %335, %337 : vector<8x32xf32>
    %339 = vector.extract_strided_slice %12 {offsets = [3, 0], sizes = [1, 32], strides = [1, 1]} : vector<5x32xf32> to vector<1x32xf32>
    %340 = vector.extract_strided_slice %14 {offsets = [3, 0], sizes = [1, 32], strides = [1, 1]} : vector<5x32xf32> to vector<1x32xf32>
    %cst_94 = arith.constant dense<0.000000e+00> : vector<8xf32>
    %341 = vector.multi_reduction <add>, %338, %cst_94 [1] : vector<8x32xf32> to vector<8xf32>
    %342 = vector.shape_cast %341 : vector<8xf32> to vector<8x1xf32>
    %cst_95 = arith.constant 3.200000e+01 : f32
    %343 = vector.broadcast %cst_95 : f32 to vector<8x1xf32>
    %344 = arith.divf %342, %343 : vector<8x1xf32>
    %345 = vector.broadcast %344 : vector<8x1xf32> to vector<8x32xf32>
    %346 = arith.subf %338, %345 : vector<8x32xf32>
    %347 = arith.mulf %346, %346 : vector<8x32xf32>
    %cst_96 = arith.constant dense<0.000000e+00> : vector<8xf32>
    %348 = vector.multi_reduction <add>, %347, %cst_96 [1] : vector<8x32xf32> to vector<8xf32>
    %349 = vector.shape_cast %348 : vector<8xf32> to vector<8x1xf32>
    %cst_97 = arith.constant 3.200000e+01 : f32
    %350 = vector.broadcast %cst_97 : f32 to vector<8x1xf32>
    %351 = arith.divf %349, %350 : vector<8x1xf32>
    %cst_98 = arith.constant 9.99999996E-13 : f32
    %352 = vector.broadcast %cst_98 : f32 to vector<8x1xf32>
    %353 = arith.addf %351, %352 : vector<8x1xf32>
    %354 = math.rsqrt %353 : vector<8x1xf32>
    %355 = vector.broadcast %354 : vector<8x1xf32> to vector<8x32xf32>
    %356 = arith.mulf %346, %355 : vector<8x32xf32>
    %357 = vector.broadcast %339 : vector<1x32xf32> to vector<8x32xf32>
    %358 = arith.mulf %356, %357 : vector<8x32xf32>
    %359 = vector.broadcast %340 : vector<1x32xf32> to vector<8x32xf32>
    %360 = arith.addf %358, %359 : vector<8x32xf32>
    %cst_99 = arith.constant 0.000000e+00 : f32
    %361 = vector.broadcast %cst_99 : f32 to vector<1x32xf32>
    %362 = tpu.concatenate %361, %360, %361 in 0 : vector<1x32xf32>, vector<8x32xf32>, vector<1x32xf32> -> vector<10x32xf32>
    %363 = vector.extract_strided_slice %362 {offsets = [0, 0], sizes = [8, 32], strides = [1, 1]} : vector<10x32xf32> to vector<8x32xf32>
    %364 = vector.extract_strided_slice %362 {offsets = [1, 0], sizes = [8, 32], strides = [1, 1]} : vector<10x32xf32> to vector<8x32xf32>
    %365 = vector.extract_strided_slice %362 {offsets = [2, 0], sizes = [8, 32], strides = [1, 1]} : vector<10x32xf32> to vector<8x32xf32>
    %366 = tpu.concatenate %363, %364, %365 in 1 : vector<8x32xf32>, vector<8x32xf32>, vector<8x32xf32> -> vector<8x96xf32>
    %c0_100 = arith.constant 0 : index
    %c1 = arith.constant 1 : index
    %c0_101 = arith.constant 0 : index
    %c0_102 = arith.constant 0 : index
    %367 = vector.load %arg9[%c0_100, %c1, %c0_101, %c0_102] : memref<1x2x96x128xbf16, #tpu.memory_space<vmem>>, vector<1x1x96x128xbf16>
    %368 = vector.shape_cast %367 : vector<1x1x96x128xbf16> to vector<96x128xbf16>
    %369 = arith.truncf %366 : vector<8x96xf32> to vector<8x96xbf16>
    %cst_103 = arith.constant dense<0.000000e+00> : vector<8x128xf32>
    %370 = tpu.matmul %369, %368, %cst_103 {dimension_numbers = #tpu.dot_dimension_numbers<[1], [0], [0], [1], [0, 0, 1, 1], [], []>} : vector<8x96xbf16>, vector<96x128xbf16>, vector<8x128xf32> -> vector<8x128xf32>
    %371 = vector.extract_strided_slice %18 {offsets = [1, 0], sizes = [1, 128], strides = [1, 1]} : vector<2x128xf32> to vector<1x128xf32>
    %372 = vector.broadcast %371 : vector<1x128xf32> to vector<8x128xf32>
    %373 = arith.addf %370, %372 : vector<8x128xf32>
    %cst_104 = arith.constant 0.000000e+00 : f32
    %374 = vector.broadcast %cst_104 : f32 to vector<8x128xf32>
    %375 = arith.maximumf %373, %374 : vector<8x128xf32>
    %cst_105 = arith.constant 0.000000e+00 : f32
    %376 = vector.broadcast %cst_105 : f32 to vector<1x128xf32>
    %377 = tpu.concatenate %376, %375, %376 in 0 : vector<1x128xf32>, vector<8x128xf32>, vector<1x128xf32> -> vector<10x128xf32>
    %378 = vector.extract_strided_slice %377 {offsets = [0, 0], sizes = [8, 128], strides = [1, 1]} : vector<10x128xf32> to vector<8x128xf32>
    %379 = vector.extract_strided_slice %377 {offsets = [1, 0], sizes = [8, 128], strides = [1, 1]} : vector<10x128xf32> to vector<8x128xf32>
    %380 = vector.extract_strided_slice %377 {offsets = [2, 0], sizes = [8, 128], strides = [1, 1]} : vector<10x128xf32> to vector<8x128xf32>
    %381 = tpu.concatenate %378, %379, %380 in 1 : vector<8x128xf32>, vector<8x128xf32>, vector<8x128xf32> -> vector<8x384xf32>
    %c0_106 = arith.constant 0 : index
    %c1_107 = arith.constant 1 : index
    %c0_108 = arith.constant 0 : index
    %c0_109 = arith.constant 0 : index
    %382 = vector.load %arg11[%c0_106, %c1_107, %c0_108, %c0_109] : memref<1x2x384x32xbf16, #tpu.memory_space<vmem>>, vector<1x1x384x32xbf16>
    %383 = vector.shape_cast %382 : vector<1x1x384x32xbf16> to vector<384x32xbf16>
    %384 = arith.truncf %381 : vector<8x384xf32> to vector<8x384xbf16>
    %cst_110 = arith.constant dense<0.000000e+00> : vector<8x32xf32>
    %385 = tpu.matmul %384, %383, %cst_110 {dimension_numbers = #tpu.dot_dimension_numbers<[1], [0], [0], [1], [0, 0, 1, 1], [], []>} : vector<8x384xbf16>, vector<384x32xbf16>, vector<8x32xf32> -> vector<8x32xf32>
    %386 = vector.extract_strided_slice %20 {offsets = [1, 0], sizes = [1, 32], strides = [1, 1]} : vector<2x32xf32> to vector<1x32xf32>
    %387 = vector.broadcast %386 : vector<1x32xf32> to vector<8x32xf32>
    %388 = arith.addf %385, %387 : vector<8x32xf32>
    %cst_111 = arith.constant 5.000000e-01 : f32
    %389 = vector.broadcast %cst_111 : f32 to vector<8x32xf32>
    %390 = arith.mulf %389, %388 : vector<8x32xf32>
    %391 = arith.addf %338, %390 : vector<8x32xf32>
    %392 = vector.extract_strided_slice %12 {offsets = [4, 0], sizes = [1, 32], strides = [1, 1]} : vector<5x32xf32> to vector<1x32xf32>
    %393 = vector.extract_strided_slice %14 {offsets = [4, 0], sizes = [1, 32], strides = [1, 1]} : vector<5x32xf32> to vector<1x32xf32>
    %cst_112 = arith.constant dense<0.000000e+00> : vector<8xf32>
    %394 = vector.multi_reduction <add>, %391, %cst_112 [1] : vector<8x32xf32> to vector<8xf32>
    %395 = vector.shape_cast %394 : vector<8xf32> to vector<8x1xf32>
    %cst_113 = arith.constant 3.200000e+01 : f32
    %396 = vector.broadcast %cst_113 : f32 to vector<8x1xf32>
    %397 = arith.divf %395, %396 : vector<8x1xf32>
    %398 = vector.broadcast %397 : vector<8x1xf32> to vector<8x32xf32>
    %399 = arith.subf %391, %398 : vector<8x32xf32>
    %400 = arith.mulf %399, %399 : vector<8x32xf32>
    %cst_114 = arith.constant dense<0.000000e+00> : vector<8xf32>
    %401 = vector.multi_reduction <add>, %400, %cst_114 [1] : vector<8x32xf32> to vector<8xf32>
    %402 = vector.shape_cast %401 : vector<8xf32> to vector<8x1xf32>
    %cst_115 = arith.constant 3.200000e+01 : f32
    %403 = vector.broadcast %cst_115 : f32 to vector<8x1xf32>
    %404 = arith.divf %402, %403 : vector<8x1xf32>
    %cst_116 = arith.constant 9.99999996E-13 : f32
    %405 = vector.broadcast %cst_116 : f32 to vector<8x1xf32>
    %406 = arith.addf %404, %405 : vector<8x1xf32>
    %407 = math.rsqrt %406 : vector<8x1xf32>
    %408 = vector.broadcast %407 : vector<8x1xf32> to vector<8x32xf32>
    %409 = arith.mulf %399, %408 : vector<8x32xf32>
    %410 = vector.broadcast %392 : vector<1x32xf32> to vector<8x32xf32>
    %411 = arith.mulf %409, %410 : vector<8x32xf32>
    %412 = vector.broadcast %393 : vector<1x32xf32> to vector<8x32xf32>
    %413 = arith.addf %411, %412 : vector<8x32xf32>
    %c0_117 = arith.constant 0 : index
    %c0_118 = arith.constant 0 : index
    %c0_119 = arith.constant 0 : index
    %414 = vector.load %arg20[%c0_117, %c0_118, %c0_119] : memref<1x8x32xf32, #tpu.memory_space<vmem>>, vector<1x8x32xf32>
    %415 = vector.shape_cast %414 : vector<1x8x32xf32> to vector<8x32xf32>
    %416 = vector.shape_cast %413 : vector<8x32xf32> to vector<1x8x32xf32>
    tpu.vector_store %arg20[%c0_117, %c0_118, %c0_119], %416 {strides = array<i32>} : memref<1x8x32xf32, #tpu.memory_space<vmem>>, vector<1x8x32xf32>,
    return
  }
  func.func @transform_0(%arg0: i32, %arg1: i32) -> (i32, i32, i32) {
    %c0_i32 = arith.constant 0 : i32
    %c0_i32_0 = arith.constant 0 : i32
    %c0_i32_1 = arith.constant 0 : i32
    return %arg0, %c0_i32, %c0_i32_0 : i32, i32, i32
  }
  func.func @transform_1(%arg0: i32, %arg1: i32) -> (i32, i32, i32) {
    %c0_i32 = arith.constant 0 : i32
    %c0_i32_0 = arith.constant 0 : i32
    %c0_i32_1 = arith.constant 0 : i32
    return %arg0, %c0_i32, %c0_i32_0 : i32, i32, i32
  }
  func.func @transform_2(%arg0: i32, %arg1: i32) -> (i32, i32) {
    %c0_i32 = arith.constant 0 : i32
    %c0_i32_0 = arith.constant 0 : i32
    %c0_i32_1 = arith.constant 0 : i32
    return %c0_i32, %c0_i32_0 : i32, i32
  }
  func.func @transform_3(%arg0: i32, %arg1: i32) -> (i32, i32) {
    %c0_i32 = arith.constant 0 : i32
    %c0_i32_0 = arith.constant 0 : i32
    %c0_i32_1 = arith.constant 0 : i32
    return %c0_i32, %c0_i32_0 : i32, i32
  }
  func.func @transform_4(%arg0: i32, %arg1: i32) -> (i32, i32, i32) {
    %c0_i32 = arith.constant 0 : i32
    %c0_i32_0 = arith.constant 0 : i32
    %c0_i32_1 = arith.constant 0 : i32
    return %arg1, %c0_i32, %c0_i32_0 : i32, i32, i32
  }
  func.func @transform_5(%arg0: i32, %arg1: i32) -> (i32, i32, i32) {
    %c0_i32 = arith.constant 0 : i32
    %c0_i32_0 = arith.constant 0 : i32
    %c0_i32_1 = arith.constant 0 : i32
    return %arg1, %c0_i32, %c0_i32_0 : i32, i32, i32
  }
  func.func @transform_6(%arg0: i32, %arg1: i32) -> (i32, i32, i32) {
    %c0_i32 = arith.constant 0 : i32
    %c0_i32_0 = arith.constant 0 : i32
    %c0_i32_1 = arith.constant 0 : i32
    return %arg1, %c0_i32, %c0_i32_0 : i32, i32, i32
  }
  func.func @transform_7(%arg0: i32, %arg1: i32) -> (i32, i32, i32, i32) {
    %c0_i32 = arith.constant 0 : i32
    %c0_i32_0 = arith.constant 0 : i32
    %c0_i32_1 = arith.constant 0 : i32
    %c0_i32_2 = arith.constant 0 : i32
    return %arg1, %c0_i32, %c0_i32_0, %c0_i32_1 : i32, i32, i32, i32
  }
  func.func @transform_8(%arg0: i32, %arg1: i32) -> (i32, i32, i32) {
    %c0_i32 = arith.constant 0 : i32
    %c0_i32_0 = arith.constant 0 : i32
    %c0_i32_1 = arith.constant 0 : i32
    return %arg1, %c0_i32, %c0_i32_0 : i32, i32, i32
  }
  func.func @transform_9(%arg0: i32, %arg1: i32) -> (i32, i32, i32, i32) {
    %c0_i32 = arith.constant 0 : i32
    %c0_i32_0 = arith.constant 0 : i32
    %c0_i32_1 = arith.constant 0 : i32
    %c0_i32_2 = arith.constant 0 : i32
    return %arg1, %c0_i32, %c0_i32_0, %c0_i32_1 : i32, i32, i32, i32
  }
  func.func @transform_10(%arg0: i32, %arg1: i32) -> (i32, i32, i32) {
    %c0_i32 = arith.constant 0 : i32
    %c0_i32_0 = arith.constant 0 : i32
    %c0_i32_1 = arith.constant 0 : i32
    return %arg1, %c0_i32, %c0_i32_0 : i32, i32, i32
  }
  func.func @transform_11(%arg0: i32, %arg1: i32) -> (i32, i32, i32) {
    %c0_i32 = arith.constant 0 : i32
    %c0_i32_0 = arith.constant 0 : i32
    %c0_i32_1 = arith.constant 0 : i32
    return %arg1, %c0_i32, %c0_i32_0 : i32, i32, i32
  }
  func.func @transform_12(%arg0: i32, %arg1: i32) -> (i32, i32, i32) {
    %c0_i32 = arith.constant 0 : i32
    %c0_i32_0 = arith.constant 0 : i32
    %c0_i32_1 = arith.constant 0 : i32
    return %arg1, %c0_i32, %c0_i32_0 : i32, i32, i32
  }
  func.func @transform_13(%arg0: i32, %arg1: i32) -> (i32, i32, i32) {
    %c0_i32 = arith.constant 0 : i32
    %c0_i32_0 = arith.constant 0 : i32
    %c0_i32_1 = arith.constant 0 : i32
    return %arg1, %c0_i32, %c0_i32_0 : i32, i32, i32
  }
  func.func @transform_14(%arg0: i32, %arg1: i32) -> (i32, i32, i32) {
    %c0_i32 = arith.constant 0 : i32
    %c0_i32_0 = arith.constant 0 : i32
    %c0_i32_1 = arith.constant 0 : i32
    return %arg1, %c0_i32, %c0_i32_0 : i32, i32, i32
  }
  func.func @transform_15(%arg0: i32, %arg1: i32) -> (i32, i32, i32) {
    %c0_i32 = arith.constant 0 : i32
    %c0_i32_0 = arith.constant 0 : i32
    %c0_i32_1 = arith.constant 0 : i32
    return %arg1, %c0_i32, %c0_i32_0 : i32, i32, i32
  }
  func.func @transform_16(%arg0: i32, %arg1: i32) -> (i32, i32, i32) {
    %c0_i32 = arith.constant 0 : i32
    %c0_i32_0 = arith.constant 0 : i32
    %c0_i32_1 = arith.constant 0 : i32
    return %arg1, %c0_i32, %c0_i32_0 : i32, i32, i32
  }
  func.func @transform_17(%arg0: i32, %arg1: i32) -> (i32, i32, i32) {
    %c0_i32 = arith.constant 0 : i32
    %c0_i32_0 = arith.constant 0 : i32
    %c0_i32_1 = arith.constant 0 : i32
    return %arg1, %c0_i32, %c0_i32_0 : i32, i32, i32
  }
  func.func @transform_18(%arg0: i32, %arg1: i32) -> (i32, i32, i32) {
    %c0_i32 = arith.constant 0 : i32
    %c0_i32_0 = arith.constant 0 : i32
    %c0_i32_1 = arith.constant 0 : i32
    return %arg0, %c0_i32, %c0_i32_0 : i32, i32, i32
  }
}

module attributes {stable_mosaic.version = 11 : i64} {
  func.func @_epilogue_kernel(%arg0: i32, %arg1: memref<1x8x32xf32, #tpu.memory_space<vmem>>, %arg2: memref<1x32xf32, #tpu.memory_space<vmem>>, %arg3: memref<1x32xf32, #tpu.memory_space<vmem>>, %arg4: memref<32x2xbf16, #tpu.memory_space<vmem>>, %arg5: memref<1x2xf32, #tpu.memory_space<vmem>>, %arg6: memref<10x32xbf16, #tpu.memory_space<vmem>>, %arg7: memref<1x32xf32, #tpu.memory_space<vmem>>, %arg8: memref<160x2xbf16, #tpu.memory_space<vmem>>, %arg9: memref<1x2xf32, #tpu.memory_space<vmem>>, %arg10: memref<1x8x128xf32, #tpu.memory_space<vmem>>) attributes {dimension_semantics = [#tpu.dimension_semantics<parallel>], iteration_bounds = array<i64: 2>, scalar_prefetch = 0 : i64, scratch_operands = 0 : i64, tpu.core_type = #tpu.core_type<tc>, window_params = [{transform_indices = @transform_0, window_bounds = array<i64: 1, 8, 32>}, {pipeline_mode = #tpu.pipeline_mode<synchronous>, transform_indices = @transform_1, window_bounds = array<i64: 1, 32>}, {pipeline_mode = #tpu.pipeline_mode<synchronous>, transform_indices = @transform_2, window_bounds = array<i64: 1, 32>}, {pipeline_mode = #tpu.pipeline_mode<synchronous>, transform_indices = @transform_3, window_bounds = array<i64: 32, 2>}, {pipeline_mode = #tpu.pipeline_mode<synchronous>, transform_indices = @transform_4, window_bounds = array<i64: 1, 2>}, {pipeline_mode = #tpu.pipeline_mode<synchronous>, transform_indices = @transform_5, window_bounds = array<i64: 10, 32>}, {pipeline_mode = #tpu.pipeline_mode<synchronous>, transform_indices = @transform_6, window_bounds = array<i64: 1, 32>}, {pipeline_mode = #tpu.pipeline_mode<synchronous>, transform_indices = @transform_7, window_bounds = array<i64: 160, 2>}, {pipeline_mode = #tpu.pipeline_mode<synchronous>, transform_indices = @transform_8, window_bounds = array<i64: 1, 2>}, {transform_indices = @transform_9, window_bounds = array<i64: 1, 8, 128>}]} {
    %c0 = arith.constant 0 : index
    %c0_0 = arith.constant 0 : index
    %c0_1 = arith.constant 0 : index
    %0 = vector.load %arg1[%c0, %c0_0, %c0_1] : memref<1x8x32xf32, #tpu.memory_space<vmem>>, vector<1x8x32xf32>
    %1 = vector.shape_cast %0 : vector<1x8x32xf32> to vector<8x32xf32>
    %c0_2 = arith.constant 0 : index
    %c0_3 = arith.constant 0 : index
    %2 = vector.load %arg2[%c0_2, %c0_3] : memref<1x32xf32, #tpu.memory_space<vmem>>, vector<1x32xf32>
    %c0_4 = arith.constant 0 : index
    %c0_5 = arith.constant 0 : index
    %3 = vector.load %arg3[%c0_4, %c0_5] : memref<1x32xf32, #tpu.memory_space<vmem>>, vector<1x32xf32>
    %cst = arith.constant dense<0.000000e+00> : vector<8xf32>
    %4 = vector.multi_reduction <add>, %1, %cst [1] : vector<8x32xf32> to vector<8xf32>
    %5 = vector.shape_cast %4 : vector<8xf32> to vector<8x1xf32>
    %cst_6 = arith.constant 3.200000e+01 : f32
    %6 = vector.broadcast %cst_6 : f32 to vector<8x1xf32>
    %7 = arith.divf %5, %6 : vector<8x1xf32>
    %8 = vector.broadcast %7 : vector<8x1xf32> to vector<8x32xf32>
    %9 = arith.subf %1, %8 : vector<8x32xf32>
    %10 = arith.mulf %9, %9 : vector<8x32xf32>
    %cst_7 = arith.constant dense<0.000000e+00> : vector<8xf32>
    %11 = vector.multi_reduction <add>, %10, %cst_7 [1] : vector<8x32xf32> to vector<8xf32>
    %12 = vector.shape_cast %11 : vector<8xf32> to vector<8x1xf32>
    %cst_8 = arith.constant 3.200000e+01 : f32
    %13 = vector.broadcast %cst_8 : f32 to vector<8x1xf32>
    %14 = arith.divf %12, %13 : vector<8x1xf32>
    %cst_9 = arith.constant 9.99999996E-13 : f32
    %15 = vector.broadcast %cst_9 : f32 to vector<8x1xf32>
    %16 = arith.addf %14, %15 : vector<8x1xf32>
    %17 = math.rsqrt %16 : vector<8x1xf32>
    %18 = vector.broadcast %17 : vector<8x1xf32> to vector<8x32xf32>
    %19 = arith.mulf %9, %18 : vector<8x32xf32>
    %20 = vector.broadcast %2 : vector<1x32xf32> to vector<8x32xf32>
    %21 = arith.mulf %19, %20 : vector<8x32xf32>
    %22 = vector.broadcast %3 : vector<1x32xf32> to vector<8x32xf32>
    %23 = arith.addf %21, %22 : vector<8x32xf32>
    %c0_10 = arith.constant 0 : index
    %c0_11 = arith.constant 0 : index
    %24 = vector.load %arg4[%c0_10, %c0_11] : memref<32x2xbf16, #tpu.memory_space<vmem>>, vector<32x2xbf16>
    %25 = arith.truncf %23 : vector<8x32xf32> to vector<8x32xbf16>
    %cst_12 = arith.constant dense<0.000000e+00> : vector<8x2xf32>
    %26 = tpu.matmul %25, %24, %cst_12 {dimension_numbers = #tpu.dot_dimension_numbers<[1], [0], [0], [1], [0, 0, 1, 1], [], []>} : vector<8x32xbf16>, vector<32x2xbf16>, vector<8x2xf32> -> vector<8x2xf32>
    %c0_13 = arith.constant 0 : index
    %c0_14 = arith.constant 0 : index
    %27 = vector.load %arg5[%c0_13, %c0_14] : memref<1x2xf32, #tpu.memory_space<vmem>>, vector<1x2xf32>
    %28 = vector.broadcast %27 : vector<1x2xf32> to vector<8x2xf32>
    %29 = arith.addf %26, %28 : vector<8x2xf32>
    %c0_15 = arith.constant 0 : index
    %c0_16 = arith.constant 0 : index
    %30 = vector.load %arg7[%c0_15, %c0_16] : memref<1x32xf32, #tpu.memory_space<vmem>>, vector<1x32xf32>
    %cst_17 = arith.constant 0.000000e+00 : f32
    %31 = vector.broadcast %cst_17 : f32 to vector<2x2xf32>
    %32 = tpu.concatenate %31, %29, %31 in 0 : vector<2x2xf32>, vector<8x2xf32>, vector<2x2xf32> -> vector<12x2xf32>
    %33 = vector.extract_strided_slice %32 {offsets = [0, 0], sizes = [8, 2], strides = [1, 1]} : vector<12x2xf32> to vector<8x2xf32>
    %34 = vector.extract_strided_slice %32 {offsets = [1, 0], sizes = [8, 2], strides = [1, 1]} : vector<12x2xf32> to vector<8x2xf32>
    %35 = vector.extract_strided_slice %32 {offsets = [2, 0], sizes = [8, 2], strides = [1, 1]} : vector<12x2xf32> to vector<8x2xf32>
    %36 = vector.extract_strided_slice %32 {offsets = [3, 0], sizes = [8, 2], strides = [1, 1]} : vector<12x2xf32> to vector<8x2xf32>
    %37 = vector.extract_strided_slice %32 {offsets = [4, 0], sizes = [8, 2], strides = [1, 1]} : vector<12x2xf32> to vector<8x2xf32>
    %38 = tpu.concatenate %33, %34, %35, %36, %37 in 1 : vector<8x2xf32>, vector<8x2xf32>, vector<8x2xf32>, vector<8x2xf32>, vector<8x2xf32> -> vector<8x10xf32>
    %c0_18 = arith.constant 0 : index
    %c0_19 = arith.constant 0 : index
    %39 = vector.load %arg6[%c0_18, %c0_19] : memref<10x32xbf16, #tpu.memory_space<vmem>>, vector<10x32xbf16>
    %40 = arith.truncf %38 : vector<8x10xf32> to vector<8x10xbf16>
    %cst_20 = arith.constant dense<0.000000e+00> : vector<8x32xf32>
    %41 = tpu.matmul %40, %39, %cst_20 {dimension_numbers = #tpu.dot_dimension_numbers<[1], [0], [0], [1], [0, 0, 1, 1], [], []>} : vector<8x10xbf16>, vector<10x32xbf16>, vector<8x32xf32> -> vector<8x32xf32>
    %42 = vector.broadcast %30 : vector<1x32xf32> to vector<8x32xf32>
    %43 = arith.addf %41, %42 : vector<8x32xf32>
    %44 = math.tanh %43 : vector<8x32xf32>
    %c0_21 = arith.constant 0 : index
    %c0_22 = arith.constant 0 : index
    %45 = vector.load %arg9[%c0_21, %c0_22] : memref<1x2xf32, #tpu.memory_space<vmem>>, vector<1x2xf32>
    %cst_23 = arith.constant 0.000000e+00 : f32
    %46 = vector.broadcast %cst_23 : f32 to vector<2x32xf32>
    %47 = tpu.concatenate %46, %44, %46 in 0 : vector<2x32xf32>, vector<8x32xf32>, vector<2x32xf32> -> vector<12x32xf32>
    %48 = vector.extract_strided_slice %47 {offsets = [0, 0], sizes = [8, 32], strides = [1, 1]} : vector<12x32xf32> to vector<8x32xf32>
    %49 = vector.extract_strided_slice %47 {offsets = [1, 0], sizes = [8, 32], strides = [1, 1]} : vector<12x32xf32> to vector<8x32xf32>
    %50 = vector.extract_strided_slice %47 {offsets = [2, 0], sizes = [8, 32], strides = [1, 1]} : vector<12x32xf32> to vector<8x32xf32>
    %51 = vector.extract_strided_slice %47 {offsets = [3, 0], sizes = [8, 32], strides = [1, 1]} : vector<12x32xf32> to vector<8x32xf32>
    %52 = vector.extract_strided_slice %47 {offsets = [4, 0], sizes = [8, 32], strides = [1, 1]} : vector<12x32xf32> to vector<8x32xf32>
    %53 = tpu.concatenate %48, %49, %50, %51, %52 in 1 : vector<8x32xf32>, vector<8x32xf32>, vector<8x32xf32>, vector<8x32xf32>, vector<8x32xf32> -> vector<8x160xf32>
    %c0_24 = arith.constant 0 : index
    %c0_25 = arith.constant 0 : index
    %54 = vector.load %arg8[%c0_24, %c0_25] : memref<160x2xbf16, #tpu.memory_space<vmem>>, vector<160x2xbf16>
    %55 = arith.truncf %53 : vector<8x160xf32> to vector<8x160xbf16>
    %cst_26 = arith.constant dense<0.000000e+00> : vector<8x2xf32>
    %56 = tpu.matmul %55, %54, %cst_26 {dimension_numbers = #tpu.dot_dimension_numbers<[1], [0], [0], [1], [0, 0, 1, 1], [], []>} : vector<8x160xbf16>, vector<160x2xbf16>, vector<8x2xf32> -> vector<8x2xf32>
    %57 = vector.broadcast %45 : vector<1x2xf32> to vector<8x2xf32>
    %58 = arith.addf %56, %57 : vector<8x2xf32>
    %59 = arith.addf %29, %58 : vector<8x2xf32>
    %cst_27 = arith.constant 0.000000e+00 : f32
    %60 = vector.broadcast %cst_27 : f32 to vector<8x124xf32>
    %61 = tpu.concatenate %29, %59, %60 in 1 : vector<8x2xf32>, vector<8x2xf32>, vector<8x124xf32> -> vector<8x128xf32>
    %c0_28 = arith.constant 0 : index
    %c0_29 = arith.constant 0 : index
    %c0_30 = arith.constant 0 : index
    %62 = vector.load %arg10[%c0_28, %c0_29, %c0_30] : memref<1x8x128xf32, #tpu.memory_space<vmem>>, vector<1x8x128xf32>
    %63 = vector.shape_cast %62 : vector<1x8x128xf32> to vector<8x128xf32>
    %64 = vector.shape_cast %61 : vector<8x128xf32> to vector<1x8x128xf32>
    tpu.vector_store %arg10[%c0_28, %c0_29, %c0_30], %64 {strides = array<i32>} : memref<1x8x128xf32, #tpu.memory_space<vmem>>, vector<1x8x128xf32>,
    return
  }
  func.func @transform_0(%arg0: i32) -> (i32, i32, i32) {
    %c0_i32 = arith.constant 0 : i32
    %c0_i32_0 = arith.constant 0 : i32
    %c0_i32_1 = arith.constant 0 : i32
    return %arg0, %c0_i32, %c0_i32_0 : i32, i32, i32
  }
  func.func @transform_1(%arg0: i32) -> (i32, i32) {
    %c0_i32 = arith.constant 0 : i32
    %c0_i32_0 = arith.constant 0 : i32
    %c0_i32_1 = arith.constant 0 : i32
    return %c0_i32, %c0_i32_0 : i32, i32
  }
  func.func @transform_2(%arg0: i32) -> (i32, i32) {
    %c0_i32 = arith.constant 0 : i32
    %c0_i32_0 = arith.constant 0 : i32
    %c0_i32_1 = arith.constant 0 : i32
    return %c0_i32, %c0_i32_0 : i32, i32
  }
  func.func @transform_3(%arg0: i32) -> (i32, i32) {
    %c0_i32 = arith.constant 0 : i32
    %c0_i32_0 = arith.constant 0 : i32
    %c0_i32_1 = arith.constant 0 : i32
    return %c0_i32, %c0_i32_0 : i32, i32
  }
  func.func @transform_4(%arg0: i32) -> (i32, i32) {
    %c0_i32 = arith.constant 0 : i32
    %c0_i32_0 = arith.constant 0 : i32
    %c0_i32_1 = arith.constant 0 : i32
    return %c0_i32, %c0_i32_0 : i32, i32
  }
  func.func @transform_5(%arg0: i32) -> (i32, i32) {
    %c0_i32 = arith.constant 0 : i32
    %c0_i32_0 = arith.constant 0 : i32
    %c0_i32_1 = arith.constant 0 : i32
    return %c0_i32, %c0_i32_0 : i32, i32
  }
  func.func @transform_6(%arg0: i32) -> (i32, i32) {
    %c0_i32 = arith.constant 0 : i32
    %c0_i32_0 = arith.constant 0 : i32
    %c0_i32_1 = arith.constant 0 : i32
    return %c0_i32, %c0_i32_0 : i32, i32
  }
  func.func @transform_7(%arg0: i32) -> (i32, i32) {
    %c0_i32 = arith.constant 0 : i32
    %c0_i32_0 = arith.constant 0 : i32
    %c0_i32_1 = arith.constant 0 : i32
    return %c0_i32, %c0_i32_0 : i32, i32
  }
  func.func @transform_8(%arg0: i32) -> (i32, i32) {
    %c0_i32 = arith.constant 0 : i32
    %c0_i32_0 = arith.constant 0 : i32
    %c0_i32_1 = arith.constant 0 : i32
    return %c0_i32, %c0_i32_0 : i32, i32
  }
  func.func @transform_9(%arg0: i32) -> (i32, i32, i32) {
    %c0_i32 = arith.constant 0 : i32
    %c0_i32_0 = arith.constant 0 : i32
    %c0_i32_1 = arith.constant 0 : i32
    return %arg0, %c0_i32, %c0_i32_0 : i32, i32, i32
  }
}

</mosaic_0001>

<bundles_post_ra>
// kernel: predictor_forward.3
= control target key start
LH: loop header
LB: loop body
LE: loop exit
PB: predicated region body
PF: predicated region fallthrough
CT: control target
= control target key end

     0   :  { %s864_s30 = smov 0   ;;  %s974_s0 = inlined_call_operand.vmem [shape: f32[2,8,32], index: 0, kind: input, shape index: {}]   ;;  %s975_s1 = inlined_call_operand.vmem [shape: f32[1,32], index: 1, kind: input, shape index: {}]   ;;  %s976_s2 = inlined_call_operand.vmem [shape: f32[1,32], index: 2, kind: input, shape index: {}]   ;;  %s977_s3 = inlined_call_operand.vmem [shape: bf16[32,2], index: 3, kind: input, shape index: {}]   ;;  %s978_s4 = inlined_call_operand.vmem [shape: f32[1,2], index: 4, kind: input, shape index: {}]   ;;  %s979_s5 = inlined_call_operand.vmem [shape: bf16[10,32], index: 5, kind: input, shape index: {}]   ;;  %s980_s6 = inlined_call_operand.vmem [shape: f32[1,32], index: 6, kind: input, shape index: {}]   ;;  %s981_s7 = inlined_call_operand.vmem [shape: bf16[160,2], index: 7, kind: input, shape index: {}]   ;;  %s982_s8 = inlined_call_operand.vmem [shape: f32[1,2], index: 8, kind: input, shape index: {}]   ;;  %s983_s9 = inlined_call_operand.vmem [shape: f32[2,8,128], index: 9, kind: output, shape index: {}]  }
   0x1 LB: > { %s694_s10 = sadd.s32 4294967295, %s804_s30   ;;  %p698_p0 = scmp.ge.s32.totalorder %s804_s30, 1  ;;  %s804_s30 = sphi %s864_s30, %s19_s30  }
   0x2   : > { %p286_p1 = scmp.lt.s32.totalorder %s804_s30, 3 }
   0x4   : > { %p287_p2 = pnand %p698_p0, %p286_p1 }
   0x5   : > { %p320_p3 = scmp.lt.s32.totalorder (!%p287_p2), %s694_s10, 1  ;;  %s807_s25 = smov (!%p287_p2), 6  }
   0x6   : > { %290 = sbr.rel (%p287_p2) target bundleno = 1065 (0x429), region = 56  ;;  %s808_s26 = smov (!%p287_p2), 2  }
   0x7   : > { %s809_s27 = smov (!%p287_p2), 8   ;;  %s810_s28 = smov (!%p287_p2), 4  }
   0x8   : > { %s811_s23 = smov (!%p287_p2), 96   ;;  %s812_s24 = smov (!%p287_p2), 64  }
   0xb   : > { %s985_s10 = smov (!%p320_p3, %s694_s10), 1  ;;  %vm332_vm0 = vcmask 261120   ;;  %v806_v2 = vmov 32.0   ;;  %v759_v14 = vld [vmem:[%s977_s3 + $0x8] sm:$0xff]  ;;  %v758_v15 = vld [vmem:[%s977_s3] sm:$0xff]  ;;  %vm411_vm5 = vcmask 1041408  }
   0xc   : > { %s699_s11 = sshll.u32 %s985_s10, 3  ;;  %792 = vrcp.f32 %v806_v2  ;;  %400 = vmatpush.bf16.msra.mxu0 %v759_v14  ;;  %v787_v25 = vld [vmem:[%s975_s1] ss:$0 sm:$0xff]  ;;  %vm430_vm6 = vcmask 1044480   ;;  %vm416_vm7 = vcmask 1046528   ;;  %vm437_vm8 = vcmask 1043456  }
   0xd   : > { %s323_s14 = scalar_lea.vmem %s974_s0, %s699_s11  ;;  %v788_v28 = vld [vmem:[%s976_s2] ss:$0 sm:$0xff]  ;;  %vm423_vm9 = vcmask 1045504   ;;  %v760_v52 = vld [vmem:[%s979_s5] sm:$0x10]  ;;  %vm444_vm10 = vcmask 15360  }
   0xe   : > { %v329_v0 = vld [vmem:[%s323_s14] sm:$0xff]  ;;  %vm446_vm11 = vcmask 31744   ;;  %vm448_vm12 = vcmask 48128   ;;  %vm450_vm13 = vcmask 64512   ;;  %vm463_vm14 = vcmask 80896   ;;  %v768_v2 = vld [vmem:[%s981_s7 + $0x38] sm:$0xff] }
   0xf   : > { %v333_v1 = vsel %vm332_vm0, %v329_v0, 0.0  ;;  %v789_v32 = vld [vmem:[%s978_s4] ss:$0 sm:$0xff]  ;;  %607 = vmatpush.bf16.msra.mxu2 %v768_v2  ;;  %vm515_vm15 = vcmask 523264  }
  0x10   : > { %334 = vadd.xlane.f32.xlu0 %v333_v1  ;;  %401 = vmatpush.bf16.msra.mxu0 %v758_v15  ;;  %v712_v51 = vld [vmem:[%s979_s5] sm:$0xf] }
  0x11   : > { %v713_v53 = vor.u32 %v760_v52, %v712_v51  ;;  %v769_v1 = vld [vmem:[%s981_s7 + $0x40] sm:$0xff] }
  0x12   : > { %v793_v3 = vpop.eup %792 }
  0x13   : > { %v337_v4 = vmul.f32 32.0, %v793_v3  ;;  %vm341_vm1 = vweird.f32 %v793_v3  ;;  %v468_v54 = vsel %vm430_vm6, %v713_v53, 0 }
  0x14   : > { %477 = vmatpush.bf16.msra.mxu1 %v468_v54 }
  0x15   : > { %v338_v5 = vsub.f32 1.0, %v337_v4 }
  0x17   : > { %v339_v6 = vmul.f32 %v793_v3, %v338_v5 }
  0x19   : > { %v340_v7 = vadd.f32 %v793_v3, %v339_v6 }
  0x1b   : > { %v342_v8 = vsel %vm341_vm1, %v793_v3, %v340_v7  ;;  %v790_v3 = vld [vmem:[%s980_s6] ss:$0 sm:$0xff]  ;;  %vm517_vm1 = vcmask 785408  }
  0x83   : > { %v335_v9 = vpop.xlane.xlu0 %334 }
  0x84   : > { %v343_v10 = vmul.f32 %v342_v8, %v335_v9 }
  0x86   : > { %v344_v11 = vsub.f32 %v329_v0, %v343_v10  ;;  %v770_v0 = vld [vmem:[%s981_s7 + $0x48] sm:$0xff] }
  0x87   : > { %626 = vmatpush.bf16.msra.mxu3 %v770_v0 }
  0x88   : > { %v345_v12 = vmul.f32 %v344_v11, %v344_v11 }
  0x8a   : > { %v346_v13 = vsel %vm332_vm0, %v345_v12, 0.0 }
  0x8b   : > { %347 = vadd.xlane.f32.xlu0 %v346_v13  ;;  %627 = vmatpush.bf16.msra.mxu3 %v769_v1 }
  0xfe   : > { %v348_v16 = vpop.xlane.xlu0 %347 }
  0xff   : > { %v349_v17 = vmul.f32 %v348_v16, %v342_v8 }
 0x101   : > { %v350_v18 = vadd.f32 1e-12, %v349_v17 }
 0x103   : > { %794 = vrsqrt.f32 %v350_v18  ;;  %vm357_vm3 = vweird.f32 %v350_v18 }
 0x109   : > { %v795_v19 = vpop.eup %794 }
 0x10a   : > { %v352_v20 = vmul.f32 %v795_v19, %v350_v18  ;;  %vm358_vm2 = vweird.f32 %v795_v19 }
 0x10b   : > { %vm359_vm4 = vmor %vm357_vm3, %vm358_vm2 }
 0x10c   : > { %v353_v21 = vmul.f32 %v795_v19, %v352_v20 }
 0x10e   : > { %v354_v22 = vmul.f32 0.5, %v353_v21 }
 0x110   : > { %v355_v23 = vsub.f32 1.5, %v354_v22 }
 0x112   : > { %v356_v24 = vmul.f32 %v795_v19, %v355_v23 }
 0x114   : > { %v360_v26 = vsel %vm359_vm4, %v795_v19, %v356_v24  ;;  %v767_v24 = vld [vmem:[%s981_s7 + $0x30] sm:$0xff] }
 0x115   : > { %v361_v27 = vmul.f32 %v360_v26, %v344_v11  ;;  %608 = vmatpush.bf16.msra.mxu2 %v767_v24  ;;  %v765_v26 = vld [vmem:[%s981_s7 + $0x20] sm:$0xff] }
 0x117   : > { %v365_v29 = vmul.f32 %v787_v25, %v361_v27  ;;  %v766_v25 = vld [vmem:[%s981_s7 + $0x28] sm:$0xff]  ;;  %v764_v27 = vld [vmem:[%s981_s7 + $0x18] sm:$0xff] }
 0x119   : > { %v369_v30 = vadd.f32 %v788_v28, %v365_v29  ;;  %609 = vmatpush.bf16.msra.mxu2 %v766_v25  ;;  %v763_v28 = vld [vmem:[%s981_s7 + $0x10] sm:$0xff]  ;;  %v762_v29 = vld [vmem:[%s981_s7 + $0x8] sm:$0xff] }
 0x11b   : > { %v374_v31 = vpack.c.bf16 %v369_v30, %v369_v30  ;;  %v761_v30 = vld [vmem:[%s981_s7] sm:$0xff] }
 0x11d   : > { %709 = vmatmul.msk.bf16.vlgmr.msra.gmra.mxu0 %vm332_vm0, %v374_v31  ;;  %610 = vmatpush.bf16.msra.mxu2 %v765_v26 }
 0x121   : > { %611 = vmatpush.bf16.msra.mxu2 %v764_v27 }
 0x125   : > { %612 = vmatpush.bf16.msra.mxu2 %v763_v28 }
 0x129   : > { %613 = vmatpush.bf16.msra.mxu2 %v762_v29 }
 0x12d   : > { %614 = vmatpush.bf16.msra.mxu2 %v761_v30 }
 0x19a   : > { %v403_v33 = vpop.f32.mrf.mxu0 }
 0x19b   : > { %v898_v34 = vadd.f32 %v789_v32, %v403_v33 }
 0x19d   : > { %v409_v35 = vrot.slane %v898_v34, 6 }
 0x19f   : > { %v412_v36 = vsel %vm411_vm5, 0.0, %v409_v35  ;;  %v413_v37 = vsel %vm411_vm5, %v409_v35, 0.0 }
 0x1a0   : > { %v431_v38 = vrot.slane %v412_v36, 3  ;;  %v432_v39 = vrot.slane %v413_v37, 3  ;;  %v417_v40 = vrot.slane %v412_v36, 1  ;;  %v418_v41 = vrot.slane %v413_v37, 1 }
 0x1a1   : > { %v438_v45 = vrot.slane %v412_v36, 4  ;;  %v439_v46 = vrot.slane %v413_v37, 4  ;;  %v424_v47 = vrot.slane %v412_v36, 2  ;;  %v425_v48 = vrot.slane %v413_v37, 2 }
 0x1a2   : > { %v405_v42 = vpop.f32.mrf.mxu0  ;;  %v433_v43 = vsel %vm430_vm6, %v431_v38, %v432_v39  ;;  %v419_v44 = vsel %vm416_vm7, %v417_v40, %v418_v41  ;;  %v791_v41 = vld [vmem:[%s982_s8] ss:$0 sm:$0xff] }
 0x1a3   : > { %434 = vrot.lane.b32.xlu2 %v433_v43, %s807_s25  ;;  %420 = vrot.lane.b32.xlu1 %v419_v44, %s808_s26  ;;  %v440_v49 = vsel %vm437_vm8, %v438_v45, %v439_v46  ;;  %v426_v50 = vsel %vm423_vm9, %v424_v47, %v425_v48  ;;  %s813_s25 = smov 32  }
 0x1ab   : > { %441 = vrot.lane.b32.xlu2 %v440_v49, %s809_s27  ;;  %427 = vrot.lane.b32.xlu1 %v426_v50, %s810_s28  ;;  %s327_s28 = scalar_lea.vmem %s983_s9, %s699_s11 }
 0x1fd   : > { %v435_v55 = vpop.permute.xlu2 %434 }
 0x205   : > { %v442_v60 = vpop.permute.xlu2 %441 }
 0x215   : > { %v421_v56 = vpop.permute.xlu1 %420 }
 0x216   : > { %v445_v57 = vsel %vm444_vm10, %v412_v36, %v421_v56 }
 0x21d   : > { %v428_v58 = vpop.permute.xlu1 %427 }
 0x21e   : > { %v447_v59 = vsel %vm446_vm11, %v445_v57, %v428_v58 }
 0x21f   : > { %v449_v61 = vsel %vm448_vm12, %v447_v59, %v435_v55 }
 0x220   : > { %v451_v62 = vsel %vm450_vm13, %v449_v61, %v442_v60 }
 0x221   : > { %v454_v63 = vpack.c.bf16 %v451_v62, %v451_v62 }
 0x223   : > { %714 = vmatmul.msk.bf16.vlgmr.msra.gmra.mxu1 %vm463_vm14, %v454_v63 }
 0x2a0   : > { %v479_v4 = vpop.f32.mrf.mxu1 }
 0x2a1   : > { %v480_v5 = vadd.f32 %v790_v3, %v479_v4 }
 0x2a3   : > { %796 = vtanh.f32 %v480_v5 }
 0x2a8   : > { %v481_v6 = vpop.f32.mrf.mxu1 }
 0x2a9   : > { %v797_v7 = vpop.eup %796 }
 0x2aa   : > { %v486_v8 = vrot.slane %v797_v7, 6 }
 0x2ac   : > { %v488_v9 = vsel %vm411_vm5, 0.0, %v486_v8  ;;  %v489_v10 = vsel %vm411_vm5, %v486_v8, 0.0 }
 0x2ad   : > { %v504_v11 = vrot.slane %v488_v9, 3  ;;  %v505_v12 = vrot.slane %v489_v10, 3  ;;  %v498_v13 = vrot.slane %v488_v9, 2  ;;  %v499_v14 = vrot.slane %v489_v10, 2 }
 0x2ae   : > { %v492_v15 = vrot.slane %v488_v9, 1  ;;  %v493_v16 = vrot.slane %v489_v10, 1  ;;  %v510_v17 = vrot.slane %v488_v9, 4  ;;  %v511_v18 = vrot.slane %v489_v10, 4 }
 0x2af   : > { %v506_v19 = vsel %vm430_vm6, %v504_v11, %v505_v12  ;;  %v500_v20 = vsel %vm423_vm9, %v498_v13, %v499_v14 }
 0x2b0   : > { %507 = vrot.lane.b32.xlu2 %v506_v19, %s811_s23  ;;  %501 = vrot.lane.b32.xlu1 %v500_v20, %s812_s24  ;;  %v494_v21 = vsel %vm416_vm7, %v492_v15, %v493_v16  ;;  %v512_v22 = vsel %vm437_vm8, %v510_v17, %v511_v18 }
 0x2b1   : > { %495 = vrot.lane.b32.xlu0 %v494_v21, %s813_s25  ;;  %v540_v23 = vpack.c.bf16 %v512_v22, %v512_v22 }
 0x2b3   : > { %755 = vmatmul.msk.bf16.vlgmr.msra.gmra.mxu3 %vm332_vm0, %v540_v23 }
 0x30a   : > { %v508_v35 = vpop.permute.xlu2 %507 }
 0x322   : > { %v502_v31 = vpop.permute.xlu1 %501 }
 0x323   : > { %v496_v32 = vpop.permute.xlu0 %495 }
 0x324   : > { %v514_v33 = vsel %vm332_vm0, %v488_v9, %v496_v32 }
 0x325   : > { %v516_v36 = vsel %vm515_vm15, %v514_v33, %v502_v31 }
 0x326   : > { %v518_v37 = vsel %vm517_vm1, %v516_v36, %v508_v35 }
 0x327   : > { %v539_v38 = vpack.c.bf16 %v518_v37, %v518_v37 }
 0x329   : > { %615 = vmatmul.bf16.vlgmr.msra.gmra.mxu2 %v539_v38 }
 0x336   : > { %v629_v39 = vpop.f32.mrf.mxu3 }
 0x33e   : > { %v631_v40 = vpop.f32.mrf.mxu3 }
 0x3ac   : > { %v616_v42 = vpop.f32.mrf.mxu2 }
 0x3ad   : > { %v617_v43 = vadd.f32 %v791_v41, %v616_v42 }
 0x3af   : > { %v630_v44 = vadd.f32 %v629_v39, %v617_v43 }
 0x3b1   : > { %v633_v45 = vadd.f32 %v630_v44, %v898_v34 }
 0x3b3   : > { %635 = vrot.lane.b32.xlu1 %v633_v45, %s808_s26 }
 0x3b4   : > { %v618_v46 = vpop.f32.mrf.mxu2 }
 0x425   : > { %v636_v47 = vpop.permute.xlu1 %635 }
 0x426   : > { %v638_v48 = vsel %vm444_vm10, %v898_v34, %v636_v47 }
 0x427   : > { %v639_v49 = vsel %vm446_vm11, %v638_v48, 0.0 }
 0x428   : > { %640 = vst [vmem:[%s327_s28] sm:$0xff] %v639_v49 }
 0x429 PF: > { %s19_s30 = sadd.s32 1, %s804_s30  }
 0x42a   : > { %p16_p4 = scmp.ge.s32.totalorder %s19_s30, 4  }
 0x42c   :  { %18 = sbr.rel (!%p16_p4) target bundleno = 1 (0x1), region = 86 }

// kernel: predictor_forward.2
= control target key start
LH: loop header
LB: loop body
LE: loop exit
PB: predicated region body
PF: predicated region fallthrough
CT: control target
= control target key end

     0   :  { %s3280_s27 = smov 0   ;;  %s3282_s28 = smov 0   ;;  %s3732_s0 = inlined_call_operand.vmem [shape: bf16[2,8,13], index: 0, kind: input, shape index: {}]   ;;  %s3733_s1 = inlined_call_operand.vmem [shape: f32[2,1,8], index: 1, kind: input, shape index: {}]   ;;  %s3734_s2 = inlined_call_operand.vmem [shape: bf16[13,32], index: 2, kind: input, shape index: {}]   ;;  %s3735_s3 = inlined_call_operand.vmem [shape: f32[1,32], index: 3, kind: input, shape index: {}]   ;;  %s3736_s4 = inlined_call_operand.vmem [shape: bf16[2,15,32], index: 4, kind: input, shape index: {}]   ;;  %s3737_s5 = inlined_call_operand.vmem [shape: f32[2,5,32], index: 5, kind: input, shape index: {}]   ;;  %s3738_s6 = inlined_call_operand.vmem [shape: f32[2,5,32], index: 6, kind: input, shape index: {}]   ;;  %s3739_s7 = inlined_call_operand.vmem [shape: bf16[2,2,96,128], index: 7, kind: input, shape index: {}]   ;;  %s3740_s8 = inlined_call_operand.vmem [shape: f32[2,2,128], index: 8, kind: input, shape index: {}]   ;;  %s3741_s9 = inlined_call_operand.vmem [shape: bf16[2,2,384,32], index: 9, kind: input, shape index: {}]   ;;  %s3742_s10 = inlined_call_operand.vmem [shape: f32[2,2,32], index: 10, kind: input, shape index: {}]   ;;  %s3743_s11 = inlined_call_operand.vmem [shape: bf16[2,32,96], index: 11, kind: input, shape index: {}]   ;;  %s3744_s12 = inlined_call_operand.vmem [shape: f32[2,1,96], index: 12, kind: input, shape index: {}]   ;;  %s3745_s13 = inlined_call_operand.vmem [shape: bf16[2,32,32], index: 13, kind: input, shape index: {}]   ;;  %s3746_s14 = inlined_call_operand.vmem [shape: bf16[2,32,64], index: 14, kind: input, shape index: {}]   ;;  %s3747_s15 = inlined_call_operand.vmem [shape: bf16[2,32,32], index: 15, kind: input, shape index: {}]   ;;  %s3748_s16 = inlined_call_operand.vmem [shape: f32[2,7,32], index: 16, kind: input, shape index: {}]   ;;  %s3749_s17 = inlined_call_operand.vmem [shape: f32[2,31,32], index: 17, kind: input, shape index: {}]   ;;  %s3750_s18 = inlined_call_operand.vmem [shape: f32[2,8,32], index: 18, kind: output, shape index: {}]  }
   0x1   :  { %3758 = sst [smem:[#allocation11_spill]] %s3732_s0  ;;  %s3284_s29 = smov 0  }
   0x2   :  { %3759 = sst [smem:[#allocation12_spill]] %s3733_s1  ;;  %s3286_s30 = smov 0  }
   0x3   :  { %3760 = sst [smem:[#allocation13_spill]] %s3734_s2  ;;  %s3288_s0 = smov 0  }
   0x4   :  { %3761 = sst [smem:[#allocation14_spill]] %s3735_s3 }
   0x5   :  { %3762 = sst [smem:[#allocation15_spill]] %s3736_s4 }
   0x6   :  { %3763 = sst [smem:[#allocation16_spill]] %s3737_s5 }
   0x7   :  { %3764 = sst [smem:[#allocation17_spill]] %s3738_s6 }
   0x8   :  { %3765 = sst [smem:[#allocation18_spill]] %s3739_s7 }
   0x9   :  { %3766 = sst [smem:[#allocation19_spill]] %s3740_s8 }
   0xa   :  { %3767 = sst [smem:[#allocation20_spill]] %s3741_s9 }
   0xb   :  { %3768 = sst [smem:[#allocation21_spill]] %s3742_s10 }
   0xc   :  { %3769 = sst [smem:[#allocation22_spill]] %s3743_s11 }
   0xd   :  { %3770 = sst [smem:[#allocation23_spill]] %s3745_s13 }
   0xe   :  { %3771 = sst [smem:[#allocation24_spill]] %s3746_s14 }
   0xf   :  { %3772 = sst [smem:[#allocation25_spill]] %s3750_s18 }
  0x10 LB: > { %3773 = sst [smem:[#allocation2_spill]] %s3150_s27  ;;  %s37_s19 = sadd.s32 1, %s3158_s29  ;;  %s3166_s0 = sphi %s3288_s0, %s28_s0   ;;  %s3162_s30 = sphi %s3286_s30, %s3813_s30   ;;  %s3158_s29 = sphi %s3284_s29, %s3812_s29   ;;  %s3154_s28 = sphi %s3282_s28, %s3811_s28   ;;  %s3150_s27 = sphi %s3280_s27, %s3810_s27  }
  0x11   : > { %3774 = sst [smem:[#allocation3_spill]] %s3158_s29  ;;  %s40_s1 = sadd.s32 1, %s3162_s30 }
  0x12   : > { %3775 = sst [smem:[#allocation4_spill]] %s3162_s30  ;;  %p38_p0 = scmp.ge.s32.totalorder %s37_s19, 2 }
  0x13   : > { %3776 = sst [smem:[#allocation5_spill]] %s3166_s0  ;;  %p2568_p1 = scmp.ge.s32.totalorder %s3166_s0, 1 }
  0x14   : > { %p664_p2 = scmp.lt.s32.totalorder %s3166_s0, 5  ;;  %s3815_s19 = smov (%p38_p0, %s37_s19), 0 }
  0x15   : > { %3777 = sst [smem:[#allocation6_spill]] %s3815_s19  ;;  %s3817_s1 = smov (!%p38_p0, %s40_s1), %s3162_s30 }
  0x16   : > { %p665_p3 = pnand %p2568_p1, %p664_p2  ;;  %p42_p4 = scmp.ge.s32.totalorder %s3817_s1, 2 }
  0x18   : > { %s3819_s1 = smov (%p42_p4, %s3817_s1), 0  ;;  %668 = sbr.rel (%p665_p3) target bundleno = 4091 (0xffb), region = 92 }
  0x19   : > { %3778 = sst [smem:[#allocation7_spill]] %s3819_s1 }
  0x1d   : > { %p782_p5 = scmp.lt.s32.totalorder %s3154_s28, 1  ;;  %p789_p6 = scmp.lt.s32.totalorder %s3150_s27, 1 }
  0x1e   : > { %s3780_s1 = sld [smem:[#allocation11_spill]] }
  0x1f   : > { %s3821_s28 = smov (!%p782_p5, %s3154_s28), 1  ;;  %s3783_s5 = sld [smem:[#allocation16_spill]] }
  0x20   : > { %s3316_s20 = scalar_select %p789_p6, %s3150_s27, 1 }
  0x21   : > { %s2569_s21 = sshll.u32 %s3821_s28, 2  ;;  %s3785_s6 = sld [smem:[#allocation17_spill]] }
  0x22   : > { %s3329_s30 = sshll.u32 %s3316_s20, 3  ;;  %s2575_s25 = sshll.u32 %s3316_s20, 1 }
  0x23   : > { %s3036_s26 = smul.u32 384, %s3316_s20  ;;  %s3787_s7 = sld [smem:[#allocation18_spill]] }
  0x24   : > { %s3326_s19 = scalar_lea.vmem %s3780_s1, %s2569_s21  ;;  %s3035_s21 = smul.u32 96, %s3316_s20 }
  0x25   : > { %3781 = sst [smem:[#allocation8_spill]] %s3326_s19  ;;  %s3339_s22 = scalar_lea.vmem %s3783_s5, %s3329_s30 }
  0x26   : > { %3784 = sst [smem:[#allocation9_spill]] %s3339_s22  ;;  %s2960_s22 = sshll.u32 %s3316_s20, 4 }
  0x27   : > { %s3345_s1 = scalar_lea.vmem %s3785_s6, %s3329_s30  ;;  %s3788_s8 = sld [smem:[#allocation19_spill]] }
  0x28   : > { %3786 = sst [smem:[#allocation10_spill]] %s3345_s1  ;;  %s3393_s19 = scalar_lea.vmem %s3747_s15, %s2960_s22 }
  0x29   : > { %s3353_s24 = scalar_lea.vmem %s3787_s7, %s3035_s21  ;;  %s3789_s9 = sld [smem:[#allocation20_spill]] }
  0x2a   : > { %s3790_s10 = sld [smem:[#allocation21_spill]]  ;;  %s2964_s0 = sshll.u32 %s3316_s20, 5 }
  0x2b   : > { %s3791_s11 = sld [smem:[#allocation22_spill]]  ;;  %s2589_s18 = sshll.u32 %s3821_s28, 3 }
  0x2c   : > { %s3792_s13 = sld [smem:[#allocation23_spill]] }
  0x2d   : > { %s3358_s27 = scalar_lea.vmem %s3788_s8, %s2575_s25  ;;  %s3793_s14 = sld [smem:[#allocation24_spill]] }
  0x2e   : > { %s3403_s8 = scalar_lea.vmem %s3749_s17, %s2964_s0 }
  0x2f   : > { %s3363_s2 = scalar_lea.vmem %s3789_s9, %s3036_s26  ;;  %s3794_s26 = sld [smem:[#allocation25_spill]] }
  0x30   : > { %s3368_s1 = scalar_lea.vmem %s3790_s10, %s2575_s25 }
  0x31   : > { %s3378_s3 = scalar_lea.vmem %s3791_s11, %s2960_s22 }
  0x32   : > { %s3383_s4 = scalar_lea.vmem %s3792_s13, %s2960_s22 }
  0x33   : > { %s3388_s6 = scalar_lea.vmem %s3793_s14, %s2960_s22  ;;  %s3795_s14 = sld [smem:[#allocation2_spill]] }
  0x35   : > { %s3409_s13 = scalar_lea.vmem %s3794_s26, %s2589_s18 }
  0x39   : > { %p2590_p7 = scmp.ne.s32.totalorder %s3795_s14, 0 }
  0x3a   : > { %s3796_s23 = sld [smem:[#allocation13_spill]] (!%p2590_p7) }
  0x3b   : > { %860 = sbr.rel (%p2590_p7) target bundleno = 207 (0xcf), region = 96  ;;  %s3797_s21 = sld [smem:[#allocation8_spill]] (!%p2590_p7) }
  0x3c   : > { %s3798_s11 = sld [smem:[#allocation14_spill]] (!%p2590_p7) }
  0x40   : > { %v2593_v0 = vld [vmem:[%s3796_s23] sm:$0xf]  ;;  %v2965_v1 = vld [vmem:[%s3796_s23] sm:$0x70]  ;;  %vm877_vm0 = vcmask 1045504   ;;  %vm878_vm1 = vcmask 1046528  }
  0x41   : > { %v2594_v2 = vor.u32 %v2965_v1, %v2593_v0  ;;  %v3168_v3 = vmov 65535   ;;  %v861_v7 = vld [vmem:[%s3797_s21] sm:$0xf]  ;;  %vm873_vm2 = vcmask 105472   ;;  %vm898_vm3 = vcmask 261120  }
  0x42   : > { %v879_v4 = vsel %vm877_vm0, 4294967295, %v3168_v3  ;;  %v3094_v8 = vld [vmem:[%s3798_s11] ss:$0 sm:$0xff] }
  0x43   : > { %v880_v5 = vsel %vm878_vm1, %v879_v4, 0 }
  0x44   : > { %v882_v6 = vand.u32 %v2594_v2, %v880_v5 }
  0x46   : > { %891 = vmatpush.bf16.msra.mxu0 %v882_v6 }
  0x49   : > { %2595 = vmatmul.msk.bf16.vlgmr.msra.gmra.mxu0 %vm873_vm2, %v861_v7 }
  0xc6   : > { %v893_v9 = vpop.f32.mrf.mxu0 }
  0xc7   : > { %v894_v10 = vadd.f32 %v3094_v8, %v893_v9 }
  0xc9   : > { %v897_v11 = vmul.f32 5.656854, %v894_v10 }
  0xcb   : > { %899 = vst.msk [vmem:[%s3409_s13] sm:$0xff] %vm898_vm3, %v897_v11 }
  0xce   : > { %v895_v12 = vpop.f32.mrf.mxu0 }
  0xcf PF: > { %vm914_vm4 = vcmask 261120   ;;  %v3169_v15 = vmov 32.0   ;;  %s3799_s14 = sld [smem:[#allocation9_spill]]  ;;  %v2972_v31 = vld [vmem:[%s3353_s24 + $0x28] sm:$0xff]  ;;  %v2971_v33 = vld [vmem:[%s3353_s24 + $0x20] sm:$0xff]  ;;  %v2970_v36 = vld [vmem:[%s3353_s24 + $0x18] sm:$0xff]  ;;  %s3805_s9 = scalar_lea.vmem %s3748_s16, %s3329_s30 }
  0xd0   : > { %3096 = vrcp.f32 %v3169_v15  ;;  %s3800_s7 = sld [smem:[#allocation10_spill]]  ;;  %1029 = vmatpush.bf16.msra.mxu0 %v2972_v31  ;;  %vm951_vm9 = vcmask 1040384   ;;  %vm956_vm10 = vcmask 1046528   ;;  %s3170_s0 = smov 32   ;;  %vm963_vm11 = vcmask 1045504   ;;  %v2969_v56 = vld [vmem:[%s3353_s24 + $0x10] sm:$0xff] }
  0xd1   : > { %s3171_s18 = smov 64   ;;  %v2968_v57 = vld [vmem:[%s3353_s24 + $0x8] sm:$0xff]  ;;  %v2967_v58 = vld [vmem:[%s3353_s24] sm:$0xff]  ;;  %v2980_v59 = vld [vmem:[%s3363_s2 + $0x38] sm:$0xff]  ;;  %vm971_vm12 = vcmask 523264   ;;  %vm1023_vm13 = vcmask 785408   ;;  %s3806_s5 = scalar_lea.vmem %s3744_s12, %s3316_s20 }
  0xd2   : > { %v3424_v13 = vld [vmem:[%s3409_s13] sm:$0xff]  ;;  %v2988_v60 = vld [vmem:[%s3363_s2 + $0x78] sm:$0xff]  ;;  %1252 = vmatpush.bf16.msra.mxu1 %v2980_v59  ;;  %v2979_v62 = vld [vmem:[%s3363_s2 + $0x30] sm:$0xff]  ;;  %s3803_s22 = sld [smem:[#allocation15_spill]]  ;;  %s3172_s21 = smov 112   ;;  %vm1369_vm3 = vcmask 130048  }
  0xd3   : > { %v915_v14 = vsel %vm914_vm4, %v3424_v13, 0.0  ;;  %v2996_v61 = vld [vmem:[%s3363_s2 + $0xb8] sm:$0xff]  ;;  %1265 = vmatpush.bf16.msra.mxu2 %v2988_v60  ;;  %v2987_v63 = vld [vmem:[%s3363_s2 + $0x70] sm:$0xff]  ;;  %v2978_v1 = vld [vmem:[%s3363_s2 + $0x28] sm:$0xff]  ;;  %s3173_s26 = smov 80   ;;  %s3175_s20 = smov 3  }
  0xd4   : > { %916 = vadd.xlane.f32.xlu0 %v915_v14  ;;  %1030 = vmatpush.bf16.msra.mxu0 %v2971_v33  ;;  %v2995_v0 = vld [vmem:[%s3363_s2 + $0xb0] sm:$0xff]  ;;  %v2986_v2 = vld [vmem:[%s3363_s2 + $0x68] sm:$0xff]  ;;  %v2977_v4 = vld [vmem:[%s3363_s2 + $0x20] sm:$0xff]  ;;  %s3180_s29 = smov 4   ;;  %s3182_s10 = smov 121  }
  0xd5   : > { %v3438_v38 = vld [vmem:[%s3799_s14] sm:$0x1f]  ;;  %1278 = vmatpush.bf16.msra.mxu3 %v2996_v61  ;;  %v2994_v3 = vld [vmem:[%s3363_s2 + $0xa8] sm:$0xff]  ;;  %v2976_v7 = vld [vmem:[%s3363_s2 + $0x18] sm:$0xff] }
  0xd6   : > { %v3097_v16 = vpop.eup %3096  ;;  %v3441_v40 = vld [vmem:[%s3800_s7] sm:$0x1f]  ;;  %v944_v41 = vperm.slane %v3438_v38, 0  ;;  %1253 = vmatpush.bf16.msra.mxu1 %v2979_v62  ;;  %v2984_v8 = vld [vmem:[%s3363_s2 + $0x58] sm:$0xff]  ;;  %v2975_v10 = vld [vmem:[%s3363_s2 + $0x10] sm:$0xff] }
  0xd7   : > { %v919_v17 = vmul.f32 32.0, %v3097_v16  ;;  %vm923_vm5 = vweird.f32 %v3097_v16  ;;  %v946_v44 = vperm.slane %v3441_v40, 0  ;;  %1266 = vmatpush.bf16.msra.mxu2 %v2987_v63  ;;  %v2985_v5 = vld [vmem:[%s3363_s2 + $0x60] sm:$0xff]  ;;  %v2992_v9 = vld [vmem:[%s3363_s2 + $0x98] sm:$0xff]  ;;  %vm3483_vm14 = vmneg %vm951_vm9 }
  0xd8   : > { %1031 = vmatpush.bf16.msra.mxu0 %v2970_v36  ;;  %v2993_v6 = vld [vmem:[%s3363_s2 + $0xa0] sm:$0xff]  ;;  %vm2720_vm15 = vmpackc.low %vm3483_vm14, %vm3483_vm14  ;;  %s3804_s25 = scalar_lea.vmem %s3803_s22, %s3329_s30  ;;  %s3174_s30 = smov 96  }
  0xd9   : > { %v920_v18 = vsub.f32 1.0, %v919_v17  ;;  %1279 = vmatpush.bf16.msra.mxu3 %v2995_v0  ;;  %v2974_v17 = vld [vmem:[%s3363_s2 + $0x8] sm:$0xff]  ;;  %s3176_s22 = smov 2  }
  0xda   : > { %1254 = vmatpush.bf16.msra.mxu1 %v2978_v1 }
  0xdb   : > { %v921_v19 = vmul.f32 %v3097_v16, %v920_v18  ;;  %1267 = vmatpush.bf16.msra.mxu2 %v2986_v2  ;;  %v2983_v18 = vld [vmem:[%s3363_s2 + $0x50] sm:$0xff]  ;;  %v2998_v2 = vld [vmem:[%s3378_s3 + $0x8] sm:$0xff] }
  0xdc   : > { %1032 = vmatpush.bf16.msra.mxu0 %v2969_v56 }
  0xdd   : > { %v922_v20 = vadd.f32 %v3097_v16, %v921_v19  ;;  %1280 = vmatpush.bf16.msra.mxu3 %v2994_v3  ;;  %v2991_v19 = vld [vmem:[%s3363_s2 + $0x90] sm:$0xff]  ;;  %v2997_v3 = vld [vmem:[%s3378_s3] sm:$0xff]  ;;  %s3179_s3 = smov 5  }
  0xde   : > { %1255 = vmatpush.bf16.msra.mxu1 %v2977_v4 }
  0xdf   : > { %v3428_v21 = vsel %vm923_vm5, %v3097_v16, %v922_v20  ;;  %1268 = vmatpush.bf16.msra.mxu2 %v2985_v5  ;;  %v2973_v20 = vld [vmem:[%s3363_s2] sm:$0xff]  ;;  %vm1412_vm5 = vcmask 1041408  }
  0xe0   : > { %1033 = vmatpush.bf16.msra.mxu0 %v2968_v57 }
  0xe1   : > { %1281 = vmatpush.bf16.msra.mxu3 %v2993_v6 }
  0xe2   : > { %1256 = vmatpush.bf16.msra.mxu1 %v2976_v7 }
  0xe3   : > { %1269 = vmatpush.bf16.msra.mxu2 %v2984_v8 }
  0xe4   : > { %1034 = vmatpush.bf16.msra.mxu0 %v2967_v58 }
  0xe5   : > { %1282 = vmatpush.bf16.msra.mxu3 %v2992_v9 }
  0xe6   : > { %1257 = vmatpush.bf16.msra.mxu1 %v2975_v10 }
  0xe7   : > { %1270 = vmatpush.bf16.msra.mxu2 %v2983_v18 }
  0xe8   : > { %1348 = vmatpush.bf16.msrb.mxu0 %v2998_v2 }
  0xe9   : > { %1283 = vmatpush.bf16.msra.mxu3 %v2991_v19 }
  0xea   : > { %1258 = vmatpush.bf16.msra.mxu1 %v2974_v17  ;;  %v1317_v17 = vperm.slane %v3441_v40, 1 }
  0xec   : > { %1349 = vmatpush.bf16.msrb.mxu0 %v2997_v3 }
  0xee   : > { %1259 = vmatpush.bf16.msra.mxu1 %v2973_v20 }
 0x147   : > { %v917_v22 = vpop.xlane.xlu0 %916 }
 0x148   : > { %v925_v23 = vmul.f32 %v3428_v21, %v917_v22  ;;  %v2982_v22 = vld [vmem:[%s3363_s2 + $0x48] sm:$0xff] }
 0x149   : > { %1271 = vmatpush.bf16.msra.mxu2 %v2982_v22 }
 0x14a   : > { %v926_v24 = vsub.f32 %v3424_v13, %v925_v23  ;;  %v2990_v23 = vld [vmem:[%s3363_s2 + $0x88] sm:$0xff] }
 0x14b   : > { %1284 = vmatpush.bf16.msra.mxu3 %v2990_v23  ;;  %v3526_v23 = vld [vmem:[%s3805_s9] sm:$0x7f]  ;;  %s3181_s9 = smov 7  }
 0x14c   : > { %v927_v25 = vmul.f32 %v926_v24, %v926_v24 }
 0x14e   : > { %v928_v26 = vsel %vm914_vm4, %v927_v25, 0.0  ;;  %v2989_v25 = vld [vmem:[%s3363_s2 + $0x80] sm:$0xff] }
 0x14f   : > { %929 = vadd.xlane.f32.xlu0 %v928_v26  ;;  %1285 = vmatpush.bf16.msra.mxu3 %v2989_v25  ;;  %v907_v26 = vld [vmem:[%s3358_s27] sm:$0x3]  ;;  %v1360_v25 = vperm.slane %v3526_v23, 2 }
 0x1c2   : > { %v930_v27 = vpop.xlane.xlu0 %929 }
 0x1c3   : > { %v931_v28 = vmul.f32 %v930_v27, %v3428_v21  ;;  %v986_v27 = vperm.slane %v907_v26, 0 }
 0x1c5   : > { %v932_v29 = vadd.f32 1e-12, %v931_v28 }
 0x1c7   : > { %3098 = vrsqrt.f32 %v932_v29  ;;  %vm939_vm7 = vweird.f32 %v932_v29 }
 0x1cd   : > { %v3099_v30 = vpop.eup %3098 }
 0x1ce   : > { %v934_v32 = vmul.f32 %v3099_v30, %v932_v29  ;;  %vm940_vm6 = vweird.f32 %v3099_v30 }
 0x1cf   : > { %vm941_vm8 = vmor %vm939_vm7, %vm940_vm6  ;;  %vm1414_vm6 = vcmask 1042432   ;;  %vm1416_vm7 = vcmask 1043456  }
 0x1d0   : > { %v935_v34 = vmul.f32 %v3099_v30, %v934_v32 }
 0x1d2   : > { %v936_v35 = vmul.f32 0.5, %v935_v34 }
 0x1d4   : > { %v937_v37 = vsub.f32 1.5, %v936_v35 }
 0x1d6   : > { %v938_v39 = vmul.f32 %v3099_v30, %v937_v37 }
 0x1d8   : > { %v942_v42 = vsel %vm941_vm8, %v3099_v30, %v938_v39  ;;  %vm1418_vm8 = vcmask 1044480  }
 0x1d9   : > { %v943_v43 = vmul.f32 %v942_v42, %v926_v24  ;;  %v2981_v24 = vld [vmem:[%s3363_s2 + $0x40] sm:$0xff] }
 0x1da   : > { %1272 = vmatpush.bf16.msra.mxu2 %v2981_v24  ;;  %v3095_v24 = vld [vmem:[%s3806_s5] ss:$0 sm:$0xff] }
 0x1db   : > { %v945_v45 = vmul.f32 %v944_v41, %v943_v43 }
 0x1dd   : > { %v947_v46 = vadd.f32 %v946_v44, %v945_v45 }
 0x1df   : > { %v949_v47 = vrot.slane %v947_v46, 7 }
 0x1e1   : > { %v952_v48 = vsel %vm951_vm9, 0.0, %v949_v47  ;;  %v953_v49 = vsel %vm951_vm9, %v949_v47, 0.0 }
 0x1e2   : > { %v957_v50 = vrot.slane %v952_v48, 1  ;;  %v958_v51 = vrot.slane %v953_v49, 1  ;;  %v964_v53 = vrot.slane %v952_v48, 2  ;;  %v965_v54 = vrot.slane %v953_v49, 2 }
 0x1e4   : > { %v959_v52 = vsel %vm956_vm10, %v957_v50, %v958_v51  ;;  %v966_v55 = vsel %vm963_vm11, %v964_v53, %v965_v54 }
 0x1e5   : > { %960 = vrot.lane.b32.xlu1 %v959_v52, %s3170_s0 }
 0x1ed   : > { %967 = vrot.lane.b32.xlu1 %v966_v55, %s3171_s18 }
 0x257   : > { %v961_v11 = vpop.permute.xlu1 %960 }
 0x258   : > { %v970_v12 = vsel %vm914_vm4, %v952_v48, %v961_v11  ;;  %v908_v48 = vld [vmem:[%s3368_s1] sm:$0x3] }
 0x259   : > { %v1107_v49 = vperm.slane %v908_v48, 0 }
 0x25f   : > { %v968_v14 = vpop.permute.xlu1 %967 }
 0x260   : > { %v972_v15 = vsel %vm971_vm12, %v970_v12, %v968_v14  ;;  %v1315_v14 = vperm.slane %v3438_v38, 1 }
 0x261   : > { %v985_v16 = vpack.c.bf16 %v972_v15, %v972_v15 }
 0x263   : > { %2621 = vmatmul.msk.bf16.vlgmr.msra.gmra.mxu0 %vm1023_vm13, %v985_v16 }
 0x2e0   : > { %v1036_v28 = vpop.f32.mrf.mxu0 }
 0x2e1   : > { %v1037_v29 = vadd.f32 %v1036_v28, %v986_v27 }
 0x2e3   : > { %v1040_v30 = vmax.f32 %v1037_v29, 0.0 }
 0x2e5   : > { %v1042_v32 = vrot.slane %v1040_v30, 7  ;;  %v1356_v30 = vperm.slane %v3526_v23, 1 }
 0x2e7   : > { %v1044_v33 = vsel %vm951_vm9, 0.0, %v1042_v32  ;;  %v1045_v34 = vsel %vm951_vm9, %v1042_v32, 0.0  ;;  %v2721_v35 = vpack.c.bf16 %v1042_v32, %v1042_v32 }
 0x2e8   : > { %v1038_v36 = vpop.f32.mrf.mxu0  ;;  %v1048_v37 = vrot.slane %v1044_v33, 1  ;;  %v1049_v39 = vrot.slane %v1045_v34, 1  ;;  %v1052_v41 = vrot.slane %v1044_v33, 2  ;;  %v1053_v42 = vrot.slane %v1045_v34, 2 }
 0x2e9   : > { %2722 = vmatmul.msk.bf16.vlgmr.msra.gmra.mxu1 %vm2720_vm15, %v2721_v35 }
 0x2ea   : > { %v1050_v43 = vsel %vm956_vm10, %v1048_v37, %v1049_v39  ;;  %v1054_v44 = vsel %vm963_vm11, %v1052_v41, %v1053_v42 }
 0x2eb   : > { %v1105_v45 = vpack.c.bf16 %v1050_v43, %v1050_v43  ;;  %v1106_v46 = vpack.c.bf16 %v1054_v44, %v1054_v44 }
 0x2ed   : > { %1273 = vmatmul.bf16.vlgmr.msra.gmra.mxu2 %v1105_v45  ;;  %1286 = vmatmul.bf16.vlgmr.msra.gmra.mxu3 %v1106_v46 }
 0x366   : > { %v1261_v47 = vpop.f32.mrf.mxu1 }
 0x367   : > { %v1262_v51 = vadd.f32 %v1261_v47, %v1107_v49 }
 0x36e   : > { %v1263_v50 = vpop.f32.mrf.mxu1 }
 0x370   : > { %v1274_v52 = vpop.f32.mrf.mxu2  ;;  %v1287_v53 = vpop.f32.mrf.mxu3 }
 0x371   : > { %v1275_v54 = vadd.f32 %v1274_v52, %v1262_v51 }
 0x373   : > { %v1288_v55 = vadd.f32 %v1287_v53, %v1275_v54 }
 0x375   : > { %v1291_v56 = vmul.f32 0.5, %v1288_v55 }
 0x377   : > { %v3501_v57 = vadd.f32 %v1291_v56, %v3424_v13  ;;  %v2966_v13 = vld [vmem:[%s3804_s25] sm:$0xff]  ;;  %s3177_s25 = smov 1  }
 0x378   : > { %v1276_v58 = vpop.f32.mrf.mxu2  ;;  %v1289_v59 = vpop.f32.mrf.mxu3  ;;  %1489 = vrot.lane.b32.xlu0 %v2966_v13, %s3172_s21  ;;  %v1374_v22 = vsel %vm1369_vm3, %v2966_v13, 0 }
 0x379   : > { %v1293_v60 = vsel %vm914_vm4, %v3501_v57, 0.0  ;;  %1383 = vmatpush.bf16.xpose.msrb.mxu2 %v1374_v22 }
 0x37a   : > { %1294 = vadd.xlane.f32.xlu2 %v1293_v60 }
 0x3ea   : > { %v1490_v39 = vpop.permute.xlu0 %1489 }
 0x3eb   : > { %v1495_v41 = vsel %vm1369_vm3, %v1490_v39, 0 }
 0x3ec   : > { %1504 = vmatpush.bf16.xpose.msra.mxu0 %v1495_v41 }
 0x3ed   : > { %v1295_v61 = vpop.xlane.xlu2 %1294 }
 0x3ee   : > { %v1296_v62 = vmul.f32 %v1295_v61, %v3428_v21 }
 0x3f0   : > { %v1297_v63 = vsub.f32 %v3501_v57, %v1296_v62 }
 0x3f2   : > { %v1298_v0 = vmul.f32 %v1297_v63, %v1297_v63 }
 0x3f4   : > { %v1299_v1 = vsel %vm914_vm4, %v1298_v0, 0.0 }
 0x3f5   : > { %1300 = vadd.xlane.f32.xlu2 %v1299_v1 }
 0x468   : > { %v1301_v4 = vpop.xlane.xlu2 %1300 }
 0x469   : > { %v1302_v5 = vmul.f32 %v1301_v4, %v3428_v21 }
 0x46b   : > { %v1303_v6 = vadd.f32 1e-12, %v1302_v5 }
 0x46d   : > { %3100 = vrsqrt.f32 %v1303_v6  ;;  %vm1310_vm1 = vweird.f32 %v1303_v6 }
 0x473   : > { %v3101_v7 = vpop.eup %3100 }
 0x474   : > { %v1305_v8 = vmul.f32 %v3101_v7, %v1303_v6  ;;  %vm1311_vm0 = vweird.f32 %v3101_v7 }
 0x475   : > { %vm1312_vm2 = vmor %vm1310_vm1, %vm1311_vm0  ;;  %vm1452_vm0 = vcmask 64512  }
 0x476   : > { %v1306_v9 = vmul.f32 %v3101_v7, %v1305_v8 }
 0x478   : > { %v1307_v10 = vmul.f32 0.5, %v1306_v9 }
 0x47a   : > { %v1308_v11 = vsub.f32 1.5, %v1307_v10 }
 0x47c   : > { %v1309_v12 = vmul.f32 %v3101_v7, %v1308_v11 }
 0x47e   : > { %v1313_v15 = vsel %vm1312_vm2, %v3101_v7, %v1309_v12 }
 0x47f   : > { %v1314_v16 = vmul.f32 %v1313_v15, %v1297_v63 }
 0x481   : > { %v1316_v18 = vmul.f32 %v1315_v14, %v1314_v16 }
 0x483   : > { %v1318_v19 = vadd.f32 %v1317_v17, %v1316_v18 }
 0x485   : > { %v1323_v20 = vpack.c.bf16 %v1318_v19, %v1318_v19 }
 0x487   : > { %2731 = vmatmul.msk.bf16.vlgmr.msrb.gmra.mxu0 %vm914_vm4, %v1323_v20 }
 0x504   : > { %v1351_v26 = vpop.f32.mrf.mxu0 }
 0x505   : > { %v1352_v27 = vadd.f32 %v3095_v24, %v1351_v26 }
 0x507   : > { %v3534_v28 = vpack.c.bf16 %v1352_v27, %v1352_v27  ;;  %v1361_v29 = vadd.f32 %v1360_v25, %v1352_v27  ;;  %v1357_v34 = vadd.f32 %v1356_v30, %v1352_v27 }
 0x509   : > { %1542 = vrot.lane.b32.xlu2 %v3534_v28, %s3173_s26  ;;  %v1362_v32 = vmul.f32 0.25, %v1361_v29  ;;  %v1358_v36 = vmul.f32 0.25, %v1357_v34  ;;  %s3807_s26 = sld [smem:[#allocation12_spill]] }
 0x50b   : > { %v1363_v33 = vpack.c.bf16 %v1362_v32, %v1362_v32  ;;  %v1359_v37 = vpack.c.bf16 %v1358_v36, %v1358_v36 }
 0x50c   : > { %v1353_v35 = vpop.f32.mrf.mxu0 }
 0x50d   : > { %1487 = vrot.lane.b32.xlu1 %v1363_v33, %s3172_s21  ;;  %2736 = vmatmul.msk.bf16.vlgmr.msrb.gmra.mxu2 %vm1369_vm3, %v1363_v33 }
 0x515   : > { %1540 = vrot.lane.b32.xlu1 %v1359_v37, %s3172_s21  ;;  %s3178_s21 = smov 6  }
 0x51d   : > { %1423 = vrot.lane.b32.xlu1 %v3534_v28, %s3174_s30 }
 0x563   : > { %v1543_v42 = vpop.permute.xlu2 %1542 }
 0x564   : > { %v1552_v43 = vsel %vm1369_vm3, %v1543_v42, 0 }
 0x565   : > { %1561 = vmatpush.bf16.xpose.msrb.mxu1 %v1552_v43 }
 0x57f   : > { %v1488_v44 = vpop.permute.xlu1 %1487 }
 0x580   : > { %2739 = vmatmul.msk.bf16.vlgmr.msra.gmra.mxu0 %vm1369_vm3, %v1488_v44 }
 0x587   : > { %v1541_v45 = vpop.permute.xlu1 %1540 }
 0x588   : > { %2740 = vmatmul.msk.bf16.vlgmr.msrb.gmra.mxu1 %vm1369_vm3, %v1541_v45 }
 0x58f   : > { %v1424_v46 = vpop.permute.xlu1 %1423 }
 0x590   : > { %v1433_v47 = vsel %vm1369_vm3, %v1424_v46, 0  ;;  %v1385_v48 = vpop.f32.mrf.mxu2 }
 0x591   : > { %1442 = vmatpush.bf16.xpose.msra.mxu2 %v1433_v47 }
 0x598   : > { %v1387_v49 = vpop.f32.mrf.mxu2  ;;  %2737 = vmatmul.msk.bf16.vlgmr.msra.gmra.mxu2 %vm1369_vm3, %v1359_v37 }
 0x5fd   : > { %v1506_v50 = vpop.f32.mrf.mxu0 }
 0x5fe   : > { %1517 = vrot.lane.b32.xlu2 %v1506_v50, %s3175_s20  ;;  %1514 = vrot.lane.b32.xlu1 %v1506_v50, %s3176_s22 }
 0x5ff   : > { %1511 = vrot.lane.b32.xlu0 %v1506_v50, %s3177_s25 }
 0x605   : > { %v1508_v51 = vpop.f32.mrf.mxu0  ;;  %v1563_v52 = vpop.f32.mrf.mxu1 }
 0x606   : > { %1526 = vrot.lane.b32.xlu2 %v1506_v50, %s3178_s21  ;;  %1523 = vrot.lane.b32.xlu1 %v1506_v50, %s3179_s3 }
 0x607   : > { %1520 = vrot.lane.b32.xlu0 %v1506_v50, %s3180_s29 }
 0x60d   : > { %v1565_v53 = vpop.f32.mrf.mxu1 }
 0x60e   : > { %1393 = vrot.lane.b32.xlu2 %v1385_v48, %s3176_s22  ;;  %1390 = vrot.lane.b32.xlu1 %v1385_v48, %s3177_s25  ;;  %s3183_s22 = smov 48  }
 0x60f   : > { %1529 = vrot.lane.b32.xlu0 %v1506_v50, %s3181_s9 }
 0x616   : > { %1402 = vrot.lane.b32.xlu2 %v1385_v48, %s3179_s3  ;;  %1399 = vrot.lane.b32.xlu1 %v1385_v48, %s3180_s29 }
 0x617   : > { %1396 = vrot.lane.b32.xlu0 %v1385_v48, %s3175_s20  ;;  %s3808_s20 = scalar_lea.vmem %s3807_s26, %s3821_s28  ;;  %s3184_s28 = smov 16  }
 0x618   : > { %v901_v22 = vld [vmem:[%s3808_s20] sm:$0x1] }
 0x619   : > { %v2596_v24 = vadd.f32 -1.0, %v901_v22 }
 0x61b   : > { %v1444_v54 = vpop.f32.mrf.mxu2  ;;  %v903_v25 = vmul.f32 1e+30, %v2596_v24 }
 0x61d   : > { %v1449_v26 = vperm.slane %v903_v25, 0 }
 0x61e   : > { %1408 = vrot.lane.b32.xlu1 %v1385_v48, %s3181_s9 }
 0x61f   : > { %1405 = vrot.lane.b32.xlu0 %v1385_v48, %s3178_s21 }
 0x623   : > { %v1446_v55 = vpop.f32.mrf.mxu2 }
 0x658   : > { %v1518_v59 = vpop.permute.xlu2 %1517 }
 0x660   : > { %v1527_v2 = vpop.permute.xlu2 %1526 }
 0x668   : > { %v1394_v7 = vpop.permute.xlu2 %1393 }
 0x670   : > { %v1515_v56 = vpop.permute.xlu1 %1514  ;;  %v1403_v15 = vpop.permute.xlu2 %1402 }
 0x671   : > { %v1512_v58 = vpop.permute.xlu0 %1511 }
 0x672   : > { %v1532_v60 = vsel %vm951_vm9, %v1506_v50, %v1512_v58 }
 0x673   : > { %v1533_v61 = vsel %vm1412_vm5, %v1532_v60, %v1515_v56 }
 0x674   : > { %v1534_v0 = vsel %vm1414_vm6, %v1533_v61, %v1518_v59 }
 0x678   : > { %v1524_v62 = vpop.permute.xlu1 %1523 }
 0x679   : > { %v1521_v63 = vpop.permute.xlu0 %1520 }
 0x67a   : > { %v1535_v1 = vsel %vm1416_vm7, %v1534_v0, %v1521_v63  ;;  %v3000_v63 = vld [vmem:[%s3383_s4 + $0x8] sm:$0xff]  ;;  %v2999_v0 = vld [vmem:[%s3383_s4] sm:$0xff] }
 0x67b   : > { %v1536_v3 = vsel %vm1418_vm8, %v1535_v1, %v1524_v62 }
 0x67c   : > { %v1537_v5 = vsel %vm963_vm11, %v1536_v3, %v1527_v2 }
 0x680   : > { %v1391_v13 = vpop.permute.xlu1 %1390 }
 0x681   : > { %v1530_v4 = vpop.permute.xlu0 %1529  ;;  %v1411_v8 = vsel %vm951_vm9, %v1385_v48, %v1391_v13 }
 0x682   : > { %v1538_v6 = vsel %vm956_vm10, %v1537_v5, %v1530_v4  ;;  %v1413_v11 = vsel %vm1412_vm5, %v1411_v8, %v1394_v7  ;;  %v1640_v5 = vperm.slane %v3526_v23, 0 }
 0x683   : > { %1545 = vrot.lane.b32.xlu2 %v1538_v6, %s3182_s10 }
 0x688   : > { %v1400_v9 = vpop.permute.xlu1 %1399 }
 0x689   : > { %v1397_v10 = vpop.permute.xlu0 %1396 }
 0x68a   : > { %v1415_v12 = vsel %vm1414_vm6, %v1413_v11, %v1397_v10 }
 0x68b   : > { %v1417_v14 = vsel %vm1416_vm7, %v1415_v12, %v1400_v9 }
 0x68c   : > { %v1419_v17 = vsel %vm1418_vm8, %v1417_v14, %v1403_v15 }
 0x690   : > { %v1409_v16 = vpop.permute.xlu1 %1408 }
 0x691   : > { %v1406_v18 = vpop.permute.xlu0 %1405 }
 0x692   : > { %v1420_v19 = vsel %vm963_vm11, %v1419_v17, %v1406_v18  ;;  %v3002_v17 = vld [vmem:[%s3388_s6 + $0x8] sm:$0xff]  ;;  %v3001_v18 = vld [vmem:[%s3388_s6] sm:$0xff] }
 0x693   : > { %v1421_v20 = vsel %vm956_vm10, %v1420_v19, %v1409_v16  ;;  %1701 = vmatpush.bf16.msrb.mxu0 %v3002_v17 }
 0x694   : > { %1426 = vrot.lane.b32.xlu0 %v1421_v20, %s3182_s10 }
 0x697   : > { %1702 = vmatpush.bf16.msrb.mxu0 %v3001_v18 }
 0x6dd   : > { %v1546_v27 = vpop.permute.xlu2 %1545 }
 0x6de   : > { %v1564_v29 = vadd.f32 %v1563_v52, %v1546_v27 }
 0x6e0   : > { %v1567_v30 = vadd.f32 %v1564_v29, %v1449_v26 }
 0x6e2   : > { %v1568_v32 = vsel %vm1452_vm0, %v1567_v30, -inf }
 0x6e3   : > { %1569 = vmax.xlane.f32.xlu1 %v1568_v32  ;;  %v1664_v32 = vperm.slane %v3438_v38, 2 }
 0x706   : > { %v1427_v33 = vpop.permute.xlu0 %1426 }
 0x707   : > { %v1445_v34 = vadd.f32 %v1444_v54, %v1427_v33 }
 0x709   : > { %v1451_v35 = vadd.f32 %v1449_v26, %v1445_v34 }
 0x70b   : > { %v1453_v36 = vsel %vm1452_vm0, %v1451_v35, -inf }
 0x70c   : > { %1454 = vmax.xlane.f32.xlu2 %v1453_v36 }
 0x724   : > { %1580 = vrot.lane.b32.xlu2 %v3534_v28, %s3183_s22 }
 0x756   : > { %v1570_v37 = vpop.xlane.xlu1 %1569 }
 0x757   : > { %v1571_v39 = vsub.f32 %v1567_v30, %v1570_v37 }
 0x759   : > { %v1572_v41 = vmul.f32 1.442695, %v1571_v39 }
 0x75b   : > { %3102 = vpow2.f32 %v1572_v41 }
 0x761   : > { %v3103_v42 = vpop.eup %3102 }
 0x762   : > { %v1574_v43 = vsel %vm1452_vm0, %v3103_v42, 0.0 }
 0x763   : > { %1575 = vadd.xlane.f32.xlu0 %v1574_v43 }
 0x777   : > { %1465 = vrot.lane.b32.xlu0 %v3534_v28, %s3171_s18 }
 0x77f   : > { %v1455_v44 = vpop.xlane.xlu2 %1454 }
 0x780   : > { %v1456_v45 = vsub.f32 %v1451_v35, %v1455_v44  ;;  %v1666_v35 = vperm.slane %v3441_v40, 2 }
 0x782   : > { %v1457_v46 = vmul.f32 1.442695, %v1456_v45 }
 0x784   : > { %3104 = vpow2.f32 %v1457_v46 }
 0x787   : > { %v1581_v47 = vpop.permute.xlu2 %1580 }
 0x788   : > { %v1586_v48 = vsel %vm1416_vm7, %v1581_v47, 0 }
 0x789   : > { %1595 = vmatpush.bf16.msrb.mxu2 %v1586_v48 }
 0x78a   : > { %v3105_v49 = vpop.eup %3104 }
 0x78b   : > { %v1459_v50 = vsel %vm1452_vm0, %v3105_v49, 0.0 }
 0x78c   : > { %1460 = vadd.xlane.f32.xlu1 %v1459_v50 }
 0x7d6   : > { %v1576_v51 = vpop.xlane.xlu0 %1575 }
 0x7d7   : > { %3106 = vrcp.f32 %v1576_v51 }
 0x7dd   : > { %v3107_v52 = vpop.eup %3106 }
 0x7de   : > { %v1578_v53 = vmul.f32 %v3107_v52, %v3103_v42 }
 0x7e0   : > { %v1579_v54 = vpack.c.bf16 %v1578_v53, %v1578_v53 }
 0x7e2   : > { %2741 = vmatmul.msk.bf16.vlgmr.msrb.gmra.mxu2 %vm1452_vm0, %v1579_v54 }
 0x7e9   : > { %v1466_v28 = vpop.permute.xlu0 %1465 }
 0x7ea   : > { %v1471_v55 = vsel %vm1416_vm7, %v1466_v28, 0 }
 0x7eb   : > { %1480 = vmatpush.bf16.msrb.mxu3 %v1471_v55 }
 0x7ef   : > { %1632 = vmatpush.bf16.msra.mxu3 %v3000_v63 }
 0x7f3   : > { %1633 = vmatpush.bf16.msra.mxu3 %v2999_v0 }
 0x7ff   : > { %v1461_v56 = vpop.xlane.xlu1 %1460 }
 0x800   : > { %3108 = vrcp.f32 %v1461_v56 }
 0x806   : > { %v3109_v58 = vpop.eup %3108 }
 0x807   : > { %v1463_v59 = vmul.f32 %v3109_v58, %v3105_v49  ;;  %v3004_v58 = vld [vmem:[%s3393_s19 + $0x8] sm:$0xff] }
 0x808   : > { %1921 = vmatpush.bf16.msra.mxu1 %v3004_v58 }
 0x809   : > { %v1464_v60 = vpack.c.bf16 %v1463_v59, %v1463_v59  ;;  %v3003_v59 = vld [vmem:[%s3393_s19] sm:$0xff] }
 0x80b   : > { %2738 = vmatmul.msk.bf16.vlgmr.msrb.gmra.mxu3 %vm1452_vm0, %v1464_v60  ;;  %v910_v60 = vld [vmem:[%s3403_s8 + $0x8] sm:$0xff] }
 0x80c   : > { %1922 = vmatpush.bf16.msra.mxu1 %v3003_v59  ;;  %v1740_v63 = vperm.slane %v910_v60, 1  ;;  %v1750_v0 = vperm.slane %v910_v60, 2 }
 0x865   : > { %v1597_v61 = vpop.f32.mrf.mxu2 }
 0x866   : > { %1602 = vrot.lane.b32.xlu1 %v1597_v61, %s3184_s28 }
 0x86d   : > { %v1599_v62 = vpop.f32.mrf.mxu2 }
 0x88e   : > { %v1482_v1 = vpop.f32.mrf.mxu3 }
 0x896   : > { %v1484_v2 = vpop.f32.mrf.mxu3 }
 0x897   : > { %v1770_v2 = vperm.slane %v910_v60, 4 }
 0x8d8   : > { %v1603_v3 = vpop.permute.xlu1 %1602 }
 0x8d9   : > { %v1605_v13 = vsel %vm1369_vm3, %v1482_v1, %v1603_v3  ;;  %v1760_v1 = vperm.slane %v910_v60, 3 }
 0x8da   : > { %v1610_v4 = vpack.c.bf16 %v1605_v13, %v1605_v13  ;;  %v1737_v13 = vperm.slane %v910_v60, 0 }
 0x8dc   : > { %2750 = vmatmul.msk.bf16.vlgmr.msra.gmra.mxu3 %vm914_vm4, %v1610_v4  ;;  %v1780_v4 = vperm.slane %v910_v60, 5 }
 0x95f   : > { %v1635_v6 = vpop.f32.mrf.mxu3 }
 0x960   : > { %v1639_v7 = vadd.f32 %v1635_v6, %v3501_v57  ;;  %v1669_v57 = vrot.slane %v3526_v23, 1 }
 0x962   : > { %v3585_v8 = vadd.f32 %v1640_v5, %v1639_v7  ;;  %1670 = vrot.lane.b32.xlu1 %v1669_v57, %s3170_s0  ;;  %v1790_v7 = vperm.slane %v910_v60, 6 }
 0x964   : > { %v1642_v9 = vsel %vm914_vm4, %v3585_v8, 0.0 }
 0x965   : > { %1643 = vadd.xlane.f32.xlu2 %v1642_v9 }
 0x967   : > { %v1637_v10 = vpop.f32.mrf.mxu3 }
 0x9d4   : > { %v1671_v41 = vpop.permute.xlu1 %1670 }
 0x9d5   : > { %v1673_v42 = vsel %vm914_vm4, %v3526_v23, %v1671_v41 }
 0x9d6   : > { %v1679_v43 = vperm.slane %v1673_v42, 3 }
 0x9d8   : > { %v1644_v11 = vpop.xlane.xlu2 %1643 }
 0x9d9   : > { %v1645_v12 = vmul.f32 %v1644_v11, %v3428_v21 }
 0x9db   : > { %v1646_v14 = vsub.f32 %v3585_v8, %v1645_v12 }
 0x9dd   : > { %v1647_v15 = vmul.f32 %v1646_v14, %v1646_v14 }
 0x9df   : > { %v1648_v16 = vsel %vm914_vm4, %v1647_v15, 0.0 }
 0x9e0   : > { %1649 = vadd.xlane.f32.xlu0 %v1648_v16 }
 0xa53   : > { %v1650_v19 = vpop.xlane.xlu0 %1649 }
 0xa54   : > { %v1651_v20 = vmul.f32 %v1650_v19, %v3428_v21 }
 0xa56   : > { %v1652_v22 = vadd.f32 1e-12, %v1651_v20 }
 0xa58   : > { %3110 = vrsqrt.f32 %v1652_v22  ;;  %vm1659_vm2 = vweird.f32 %v1652_v22 }
 0xa5e   : > { %v3111_v24 = vpop.eup %3110 }
 0xa5f   : > { %v1654_v25 = vmul.f32 %v3111_v24, %v1652_v22  ;;  %vm1660_vm1 = vweird.f32 %v3111_v24 }
 0xa60   : > { %vm1661_vm3 = vmor %vm1659_vm2, %vm1660_vm1 }
 0xa61   : > { %v1655_v26 = vmul.f32 %v3111_v24, %v1654_v25 }
 0xa63   : > { %v1656_v27 = vmul.f32 0.5, %v1655_v26  ;;  %v911_v26 = vld [vmem:[%s3403_s8 + $0x10] sm:$0xff] }
 0xa64   : > { %v1810_v58 = vperm.slane %v911_v26, 0 }
 0xa65   : > { %v1657_v29 = vsub.f32 1.5, %v1656_v27  ;;  %v1800_v27 = vperm.slane %v910_v60, 7  ;;  %v1843_v60 = vperm.slane %v911_v26, 4 }
 0xa67   : > { %v1658_v30 = vmul.f32 %v3111_v24, %v1657_v29 }
 0xa69   : > { %v1662_v33 = vsel %vm1661_vm3, %v3111_v24, %v1658_v30 }
 0xa6a   : > { %v1663_v34 = vmul.f32 %v1662_v33, %v1646_v14 }
 0xa6c   : > { %v1665_v36 = vmul.f32 %v1664_v32, %v1663_v34 }
 0xa6e   : > { %v1667_v37 = vadd.f32 %v1666_v35, %v1665_v36 }
 0xa70   : > { %v1678_v39 = vpack.c.bf16 %v1667_v37, %v1667_v37 }
 0xa72   : > { %2759 = vmatmul.msk.bf16.vlgmr.msrb.gmra.mxu0 %vm914_vm4, %v1678_v39 }
 0xaef   : > { %v1704_v44 = vpop.f32.mrf.mxu0 }
 0xaf0   : > { %v1705_v45 = vadd.f32 %v1704_v44, %v1679_v43  ;;  %v1813_v43 = vperm.slane %v911_v26, 1 }
 0xaf2   : > { %v2760_v46 = vmul.f32 -1.442695, %v1705_v45 }
 0xaf4   : > { %3112 = vpow2.f32 %v2760_v46 }
 0xaf7   : > { %v1706_v38 = vpop.f32.mrf.mxu0 }
 0xafa   : > { %v3113_v47 = vpop.eup %3112 }
 0xafb   : > { %v1711_v48 = vadd.f32 1.0, %v3113_v47 }
 0xafd   : > { %3114 = vrcp.f32 %v1711_v48  ;;  %v1723_v51 = vand.u32 2147483648, %v1711_v48  ;;  %v1721_v53 = vand.u32 2147483647, %v1711_v48  ;;  %vm1717_vm1 = vweird.f32 %v1711_v48 }
 0xaff   : > { %v1724_v28 = vor.u32 1.1754944e-38, %v1723_v51  ;;  %vm1722_vm3 = vcmp.eq.f32.partialorder %v1721_v53, 8.507059e+37  ;;  %v1833_v53 = vperm.slane %v911_v26, 3 }
 0xb03   : > { %v3115_v40 = vpop.eup %3114 }
 0xb04   : > { %v1713_v49 = vmul.f32 %v3115_v40, %v1711_v48  ;;  %vm1718_vm0 = vweird.f32 %v3115_v40 }
 0xb05   : > { %vm1719_vm2 = vmor %vm1717_vm1, %vm1718_vm0 }
 0xb06   : > { %v1714_v50 = vsub.f32 1.0, %v1713_v49 }
 0xb08   : > { %v1715_v52 = vmul.f32 %v3115_v40, %v1714_v50  ;;  %v1823_v50 = vperm.slane %v911_v26, 2 }
 0xb0a   : > { %v1716_v54 = vadd.f32 %v3115_v40, %v1715_v52  ;;  %v1815_v52 = vmul.f32 0.0, %v1813_v43 }
 0xb0c   : > { %v1720_v55 = vsel %vm1719_vm2, %v3115_v40, %v1716_v54 }
 0xb0d   : > { %v1725_v56 = vsel %vm1722_vm3, %v1724_v28, %v1720_v55 }
 0xb0e   : > { %1728 = vrot.lane.b32.xlu1 %v1725_v56, %s3174_s30 }
 0xb80   : > { %v1729_v61 = vpop.permute.xlu1 %1728 }
 0xb81   : > { %v1731_v62 = vmul.f32 %v1729_v61, %v1705_v45 }
 0xb83   : > { %v1733_v3 = vrot.slane %v1731_v62, 1 }
 0xb85   : > { %v1735_v5 = vsel %vm956_vm10, 0.0, %v1733_v3  ;;  %v3608_v6 = vsel %vm956_vm10, %v1733_v3, 0.0 }
 0xb86   : > { %v1741_v9 = vmul.f32 %v1740_v63, %v1735_v5  ;;  %v1742_v10 = vmul.f32 %v1740_v63, %v3608_v6  ;;  %v1751_v11 = vmul.f32 %v1750_v0, %v1735_v5  ;;  %v1752_v12 = vmul.f32 %v1750_v0, %v3608_v6 }
 0xb87   : > { %v1761_v14 = vmul.f32 %v1760_v1, %v1735_v5  ;;  %v1762_v15 = vmul.f32 %v1760_v1, %v3608_v6  ;;  %v1771_v16 = vmul.f32 %v1770_v2, %v1735_v5  ;;  %v1772_v19 = vmul.f32 %v1770_v2, %v3608_v6 }
 0xb88   : > { %v1745_v17 = vrot.slane %v1741_v9, 1  ;;  %v1746_v18 = vrot.slane %v1742_v10, 1  ;;  %v1755_v57 = vrot.slane %v1751_v11, 2  ;;  %v1738_v20 = vmul.f32 %v1737_v13, %v1735_v5 }
 0xb89   : > { %v1756_v22 = vrot.slane %v1752_v12, 2  ;;  %v1765_v24 = vrot.slane %v1761_v14, 3  ;;  %v1766_v25 = vrot.slane %v1762_v15, 3  ;;  %v1781_v30 = vmul.f32 %v1780_v4, %v1735_v5 }
 0xb8a   : > { %v1747_v29 = vsel %vm956_vm10, %v1745_v17, %v1746_v18  ;;  %v1782_v32 = vmul.f32 %v1780_v4, %v3608_v6  ;;  %v1775_v34 = vrot.slane %v1771_v16, 4  ;;  %v1776_v36 = vrot.slane %v1772_v19, 4 }
 0xb8b   : > { %v1749_v33 = vadd.f32 %v1747_v29, %v1738_v20  ;;  %v1757_v35 = vsel %vm963_vm11, %v1755_v57, %v1756_v22  ;;  %v1791_v37 = vmul.f32 %v1790_v7, %v1735_v5  ;;  %v1792_v39 = vmul.f32 %v1790_v7, %v3608_v6 }
 0xb8c   : > { %v1767_v42 = vsel %vm1418_vm8, %v1765_v24, %v1766_v25  ;;  %v1785_v44 = vrot.slane %v1781_v30, 5  ;;  %v1786_v45 = vrot.slane %v1782_v32, 5  ;;  %v1801_v46 = vmul.f32 %v1800_v27, %v1735_v5 }
 0xb8d   : > { %v1759_v41 = vadd.f32 %v1757_v35, %v1749_v33  ;;  %v1802_v38 = vmul.f32 %v1800_v27, %v3608_v6  ;;  %v1777_v48 = vsel %vm1416_vm7, %v1775_v34, %v1776_v36  ;;  %v1795_v40 = vrot.slane %v1791_v37, 6 }
 0xb8e   : > { %v1796_v49 = vrot.slane %v1792_v39, 6  ;;  %v1787_v54 = vsel %vm1414_vm6, %v1785_v44, %v1786_v45  ;;  %v1805_v28 = vrot.slane %v1801_v46, 7  ;;  %v1814_v56 = vmul.f32 %v1813_v43, %v3608_v6 }
 0xb8f   : > { %v1769_v47 = vadd.f32 %v1767_v42, %v1759_v41  ;;  %v1806_v55 = vrot.slane %v1802_v38, 7  ;;  %v1824_v62 = vmul.f32 %v1823_v50, %v3608_v6  ;;  %v1825_v63 = vmul.f32 0.0, %v1823_v50 }
 0xb90   : > { %v1797_v61 = vsel %vm1412_vm5, %v1795_v40, %v1796_v49  ;;  %v1819_v1 = vrot.slane %v1815_v52, 1  ;;  %v1853_v2 = vperm.slane %v911_v26, 5  ;;  %v1818_v13 = vrot.slane %v1814_v56, 1 }
 0xb91   : > { %v1779_v51 = vadd.f32 %v1777_v48, %v1769_v47  ;;  %v1807_v3 = vsel %vm951_vm9, %v1805_v28, %v1806_v55  ;;  %v1834_v4 = vmul.f32 %v1833_v53, %v3608_v6  ;;  %v1835_v5 = vmul.f32 0.0, %v1833_v53 }
 0xb92   : > { %v1811_v9 = vmul.f32 %v1810_v58, %v3608_v6  ;;  %v1845_v10 = vmul.f32 0.0, %v1843_v60  ;;  %v1828_v11 = vrot.slane %v1824_v62, 2  ;;  %v1829_v12 = vrot.slane %v1825_v63, 2 }
 0xb93   : > { %v1789_v59 = vadd.f32 %v1787_v54, %v1779_v51  ;;  %v1844_v14 = vmul.f32 %v1843_v60, %v3608_v6  ;;  %v1863_v15 = vperm.slane %v911_v26, 6  ;;  %v1855_v17 = vmul.f32 0.0, %v1853_v2 }
 0xb94   : > { %v1820_v18 = vsel %vm956_vm10, %v1818_v13, %v1819_v1  ;;  %v1838_v57 = vrot.slane %v1834_v4, 3  ;;  %v1839_v19 = vrot.slane %v1835_v5, 3  ;;  %v1854_v20 = vmul.f32 %v1853_v2, %v3608_v6 }
 0xb95   : > { %v1799_v0 = vadd.f32 %v1797_v61, %v1789_v59  ;;  %v1849_v24 = vrot.slane %v1845_v10, 4  ;;  %v1830_v25 = vsel %vm963_vm11, %v1828_v11, %v1829_v12  ;;  %v1848_v27 = vrot.slane %v1844_v14, 4 }
 0xb96   : > { %v1864_v29 = vmul.f32 %v1863_v15, %v3608_v6  ;;  %v1865_v30 = vmul.f32 0.0, %v1863_v15  ;;  %v1840_v33 = vsel %vm1418_vm8, %v1838_v57, %v1839_v19  ;;  %v1858_v26 = vrot.slane %v1854_v20, 5  ;;  %v3655_v19 = vld [vmem:[%s3800_s7] sm:$0x1f] }
 0xb97   : > { %v1809_v7 = vadd.f32 %v1807_v3, %v1799_v0  ;;  %v1859_v34 = vrot.slane %v1855_v17, 5  ;;  %v1850_v36 = vsel %vm1416_vm7, %v1848_v27, %v1849_v24  ;;  %v1873_v44 = vperm.slane %v3526_v23, 5 }
 0xb98   : > { %v1868_v37 = vrot.slane %v1864_v29, 6  ;;  %v1869_v39 = vrot.slane %v1865_v30, 6  ;;  %v1929_v60 = vperm.slane %v3526_v23, 6  ;;  %v1955_v20 = vperm.slane %v3655_v19, 3 }
 0xb99   : > { %v1812_v16 = vadd.f32 %v1811_v9, %v1809_v7  ;;  %v1860_v42 = vsel %vm1414_vm6, %v1858_v26, %v1859_v34 }
 0xb9a   : > { %v1870_v45 = vsel %vm1412_vm5, %v1868_v37, %v1869_v39  ;;  %v3009_v37 = vld [vmem:[%s3353_s24 + $0x50] sm:$0xff]  ;;  %v3008_v39 = vld [vmem:[%s3353_s24 + $0x48] sm:$0xff] }
 0xb9b   : > { %v1822_v22 = vadd.f32 %v1820_v18, %v1812_v16  ;;  %v3651_v16 = vld [vmem:[%s3799_s14] sm:$0x1f] }
 0xb9c   : > { %v1953_v17 = vperm.slane %v3651_v16, 3 }
 0xb9d   : > { %v1832_v32 = vadd.f32 %v1830_v25, %v1822_v22 }
 0xb9f   : > { %v1842_v35 = vadd.f32 %v1840_v33, %v1832_v32 }
 0xba1   : > { %v1852_v41 = vadd.f32 %v1850_v36, %v1842_v35  ;;  %v3010_v36 = vld [vmem:[%s3353_s24 + $0x58] sm:$0xff] }
 0xba2   : > { %2034 = vmatpush.bf16.msra.mxu2 %v3010_v36 }
 0xba3   : > { %v1862_v43 = vadd.f32 %v1860_v42, %v1852_v41  ;;  %v3007_v41 = vld [vmem:[%s3353_s24 + $0x40] sm:$0xff]  ;;  %v3006_v42 = vld [vmem:[%s3353_s24 + $0x38] sm:$0xff] }
 0xba5   : > { %v1872_v6 = vadd.f32 %v1870_v45, %v1862_v43  ;;  %v3005_v43 = vld [vmem:[%s3353_s24 + $0x30] sm:$0xff]  ;;  %v3026_v45 = vld [vmem:[%s3363_s2 + $0x138] sm:$0xff] }
 0xba6   : > { %2035 = vmatpush.bf16.msra.mxu2 %v3009_v37  ;;  %2271 = vmatpush.bf16.msra.mxu0 %v3026_v45 }
 0xba7   : > { %v1874_v46 = vadd.f32 %v1873_v44, %v1872_v6  ;;  %v3018_v44 = vld [vmem:[%s3363_s2 + $0xf8] sm:$0xff] }
 0xba8   : > { %v3034_v6 = vld [vmem:[%s3363_s2 + $0x178] sm:$0xff]  ;;  %2258 = vmatpush.bf16.msrb.mxu3 %v3018_v44 }
 0xba9   : > { %v2761_v38 = vmul.f32 -1.442695, %v1874_v46  ;;  %2284 = vmatpush.bf16.msrb.mxu1 %v3034_v6 }
 0xbaa   : > { %2036 = vmatpush.bf16.msra.mxu2 %v3008_v39 }
 0xbab   : > { %3116 = vpow2.f32 %v2761_v38  ;;  %v3025_v38 = vld [vmem:[%s3363_s2 + $0x130] sm:$0xff] }
 0xbac   : > { %2272 = vmatpush.bf16.msra.mxu0 %v3025_v38 }
 0xbae   : > { %2037 = vmatpush.bf16.msra.mxu2 %v3007_v41 }
 0xbb1   : > { %v3117_v47 = vpop.eup %3116 }
 0xbb2   : > { %v1878_v48 = vadd.f32 1.0, %v3117_v47  ;;  %2038 = vmatpush.bf16.msra.mxu2 %v3006_v42  ;;  %v3033_v47 = vld [vmem:[%s3363_s2 + $0x170] sm:$0xff] }
 0xbb3   : > { %2285 = vmatpush.bf16.msrb.mxu1 %v3033_v47 }
 0xbb4   : > { %3118 = vrcp.f32 %v1878_v48  ;;  %v1890_v51 = vand.u32 2147483648, %v1878_v48  ;;  %v1888_v53 = vand.u32 2147483647, %v1878_v48  ;;  %vm1884_vm6 = vweird.f32 %v1878_v48 }
 0xbb6   : > { %v1891_v28 = vor.u32 1.1754944e-38, %v1890_v51  ;;  %vm1889_vm5 = vcmp.eq.f32.partialorder %v1888_v53, 8.507059e+37  ;;  %2039 = vmatpush.bf16.msra.mxu2 %v3005_v43  ;;  %v3023_v51 = vld [vmem:[%s3363_s2 + $0x120] sm:$0xff]  ;;  %v3014_v53 = vld [vmem:[%s3363_s2 + $0xd8] sm:$0xff] }
 0xbba   : > { %v3119_v40 = vpop.eup %3118 }
 0xbbb   : > { %v1880_v49 = vmul.f32 %v3119_v40, %v1878_v48  ;;  %vm1885_vm7 = vweird.f32 %v3119_v40  ;;  %v3016_v48 = vld [vmem:[%s3363_s2 + $0xe8] sm:$0xff] }
 0xbbc   : > { %vm1886_vm8 = vmor %vm1884_vm6, %vm1885_vm7 }
 0xbbd   : > { %v1881_v50 = vsub.f32 1.0, %v1880_v49  ;;  %v3032_v49 = vld [vmem:[%s3363_s2 + $0x168] sm:$0xff] }
 0xbbe   : > { %2286 = vmatpush.bf16.msrb.mxu1 %v3032_v49 }
 0xbbf   : > { %v1882_v52 = vmul.f32 %v3119_v40, %v1881_v50  ;;  %v3015_v50 = vld [vmem:[%s3363_s2 + $0xe0] sm:$0xff] }
 0xbc1   : > { %v1883_v54 = vadd.f32 %v3119_v40, %v1882_v52  ;;  %v3031_v52 = vld [vmem:[%s3363_s2 + $0x160] sm:$0xff] }
 0xbc2   : > { %2287 = vmatpush.bf16.msrb.mxu1 %v3031_v52 }
 0xbc3   : > { %v1887_v55 = vsel %vm1886_vm8, %v3119_v40, %v1883_v54  ;;  %v3024_v40 = vld [vmem:[%s3363_s2 + $0x128] sm:$0xff]  ;;  %v3022_v54 = vld [vmem:[%s3363_s2 + $0x118] sm:$0xff] }
 0xbc4   : > { %v1892_v56 = vsel %vm1889_vm5, %v1891_v28, %v1887_v55  ;;  %2273 = vmatpush.bf16.msra.mxu0 %v3024_v40  ;;  %v3030_v28 = vld [vmem:[%s3363_s2 + $0x158] sm:$0xff]  ;;  %v3013_v55 = vld [vmem:[%s3363_s2 + $0xd0] sm:$0xff] }
 0xbc5   : > { %v1894_v58 = vmul.f32 %v1892_v56, %v1874_v46  ;;  %v3017_v46 = vld [vmem:[%s3363_s2 + $0xf0] sm:$0xff] }
 0xbc6   : > { %2259 = vmatpush.bf16.msrb.mxu3 %v3017_v46  ;;  %2288 = vmatpush.bf16.msrb.mxu1 %v3030_v28  ;;  %v2321_v28 = vperm.slane %v3651_v16, 4 }
 0xbc7   : > { %v1899_v59 = vpack.c.bf16 %v1894_v58, %v1894_v58 }
 0xbc8   : > { %2274 = vmatpush.bf16.msra.mxu0 %v3023_v51 }
 0xbc9   : > { %2770 = vmatmul.msk.bf16.vlgmr.msra.gmra.mxu1 %vm914_vm4, %v1899_v59 }
 0xbca   : > { %2260 = vmatpush.bf16.msrb.mxu3 %v3016_v48 }
 0xbcc   : > { %2275 = vmatpush.bf16.msra.mxu0 %v3022_v54 }
 0xbce   : > { %2261 = vmatpush.bf16.msrb.mxu3 %v3015_v50 }
 0xbd2   : > { %2262 = vmatpush.bf16.msrb.mxu3 %v3014_v53 }
 0xbd6   : > { %2263 = vmatpush.bf16.msrb.mxu3 %v3013_v55 }
 0xc46   : > { %v1924_v61 = vpop.f32.mrf.mxu1 }
 0xc47   : > { %v1928_v62 = vadd.f32 %v1924_v61, %v3585_v8 }
 0xc49   : > { %v3642_v63 = vadd.f32 %v1929_v60, %v1928_v62  ;;  %v3012_v62 = vld [vmem:[%s3363_s2 + $0xc8] sm:$0xff] }
 0xc4a   : > { %2264 = vmatpush.bf16.msrb.mxu3 %v3012_v62 }
 0xc4b   : > { %v1931_v0 = vsel %vm914_vm4, %v3642_v63, 0.0 }
 0xc4c   : > { %1932 = vadd.xlane.f32.xlu1 %v1931_v0  ;;  %v3021_v0 = vld [vmem:[%s3363_s2 + $0x110] sm:$0xff] }
 0xc4d   : > { %2276 = vmatpush.bf16.msra.mxu0 %v3021_v0 }
 0xc4e   : > { %v1926_v1 = vpop.f32.mrf.mxu1 }
 0xc4f   : > { %v3029_v1 = vld [vmem:[%s3363_s2 + $0x150] sm:$0xff] }
 0xc50   : > { %2289 = vmatpush.bf16.msrb.mxu1 %v3029_v1 }
 0xcbf   : > { %v1933_v2 = vpop.xlane.xlu1 %1932 }
 0xcc0   : > { %v1934_v3 = vmul.f32 %v1933_v2, %v3428_v21  ;;  %v3011_v2 = vld [vmem:[%s3363_s2 + $0xc0] sm:$0xff] }
 0xcc1   : > { %2265 = vmatpush.bf16.msrb.mxu3 %v3011_v2 }
 0xcc2   : > { %v1935_v13 = vsub.f32 %v3642_v63, %v1934_v3  ;;  %v3020_v3 = vld [vmem:[%s3363_s2 + $0x108] sm:$0xff] }
 0xcc3   : > { %2277 = vmatpush.bf16.msra.mxu0 %v3020_v3 }
 0xcc4   : > { %v1936_v4 = vmul.f32 %v1935_v13, %v1935_v13 }
 0xcc6   : > { %v1937_v5 = vsel %vm914_vm4, %v1936_v4, 0.0  ;;  %v3019_v4 = vld [vmem:[%s3363_s2 + $0x100] sm:$0xff] }
 0xcc7   : > { %1938 = vadd.xlane.f32.xlu2 %v1937_v5  ;;  %v3027_v5 = vld [vmem:[%s3363_s2 + $0x140] sm:$0xff]  ;;  %2278 = vmatpush.bf16.msra.mxu0 %v3019_v4 }
 0xd3a   : > { %v1939_v23 = vpop.xlane.xlu2 %1938 }
 0xd3b   : > { %v1940_v8 = vmul.f32 %v1939_v23, %v3428_v21  ;;  %v3126_v23 = vld [vmem:[%s3358_s27] sm:$0x3] }
 0xd3d   : > { %v1941_v7 = vadd.f32 1e-12, %v1940_v8  ;;  %v1992_v8 = vperm.slane %v3126_v23, 1 }
 0xd3f   : > { %3120 = vrsqrt.f32 %v1941_v7  ;;  %vm1948_vm1 = vweird.f32 %v1941_v7 }
 0xd45   : > { %v3121_v9 = vpop.eup %3120 }
 0xd46   : > { %v1943_v10 = vmul.f32 %v3121_v9, %v1941_v7  ;;  %vm1949_vm0 = vweird.f32 %v3121_v9 }
 0xd47   : > { %vm1950_vm2 = vmor %vm1948_vm1, %vm1949_vm0 }
 0xd48   : > { %v1944_v11 = vmul.f32 %v3121_v9, %v1943_v10 }
 0xd4a   : > { %v1945_v12 = vmul.f32 0.5, %v1944_v11 }
 0xd4c   : > { %v1946_v14 = vsub.f32 1.5, %v1945_v12 }
 0xd4e   : > { %v1947_v15 = vmul.f32 %v3121_v9, %v1946_v14 }
 0xd50   : > { %v1951_v18 = vsel %vm1950_vm2, %v3121_v9, %v1947_v15 }
 0xd51   : > { %v1952_v57 = vmul.f32 %v1951_v18, %v1935_v13  ;;  %v3028_v13 = vld [vmem:[%s3363_s2 + $0x148] sm:$0xff] }
 0xd52   : > { %2290 = vmatpush.bf16.msrb.mxu1 %v3028_v13 }
 0xd53   : > { %v1954_v22 = vmul.f32 %v1953_v17, %v1952_v57 }
 0xd55   : > { %v1956_v24 = vadd.f32 %v1955_v20, %v1954_v22 }
 0xd56   : > { %2291 = vmatpush.bf16.msrb.mxu1 %v3027_v5 }
 0xd57   : > { %v1958_v25 = vrot.slane %v1956_v24, 7 }
 0xd59   : > { %v1960_v27 = vsel %vm951_vm9, 0.0, %v1958_v25  ;;  %v1961_v29 = vsel %vm951_vm9, %v1958_v25, 0.0 }
 0xd5a   : > { %v1970_v30 = vrot.slane %v1960_v27, 2  ;;  %v1971_v32 = vrot.slane %v1961_v29, 2  ;;  %v1964_v33 = vrot.slane %v1960_v27, 1  ;;  %v1965_v26 = vrot.slane %v1961_v29, 1 }
 0xd5c   : > { %v1972_v34 = vsel %vm963_vm11, %v1970_v30, %v1971_v32  ;;  %v1966_v35 = vsel %vm956_vm10, %v1964_v33, %v1965_v26  ;;  %v3127_v30 = vld [vmem:[%s3368_s1] sm:$0x3] }
 0xd5d   : > { %1973 = vrot.lane.b32.xlu2 %v1972_v34, %s3171_s18  ;;  %1967 = vrot.lane.b32.xlu0 %v1966_v35, %s3170_s0  ;;  %v2113_v32 = vperm.slane %v3127_v30, 1 }
 0xdb7   : > { %v1974_v58 = vpop.permute.xlu2 %1973 }
 0xdcf   : > { %v1968_v56 = vpop.permute.xlu0 %1967 }
 0xdd0   : > { %v1976_v59 = vsel %vm914_vm4, %v1960_v27, %v1968_v56  ;;  %v2323_v56 = vperm.slane %v3655_v19, 4 }
 0xdd1   : > { %v1977_v60 = vsel %vm971_vm12, %v1976_v59, %v1974_v58 }
 0xdd2   : > { %v1991_v61 = vpack.c.bf16 %v1977_v60, %v1977_v60 }
 0xdd4   : > { %2807 = vmatmul.msk.bf16.vlgmr.msra.gmra.mxu2 %vm1023_vm13, %v1991_v61 }
 0xe57   : > { %v2041_v7 = vpop.f32.mrf.mxu2 }
 0xe58   : > { %v2042_v9 = vadd.f32 %v2041_v7, %v1992_v8 }
 0xe5a   : > { %v2045_v10 = vmax.f32 %v2042_v9, 0.0 }
 0xe5c   : > { %v2047_v11 = vrot.slane %v2045_v10, 7 }
 0xe5e   : > { %v2049_v12 = vsel %vm951_vm9, 0.0, %v2047_v11  ;;  %v2050_v14 = vsel %vm951_vm9, %v2047_v11, 0.0  ;;  %v2955_v15 = vpack.c.bf16 %v2047_v11, %v2047_v11 }
 0xe5f   : > { %v2053_v17 = vrot.slane %v2049_v12, 1  ;;  %v2054_v18 = vrot.slane %v2050_v14, 1  ;;  %v2057_v57 = vrot.slane %v2049_v12, 2  ;;  %v2058_v20 = vrot.slane %v2050_v14, 2  ;;  %v2043_v22 = vpop.f32.mrf.mxu2 }
 0xe60   : > { %2956 = vmatmul.msk.bf16.vlgmr.msrb.gmra.mxu3 %vm2720_vm15, %v2955_v15 }
 0xe61   : > { %v2055_v24 = vsel %vm956_vm10, %v2053_v17, %v2054_v18  ;;  %v2059_v25 = vsel %vm963_vm11, %v2057_v57, %v2058_v20 }
 0xe62   : > { %v2111_v27 = vpack.c.bf16 %v2055_v24, %v2055_v24  ;;  %v2112_v29 = vpack.c.bf16 %v2059_v25, %v2059_v25 }
 0xe64   : > { %2279 = vmatmul.bf16.vlgmr.msra.gmra.mxu0 %v2111_v27  ;;  %2292 = vmatmul.bf16.vlgmr.msrb.gmra.mxu1 %v2112_v29 }
 0xee1   : > { %v2280_v33 = vpop.f32.mrf.mxu0  ;;  %v2293_v26 = vpop.f32.mrf.mxu1 }
 0xee3   : > { %v2267_v34 = vpop.f32.mrf.mxu3 }
 0xee4   : > { %v2268_v35 = vadd.f32 %v2267_v34, %v2113_v32 }
 0xee6   : > { %v2281_v36 = vadd.f32 %v2280_v33, %v2268_v35 }
 0xee8   : > { %v2294_v37 = vadd.f32 %v2293_v26, %v2281_v36 }
 0xee9   : > { %v2282_v39 = vpop.f32.mrf.mxu0  ;;  %v2295_v31 = vpop.f32.mrf.mxu1 }
 0xeea   : > { %v2297_v41 = vmul.f32 0.5, %v2294_v37 }
 0xeeb   : > { %v2269_v42 = vpop.f32.mrf.mxu3 }
 0xeec   : > { %v2298_v43 = vadd.f32 %v2297_v41, %v3642_v63 }
 0xeee   : > { %v2299_v44 = vsel %vm914_vm4, %v2298_v43, 0.0 }
 0xeef   : > { %2300 = vadd.xlane.f32.xlu0 %v2299_v44 }
 0xf62   : > { %v2301_v45 = vpop.xlane.xlu0 %2300 }
 0xf63   : > { %v2302_v6 = vmul.f32 %v2301_v45, %v3428_v21 }
 0xf65   : > { %v2303_v46 = vsub.f32 %v2298_v43, %v2302_v6 }
 0xf67   : > { %v2304_v38 = vmul.f32 %v2303_v46, %v2303_v46 }
 0xf69   : > { %v2305_v47 = vsel %vm914_vm4, %v2304_v38, 0.0 }
 0xf6a   : > { %2306 = vadd.xlane.f32.xlu1 %v2305_v47 }
 0xfdd   : > { %v2307_v48 = vpop.xlane.xlu1 %2306 }
 0xfde   : > { %v2308_v40 = vmul.f32 %v2307_v48, %v3428_v21 }
 0xfe0   : > { %v2309_v49 = vadd.f32 1e-12, %v2308_v40 }
 0xfe2   : > { %3122 = vrsqrt.f32 %v2309_v49  ;;  %vm2316_vm10 = vweird.f32 %v2309_v49 }
 0xfe8   : > { %v3123_v50 = vpop.eup %3122 }
 0xfe9   : > { %v2311_v51 = vmul.f32 %v3123_v50, %v2309_v49  ;;  %vm2317_vm9 = vweird.f32 %v3123_v50 }
 0xfea   : > { %vm2318_vm11 = vmor %vm2316_vm10, %vm2317_vm9 }
 0xfeb   : > { %v2312_v63 = vmul.f32 %v3123_v50, %v2311_v51 }
 0xfed   : > { %v2313_v52 = vmul.f32 0.5, %v2312_v63 }
 0xfef   : > { %v2314_v53 = vsub.f32 1.5, %v2313_v52 }
 0xff1   : > { %v2315_v54 = vmul.f32 %v3123_v50, %v2314_v53 }
 0xff3   : > { %v2319_v55 = vsel %vm2318_vm11, %v3123_v50, %v2315_v54 }
 0xff4   : > { %v2320_v58 = vmul.f32 %v2319_v55, %v2303_v46 }
 0xff6   : > { %v2322_v59 = vmul.f32 %v2321_v28, %v2320_v58 }
 0xff8   : > { %v2324_v21 = vadd.f32 %v2323_v56, %v2322_v59 }
 0xffa   : > { %2325 = vst.msk [vmem:[%s3409_s13] sm:$0xff] %vm914_vm4, %v2324_v21 }
 0xffb PF: > { %s3809_s24 = sld [smem:[#allocation5_spill]] }
 0xffc   : > { %s3810_s27 = sld [smem:[#allocation3_spill]] }
 0xffd   : > { %s3811_s28 = sld [smem:[#allocation4_spill]] }
 0xffe   : > { %s3812_s29 = sld [smem:[#allocation6_spill]] }
 0xfff   : > { %s3813_s30 = sld [smem:[#allocation7_spill]] }
0x1001   : > { %s28_s0 = sadd.s32 1, %s3809_s24  }
0x1002   : > { %p25_p8 = scmp.ge.s32.totalorder %s28_s0, 6  }
0x1004   :  { %27 = sbr.rel (!%p25_p8) target bundleno = 16 (0x10), region = 173 }

</bundles_post_ra>
